<compile_context>
chip_gen: v5e
topology: v5e:2x2
jax: 0.10.0
libtpu: 0.0.40
codegen_flags: <defaults>
</compile_context>

<pallas_src>
import math
import functools

import jax
import jax.numpy as jnp
from jax.experimental import pallas as pl
from jax.experimental.pallas import tpu as pltpu

LANE = 128


def round_up(x, m):
    return (x + m - 1) // m * m


# ----------------------------------------------------------------------------
# Single fused kernel: L encoder layers (post-norm, ReLU FFN) + final FC.
# grid = (num_batch_blocks,), "parallel".  Stacked per-layer weights are
# passed as constant-index full blocks (DMA'd once, VMEM-resident); the layer
# loop is a static in-kernel unroll.
# ----------------------------------------------------------------------------
def encoder_fc_kernel(x_ref, wqkv_ref, bqkv_ref, wo_ref, bo_ref,
                      ln1w_ref, ln1b_ref, w1_ref, b1_ref, w2_ref, b2_ref,
                      ln2w_ref, ln2b_ref, fcw_ref, fcb_ref, o_ref,
                      *, num_layers, num_heads, e_real):
    bf16 = jnp.bfloat16
    Bb, S, Ep = x_ref.shape
    M = Bb * S                              # batch folded into the matmul M dim
    H = num_heads
    Dp = wqkv_ref.shape[-1] // (3 * H)      # per-head lane-padded width (128)
    Vp = fcw_ref.shape[-1]
    inv_e = 1.0 / e_real                    # LN stats over the REAL width

    # Mask of the real (unpadded) embed columns, shared by every LayerNorm.
    col_mask = jax.lax.broadcasted_iota(jnp.int32, (1, Ep), 1) < e_real

    def layer_norm(res, w, b):
        # Two-pass mean / variance (review correctness concern); padded
        # columns are masked so statistics stay exact.
        mu = jnp.sum(res, axis=-1, keepdims=True) * inv_e
        d = jnp.where(col_mask, res - mu, 0.0)
        var = jnp.sum(d * d, axis=-1, keepdims=True) * inv_e
        return d * jax.lax.rsqrt(var + 1e-5) * w + b

    x = x_ref[...].reshape(M, Ep)           # f32, padded columns are zero

    for l in range(num_layers):             # static unroll; weights resident
        # --- fused QKV projection: ONE wide MXU matmul (N = 3*H*Dp) ---
        qkv = jnp.dot(x.astype(bf16), wqkv_ref[l],
                      preferred_element_type=jnp.float32) + bqkv_ref[l]
        qkv_b = qkv.astype(bf16)            # single bf16 cast; slice q/k/v below

        # --- per-head attention (1/sqrt(d_head) pre-folded into Q weights) ---
        # TODO(synk): for long sequences, tile over query/key blocks with an
        # online-softmax accumulator instead of the full (S, S) score matrix.
        ctx_heads = []
        for h in range(H):                  # static; lane-aligned 128-wide slices
            q = qkv_b[:, h * Dp:(h + 1) * Dp].reshape(Bb, S, Dp)
            k = qkv_b[:, (H + h) * Dp:(H + h + 1) * Dp].reshape(Bb, S, Dp)
            v = qkv_b[:, (2 * H + h) * Dp:(2 * H + h + 1) * Dp].reshape(Bb, S, Dp)
            s = jnp.einsum('bqd,bkd->bqk', q, k,
                           preferred_element_type=jnp.float32)
            s = s - jnp.max(s, axis=-1, keepdims=True)
            p = jnp.exp(s)
            p = p * pl.reciprocal(jnp.sum(p, axis=-1, keepdims=True), approx=True)
            ctx = jnp.einsum('bqk,bkd->bqd', p.astype(bf16), v,
                             preferred_element_type=jnp.float32)
            ctx_heads.append(ctx.reshape(M, Dp))
        # Pack heads along lanes -> ONE out-projection matmul (K = H*Dp); no
        # cross-head VPU reduction.
        ctx2d = jnp.concatenate(ctx_heads, axis=-1).astype(bf16)   # (M, H*Dp)
        attn = jnp.dot(ctx2d, wo_ref[l],
                       preferred_element_type=jnp.float32) + bo_ref[l]

        # --- residual + LayerNorm 1 ---
        ln1 = layer_norm(x + attn, ln1w_ref[l], ln1b_ref[l])

        # --- feed forward (Linear -> ReLU -> Linear) ---
        h1 = jnp.dot(ln1.astype(bf16), w1_ref[l],
                     preferred_element_type=jnp.float32) + b1_ref[l]
        h1 = jnp.maximum(h1, 0.0)
        ff = jnp.dot(h1.astype(bf16), w2_ref[l],
                     preferred_element_type=jnp.float32) + b2_ref[l]

        # --- residual + LayerNorm 2 ---
        x = layer_norm(ln1 + ff, ln2w_ref[l], ln2b_ref[l])

    # --- fused final Linear(embed -> vocab) ---
    # TODO(synk): for large vocabularies, tile the vocab axis (>=256-wide
    # tiles for the 256-wide MXU on v6e/v7x) with a grid axis instead.
    logits = jnp.dot(x.astype(bf16), fcw_ref[...],
                     preferred_element_type=jnp.float32) + fcb_ref[...]
    o_ref[...] = logits.reshape(Bb, S, Vp)


def encoder_fc(x, params, *, num_heads, embed_size, num_layers, block_b):
    B, S, Ep = x.shape
    Vp = params["fc_w"].shape[1]
    nblk = B // block_b

    weight_names = ("wqkv", "bqkv", "wo", "bo", "ln1w", "ln1b",
                    "w1", "b1", "w2", "b2", "ln2w", "ln2b", "fc_w", "fc_b")
    weights = [params[k] for k in weight_names]

    def const_spec(arr):
        # Full-array block with a constant index -> DMA'd once, kept resident
        # across grid steps (no per-batch-block re-streaming of weights).
        nd = arr.ndim
        return pl.BlockSpec(arr.shape, lambda i, _nd=nd: (0,) * _nd)

    kernel = functools.partial(encoder_fc_kernel, num_layers=num_layers,
                               num_heads=num_heads, e_real=embed_size)
    return pl.pallas_call(
        kernel,
        out_shape=jax.ShapeDtypeStruct((B, S, Vp), jnp.float32),
        grid=(nblk,),
        in_specs=[pl.BlockSpec((block_b, S, Ep), lambda i: (i, 0, 0))]
                 + [const_spec(w) for w in weights],
        out_specs=pl.BlockSpec((block_b, S, Vp), lambda i: (i, 0, 0)),
        compiler_params=pltpu.CompilerParams(
            dimension_semantics=("parallel",),
            vmem_limit_bytes=32 * 1024 * 1024),   # explicit budget (v7x: 64 MiB phys)
    )(x, *weights)


# ----------------------------------------------------------------------------
# Parameters (PyTorch-equivalent layout, pre-padded / packed for the kernel)
# ----------------------------------------------------------------------------
def positional_encoding_table(max_len, embed_size):
    position = jnp.arange(max_len, dtype=jnp.float32)[:, None]
    div_term = jnp.exp(jnp.arange(0, embed_size, 2, dtype=jnp.float32)
                       * (-math.log(10000.0) / embed_size))
    pe = jnp.zeros((max_len, embed_size), jnp.float32)
    pe = pe.at[:, 0::2].set(jnp.sin(position * div_term))
    pe = pe.at[:, 1::2].set(jnp.cos(position * div_term))
    return pe


def make_model(key, vocab_size, embed_size, num_heads, hidden_dim, num_layers,
               max_len):
    E, H = embed_size, num_heads
    Dh = E // H
    assert Dh <= LANE
    Ep = round_up(E, LANE)
    Dp = LANE                       # per-head lane-padded width
    Hp = round_up(hidden_dim, LANE)
    Vp = round_up(vocab_size, LANE)

    keys = jax.random.split(key, 3 + 8 * num_layers)
    ki = iter(keys)

    def init(shape, scale=0.02):
        return (scale * jax.random.normal(next(ki), shape)).astype(jnp.float32)

    def pad2(a, r, c):
        return jnp.pad(a, ((0, r - a.shape[0]), (0, c - a.shape[1])))

    embedding = pad2(init((vocab_size, E)), vocab_size, Ep)       # zero-padded
    pe = pad2(positional_encoding_table(max_len, E), max_len, Ep)

    stacks = {k: [] for k in ("wqkv", "bqkv", "wo", "bo", "ln1w", "ln1b",
                              "w1", "b1", "w2", "b2", "ln2w", "ln2b")}
    for _ in range(num_layers):
        wqkv = init((E, 3 * E))      # == PyTorch in_proj_weight.T
        bqkv = init((3 * E,))
        wo = init((E, E))            # == out_proj.weight.T
        bo = init((E,))
        w1 = init((E, hidden_dim))
        b1 = init((hidden_dim,))
        w2 = init((hidden_dim, E))
        b2 = init((E,))

        # Fused QKV weight packed as (Ep, 3*H*Dp): output lanes are
        # [group-major, head, padded d_head]; 1/sqrt(d_head) folded into Q.
        w = wqkv.reshape(E, 3, H, Dh)
        w = w.at[:, 0].multiply(1.0 / math.sqrt(Dh))
        w = jnp.pad(w, ((0, Ep - E), (0, 0), (0, 0), (0, Dp - Dh)))
        stacks["wqkv"].append(w.reshape(Ep, 3 * H * Dp))

        b = bqkv.reshape(3, H, Dh)
        b = b.at[0].multiply(1.0 / math.sqrt(Dh))
        b = jnp.pad(b, ((0, 0), (0, 0), (0, Dp - Dh)))
        stacks["bqkv"].append(b.reshape(1, 3 * H * Dp))

        # Out-projection packed as (H*Dp, Ep): single matmul over packed heads.
        wo_p = jnp.pad(wo.reshape(H, Dh, E), ((0, 0), (0, Dp - Dh), (0, Ep - E)))
        stacks["wo"].append(wo_p.reshape(H * Dp, Ep))
        stacks["bo"].append(jnp.pad(bo, (0, Ep - E))[None])

        stacks["ln1w"].append(jnp.pad(jnp.ones((E,), jnp.float32), (0, Ep - E))[None])
        stacks["ln1b"].append(jnp.zeros((1, Ep), jnp.float32))
        stacks["w1"].append(pad2(w1, Ep, Hp))
        stacks["b1"].append(jnp.pad(b1, (0, Hp - hidden_dim))[None])
        stacks["w2"].append(pad2(w2, Hp, Ep))
        stacks["b2"].append(jnp.pad(b2, (0, Ep - E))[None])
        stacks["ln2w"].append(jnp.pad(jnp.ones((E,), jnp.float32), (0, Ep - E))[None])
        stacks["ln2b"].append(jnp.zeros((1, Ep), jnp.float32))

    fc_w = pad2(init((E, vocab_size)), Ep, Vp).astype(jnp.bfloat16)
    fc_b = jnp.pad(init((vocab_size,)), (0, Vp - vocab_size))[None]

    params = {k: jnp.stack(v) for k, v in stacks.items()}
    for k in ("wqkv", "wo", "w1", "w2"):
        params[k] = params[k].astype(jnp.bfloat16)   # bf16 MXU inputs
    params.update(embedding=embedding, pe=pe, fc_w=fc_w, fc_b=fc_b)
    return params


# ----------------------------------------------------------------------------
# Forward pass
# ----------------------------------------------------------------------------
def transformer_forward(tokens, params, *, num_heads, embed_size, num_layers,
                        vocab_size):
    B, S = tokens.shape

    # Embedding gather * sqrt(E) + positional encoding in plain JAX (XLA fuses
    # it with the gather).  Reproduce the reference quirk: pe is indexed by
    # x.size(0) == batch and broadcast over the sequence.  Dropout = identity.
    x = jnp.take(params["embedding"], tokens, axis=0) * math.sqrt(embed_size)
    x = x + params["pe"][:B][:, None, :]

    # Keep >=2 "parallel" grid blocks when B >= 2 (v7x megacore) while folding
    # the rest of the batch into the matmul M dimension (MXU row utilization).
    block_b = max(1, B // 2)
    Bp = round_up(B, block_b)
    if Bp != B:
        x = jnp.pad(x, ((0, Bp - B), (0, 0), (0, 0)))

    logits = encoder_fc(x, params, num_heads=num_heads, embed_size=embed_size,
                        num_layers=num_layers, block_b=block_b)
    return logits[:B, :, :vocab_size]


if __name__ == "__main__":
    vocab_size = 32
    embed_size = 32
    num_heads = 4
    hidden_dim = 64
    num_layers = 2
    batch = 2
    seq = 8
    max_len = 64

    key = jax.random.PRNGKey(0)
    pkey, tkey = jax.random.split(key)
    params = make_model(pkey, vocab_size, embed_size, num_heads,
                        hidden_dim, num_layers, max_len)
    tokens = jax.random.randint(tkey, (batch, seq), 0, vocab_size, dtype=jnp.int32)

    fwd = jax.jit(functools.partial(transformer_forward, num_heads=num_heads,
                                    embed_size=embed_size,
                                    num_layers=num_layers,
                                    vocab_size=vocab_size))
    out = jax.block_until_ready(fwd(tokens, params))
    assert out.shape == (batch, seq, vocab_size)
    assert bool(jnp.all(jnp.isfinite(out)))
    print("KERNEL_OK")
</pallas_src>

<mosaic_0001>
module attributes {stable_mosaic.version = 11 : i64} {
  func.func @encoder_fc_kernel(%arg0: i32, %arg1: memref<1x8x128xf32, #tpu.memory_space<vmem>>, %arg2: memref<2x128x1536xbf16, #tpu.memory_space<vmem>>, %arg3: memref<2x1x1536xf32, #tpu.memory_space<vmem>>, %arg4: memref<2x512x128xbf16, #tpu.memory_space<vmem>>, %arg5: memref<2x1x128xf32, #tpu.memory_space<vmem>>, %arg6: memref<2x1x128xf32, #tpu.memory_space<vmem>>, %arg7: memref<2x1x128xf32, #tpu.memory_space<vmem>>, %arg8: memref<2x128x128xbf16, #tpu.memory_space<vmem>>, %arg9: memref<2x1x128xf32, #tpu.memory_space<vmem>>, %arg10: memref<2x128x128xbf16, #tpu.memory_space<vmem>>, %arg11: memref<2x1x128xf32, #tpu.memory_space<vmem>>, %arg12: memref<2x1x128xf32, #tpu.memory_space<vmem>>, %arg13: memref<2x1x128xf32, #tpu.memory_space<vmem>>, %arg14: memref<128x128xbf16, #tpu.memory_space<vmem>>, %arg15: memref<1x128xf32, #tpu.memory_space<vmem>>, %arg16: memref<1x8x128xf32, #tpu.memory_space<vmem>>) attributes {dimension_semantics = [#tpu.dimension_semantics<parallel>], iteration_bounds = array<i64: 2>, scalar_prefetch = 0 : i64, scratch_operands = 0 : i64, tpu.core_type = #tpu.core_type<tc>, window_params = [{transform_indices = @transform_0, window_bounds = array<i64: 1, 8, 128>}, {pipeline_mode = #tpu.pipeline_mode<synchronous>, transform_indices = @transform_1, window_bounds = array<i64: 2, 128, 1536>}, {pipeline_mode = #tpu.pipeline_mode<synchronous>, transform_indices = @transform_2, window_bounds = array<i64: 2, 1, 1536>}, {pipeline_mode = #tpu.pipeline_mode<synchronous>, transform_indices = @transform_3, window_bounds = array<i64: 2, 512, 128>}, {pipeline_mode = #tpu.pipeline_mode<synchronous>, transform_indices = @transform_4, window_bounds = array<i64: 2, 1, 128>}, {pipeline_mode = #tpu.pipeline_mode<synchronous>, transform_indices = @transform_5, window_bounds = array<i64: 2, 1, 128>}, {pipeline_mode = #tpu.pipeline_mode<synchronous>, transform_indices = @transform_6, window_bounds = array<i64: 2, 1, 128>}, {pipeline_mode = #tpu.pipeline_mode<synchronous>, transform_indices = @transform_7, window_bounds = array<i64: 2, 128, 128>}, {pipeline_mode = #tpu.pipeline_mode<synchronous>, transform_indices = @transform_8, window_bounds = array<i64: 2, 1, 128>}, {pipeline_mode = #tpu.pipeline_mode<synchronous>, transform_indices = @transform_9, window_bounds = array<i64: 2, 128, 128>}, {pipeline_mode = #tpu.pipeline_mode<synchronous>, transform_indices = @transform_10, window_bounds = array<i64: 2, 1, 128>}, {pipeline_mode = #tpu.pipeline_mode<synchronous>, transform_indices = @transform_11, window_bounds = array<i64: 2, 1, 128>}, {pipeline_mode = #tpu.pipeline_mode<synchronous>, transform_indices = @transform_12, window_bounds = array<i64: 2, 1, 128>}, {pipeline_mode = #tpu.pipeline_mode<synchronous>, transform_indices = @transform_13, window_bounds = array<i64: 128, 128>}, {pipeline_mode = #tpu.pipeline_mode<synchronous>, transform_indices = @transform_14, window_bounds = array<i64: 1, 128>}, {transform_indices = @transform_15, window_bounds = array<i64: 1, 8, 128>}]} {
    %0 = tpu.iota {dimensions = array<i32: 1>} : vector<1x128xi32>
    %c32_i32 = arith.constant 32 : i32
    %1 = vector.broadcast %c32_i32 : i32 to vector<1x128xi32>
    %2 = arith.cmpi slt, %0, %1 : vector<1x128xi32>
    %c0 = arith.constant 0 : index
    %c0_0 = arith.constant 0 : index
    %c0_1 = arith.constant 0 : index
    %3 = vector.load %arg1[%c0, %c0_0, %c0_1] : memref<1x8x128xf32, #tpu.memory_space<vmem>>, vector<1x8x128xf32>
    %4 = vector.shape_cast %3 : vector<1x8x128xf32> to vector<8x128xf32>
    %5 = arith.truncf %4 : vector<8x128xf32> to vector<8x128xbf16>
    %c0_2 = arith.constant 0 : index
    %c0_3 = arith.constant 0 : index
    %c0_4 = arith.constant 0 : index
    %6 = vector.load %arg2[%c0_2, %c0_3, %c0_4] : memref<2x128x1536xbf16, #tpu.memory_space<vmem>>, vector<1x128x1536xbf16>
    %7 = vector.shape_cast %6 : vector<1x128x1536xbf16> to vector<128x1536xbf16>
    %cst = arith.constant dense<0.000000e+00> : vector<8x1536xf32>
    %8 = tpu.matmul %5, %7, %cst {dimension_numbers = #tpu.dot_dimension_numbers<[1], [0], [0], [1], [0, 0, 1, 1], [], []>} : vector<8x128xbf16>, vector<128x1536xbf16>, vector<8x1536xf32> -> vector<8x1536xf32>
    %c0_5 = arith.constant 0 : index
    %c0_6 = arith.constant 0 : index
    %c0_7 = arith.constant 0 : index
    %9 = vector.load %arg3[%c0_5, %c0_6, %c0_7] : memref<2x1x1536xf32, #tpu.memory_space<vmem>>, vector<1x1x1536xf32>
    %10 = vector.shape_cast %9 : vector<1x1x1536xf32> to vector<1x1536xf32>
    %11 = vector.broadcast %10 : vector<1x1536xf32> to vector<8x1536xf32>
    %12 = arith.addf %8, %11 : vector<8x1536xf32>
    %13 = arith.truncf %12 : vector<8x1536xf32> to vector<8x1536xbf16>
    %14 = vector.extract_strided_slice %13 {offsets = [0, 0], sizes = [8, 128], strides = [1, 1]} : vector<8x1536xbf16> to vector<8x128xbf16>
    %15 = vector.shape_cast %14 : vector<8x128xbf16> to vector<1x8x128xbf16>
    %16 = vector.extract_strided_slice %13 {offsets = [0, 512], sizes = [8, 128], strides = [1, 1]} : vector<8x1536xbf16> to vector<8x128xbf16>
    %17 = vector.shape_cast %16 : vector<8x128xbf16> to vector<1x8x128xbf16>
    %18 = vector.extract_strided_slice %13 {offsets = [0, 1024], sizes = [8, 128], strides = [1, 1]} : vector<8x1536xbf16> to vector<8x128xbf16>
    %19 = vector.shape_cast %18 : vector<8x128xbf16> to vector<1x8x128xbf16>
    "tpu.trace_start"() <{level = 10 : i32, message = "bqd,bkd->bqk"}> : () -> ()
    %cst_8 = arith.constant dense<0.000000e+00> : vector<1x8x8xf32>
    %20 = tpu.matmul %15, %17, %cst_8 {dimension_numbers = #tpu.dot_dimension_numbers<[2], [2], [1], [1], [0, 0, 0, 1, 1, 1], [0], [0]>} : vector<1x8x128xbf16>, vector<1x8x128xbf16>, vector<1x8x8xf32> -> vector<1x8x8xf32>
    "tpu.trace_stop"() : () -> ()
    %cst_9 = arith.constant dense<0xFF800000> : vector<1x8xf32>
    %21 = vector.multi_reduction <maximumf>, %20, %cst_9 [2] : vector<1x8x8xf32> to vector<1x8xf32>
    %22 = vector.shape_cast %21 : vector<1x8xf32> to vector<1x8x1xf32>
    %23 = vector.broadcast %22 : vector<1x8x1xf32> to vector<1x8x8xf32>
    %24 = arith.subf %20, %23 : vector<1x8x8xf32>
    %25 = math.exp %24 : vector<1x8x8xf32>
    %cst_10 = arith.constant dense<0.000000e+00> : vector<1x8xf32>
    %26 = vector.multi_reduction <add>, %25, %cst_10 [2] : vector<1x8x8xf32> to vector<1x8xf32>
    %27 = vector.shape_cast %26 : vector<1x8xf32> to vector<1x8x1xf32>
    %28 = tpu.reciprocal %27 {approx = true} : vector<1x8x1xf32> -> vector<1x8x1xf32>
    %29 = vector.broadcast %28 : vector<1x8x1xf32> to vector<1x8x8xf32>
    %30 = arith.mulf %25, %29 : vector<1x8x8xf32>
    %31 = arith.truncf %30 : vector<1x8x8xf32> to vector<1x8x8xbf16>
    "tpu.trace_start"() <{level = 10 : i32, message = "bqk,bkd->bqd"}> : () -> ()
    %cst_11 = arith.constant dense<0.000000e+00> : vector<1x8x128xf32>
    %32 = tpu.matmul %31, %19, %cst_11 {dimension_numbers = #tpu.dot_dimension_numbers<[2], [1], [1], [2], [0, 0, 0, 1, 1, 2], [0], [0]>} : vector<1x8x8xbf16>, vector<1x8x128xbf16>, vector<1x8x128xf32> -> vector<1x8x128xf32>
    "tpu.trace_stop"() : () -> ()
    %33 = vector.shape_cast %32 : vector<1x8x128xf32> to vector<8x128xf32>
    %34 = vector.extract_strided_slice %13 {offsets = [0, 128], sizes = [8, 128], strides = [1, 1]} : vector<8x1536xbf16> to vector<8x128xbf16>
    %35 = vector.shape_cast %34 : vector<8x128xbf16> to vector<1x8x128xbf16>
    %36 = vector.extract_strided_slice %13 {offsets = [0, 640], sizes = [8, 128], strides = [1, 1]} : vector<8x1536xbf16> to vector<8x128xbf16>
    %37 = vector.shape_cast %36 : vector<8x128xbf16> to vector<1x8x128xbf16>
    %38 = vector.extract_strided_slice %13 {offsets = [0, 1152], sizes = [8, 128], strides = [1, 1]} : vector<8x1536xbf16> to vector<8x128xbf16>
    %39 = vector.shape_cast %38 : vector<8x128xbf16> to vector<1x8x128xbf16>
    "tpu.trace_start"() <{level = 10 : i32, message = "bqd,bkd->bqk"}> : () -> ()
    %cst_12 = arith.constant dense<0.000000e+00> : vector<1x8x8xf32>
    %40 = tpu.matmul %35, %37, %cst_12 {dimension_numbers = #tpu.dot_dimension_numbers<[2], [2], [1], [1], [0, 0, 0, 1, 1, 1], [0], [0]>} : vector<1x8x128xbf16>, vector<1x8x128xbf16>, vector<1x8x8xf32> -> vector<1x8x8xf32>
    "tpu.trace_stop"() : () -> ()
    %cst_13 = arith.constant dense<0xFF800000> : vector<1x8xf32>
    %41 = vector.multi_reduction <maximumf>, %40, %cst_13 [2] : vector<1x8x8xf32> to vector<1x8xf32>
    %42 = vector.shape_cast %41 : vector<1x8xf32> to vector<1x8x1xf32>
    %43 = vector.broadcast %42 : vector<1x8x1xf32> to vector<1x8x8xf32>
    %44 = arith.subf %40, %43 : vector<1x8x8xf32>
    %45 = math.exp %44 : vector<1x8x8xf32>
    %cst_14 = arith.constant dense<0.000000e+00> : vector<1x8xf32>
    %46 = vector.multi_reduction <add>, %45, %cst_14 [2] : vector<1x8x8xf32> to vector<1x8xf32>
    %47 = vector.shape_cast %46 : vector<1x8xf32> to vector<1x8x1xf32>
    %48 = tpu.reciprocal %47 {approx = true} : vector<1x8x1xf32> -> vector<1x8x1xf32>
    %49 = vector.broadcast %48 : vector<1x8x1xf32> to vector<1x8x8xf32>
    %50 = arith.mulf %45, %49 : vector<1x8x8xf32>
    %51 = arith.truncf %50 : vector<1x8x8xf32> to vector<1x8x8xbf16>
    "tpu.trace_start"() <{level = 10 : i32, message = "bqk,bkd->bqd"}> : () -> ()
    %cst_15 = arith.constant dense<0.000000e+00> : vector<1x8x128xf32>
    %52 = tpu.matmul %51, %39, %cst_15 {dimension_numbers = #tpu.dot_dimension_numbers<[2], [1], [1], [2], [0, 0, 0, 1, 1, 2], [0], [0]>} : vector<1x8x8xbf16>, vector<1x8x128xbf16>, vector<1x8x128xf32> -> vector<1x8x128xf32>
    "tpu.trace_stop"() : () -> ()
    %53 = vector.shape_cast %52 : vector<1x8x128xf32> to vector<8x128xf32>
    %54 = vector.extract_strided_slice %13 {offsets = [0, 256], sizes = [8, 128], strides = [1, 1]} : vector<8x1536xbf16> to vector<8x128xbf16>
    %55 = vector.shape_cast %54 : vector<8x128xbf16> to vector<1x8x128xbf16>
    %56 = vector.extract_strided_slice %13 {offsets = [0, 768], sizes = [8, 128], strides = [1, 1]} : vector<8x1536xbf16> to vector<8x128xbf16>
    %57 = vector.shape_cast %56 : vector<8x128xbf16> to vector<1x8x128xbf16>
    %58 = vector.extract_strided_slice %13 {offsets = [0, 1280], sizes = [8, 128], strides = [1, 1]} : vector<8x1536xbf16> to vector<8x128xbf16>
    %59 = vector.shape_cast %58 : vector<8x128xbf16> to vector<1x8x128xbf16>
    "tpu.trace_start"() <{level = 10 : i32, message = "bqd,bkd->bqk"}> : () -> ()
    %cst_16 = arith.constant dense<0.000000e+00> : vector<1x8x8xf32>
    %60 = tpu.matmul %55, %57, %cst_16 {dimension_numbers = #tpu.dot_dimension_numbers<[2], [2], [1], [1], [0, 0, 0, 1, 1, 1], [0], [0]>} : vector<1x8x128xbf16>, vector<1x8x128xbf16>, vector<1x8x8xf32> -> vector<1x8x8xf32>
    "tpu.trace_stop"() : () -> ()
    %cst_17 = arith.constant dense<0xFF800000> : vector<1x8xf32>
    %61 = vector.multi_reduction <maximumf>, %60, %cst_17 [2] : vector<1x8x8xf32> to vector<1x8xf32>
    %62 = vector.shape_cast %61 : vector<1x8xf32> to vector<1x8x1xf32>
    %63 = vector.broadcast %62 : vector<1x8x1xf32> to vector<1x8x8xf32>
    %64 = arith.subf %60, %63 : vector<1x8x8xf32>
    %65 = math.exp %64 : vector<1x8x8xf32>
    %cst_18 = arith.constant dense<0.000000e+00> : vector<1x8xf32>
    %66 = vector.multi_reduction <add>, %65, %cst_18 [2] : vector<1x8x8xf32> to vector<1x8xf32>
    %67 = vector.shape_cast %66 : vector<1x8xf32> to vector<1x8x1xf32>
    %68 = tpu.reciprocal %67 {approx = true} : vector<1x8x1xf32> -> vector<1x8x1xf32>
    %69 = vector.broadcast %68 : vector<1x8x1xf32> to vector<1x8x8xf32>
    %70 = arith.mulf %65, %69 : vector<1x8x8xf32>
    %71 = arith.truncf %70 : vector<1x8x8xf32> to vector<1x8x8xbf16>
    "tpu.trace_start"() <{level = 10 : i32, message = "bqk,bkd->bqd"}> : () -> ()
    %cst_19 = arith.constant dense<0.000000e+00> : vector<1x8x128xf32>
    %72 = tpu.matmul %71, %59, %cst_19 {dimension_numbers = #tpu.dot_dimension_numbers<[2], [1], [1], [2], [0, 0, 0, 1, 1, 2], [0], [0]>} : vector<1x8x8xbf16>, vector<1x8x128xbf16>, vector<1x8x128xf32> -> vector<1x8x128xf32>
    "tpu.trace_stop"() : () -> ()
    %73 = vector.shape_cast %72 : vector<1x8x128xf32> to vector<8x128xf32>
    %74 = vector.extract_strided_slice %13 {offsets = [0, 384], sizes = [8, 128], strides = [1, 1]} : vector<8x1536xbf16> to vector<8x128xbf16>
    %75 = vector.shape_cast %74 : vector<8x128xbf16> to vector<1x8x128xbf16>
    %76 = vector.extract_strided_slice %13 {offsets = [0, 896], sizes = [8, 128], strides = [1, 1]} : vector<8x1536xbf16> to vector<8x128xbf16>
    %77 = vector.shape_cast %76 : vector<8x128xbf16> to vector<1x8x128xbf16>
    %78 = vector.extract_strided_slice %13 {offsets = [0, 1408], sizes = [8, 128], strides = [1, 1]} : vector<8x1536xbf16> to vector<8x128xbf16>
    %79 = vector.shape_cast %78 : vector<8x128xbf16> to vector<1x8x128xbf16>
    "tpu.trace_start"() <{level = 10 : i32, message = "bqd,bkd->bqk"}> : () -> ()
    %cst_20 = arith.constant dense<0.000000e+00> : vector<1x8x8xf32>
    %80 = tpu.matmul %75, %77, %cst_20 {dimension_numbers = #tpu.dot_dimension_numbers<[2], [2], [1], [1], [0, 0, 0, 1, 1, 1], [0], [0]>} : vector<1x8x128xbf16>, vector<1x8x128xbf16>, vector<1x8x8xf32> -> vector<1x8x8xf32>
    "tpu.trace_stop"() : () -> ()
    %cst_21 = arith.constant dense<0xFF800000> : vector<1x8xf32>
    %81 = vector.multi_reduction <maximumf>, %80, %cst_21 [2] : vector<1x8x8xf32> to vector<1x8xf32>
    %82 = vector.shape_cast %81 : vector<1x8xf32> to vector<1x8x1xf32>
    %83 = vector.broadcast %82 : vector<1x8x1xf32> to vector<1x8x8xf32>
    %84 = arith.subf %80, %83 : vector<1x8x8xf32>
    %85 = math.exp %84 : vector<1x8x8xf32>
    %cst_22 = arith.constant dense<0.000000e+00> : vector<1x8xf32>
    %86 = vector.multi_reduction <add>, %85, %cst_22 [2] : vector<1x8x8xf32> to vector<1x8xf32>
    %87 = vector.shape_cast %86 : vector<1x8xf32> to vector<1x8x1xf32>
    %88 = tpu.reciprocal %87 {approx = true} : vector<1x8x1xf32> -> vector<1x8x1xf32>
    %89 = vector.broadcast %88 : vector<1x8x1xf32> to vector<1x8x8xf32>
    %90 = arith.mulf %85, %89 : vector<1x8x8xf32>
    %91 = arith.truncf %90 : vector<1x8x8xf32> to vector<1x8x8xbf16>
    "tpu.trace_start"() <{level = 10 : i32, message = "bqk,bkd->bqd"}> : () -> ()
    %cst_23 = arith.constant dense<0.000000e+00> : vector<1x8x128xf32>
    %92 = tpu.matmul %91, %79, %cst_23 {dimension_numbers = #tpu.dot_dimension_numbers<[2], [1], [1], [2], [0, 0, 0, 1, 1, 2], [0], [0]>} : vector<1x8x8xbf16>, vector<1x8x128xbf16>, vector<1x8x128xf32> -> vector<1x8x128xf32>
    "tpu.trace_stop"() : () -> ()
    %93 = vector.shape_cast %92 : vector<1x8x128xf32> to vector<8x128xf32>
    %94 = tpu.concatenate %33, %53, %73, %93 in 1 : vector<8x128xf32>, vector<8x128xf32>, vector<8x128xf32>, vector<8x128xf32> -> vector<8x512xf32>
    %95 = arith.truncf %94 : vector<8x512xf32> to vector<8x512xbf16>
    %c0_24 = arith.constant 0 : index
    %c0_25 = arith.constant 0 : index
    %c0_26 = arith.constant 0 : index
    %96 = vector.load %arg4[%c0_24, %c0_25, %c0_26] : memref<2x512x128xbf16, #tpu.memory_space<vmem>>, vector<1x512x128xbf16>
    %97 = vector.shape_cast %96 : vector<1x512x128xbf16> to vector<512x128xbf16>
    %cst_27 = arith.constant dense<0.000000e+00> : vector<8x128xf32>
    %98 = tpu.matmul %95, %97, %cst_27 {dimension_numbers = #tpu.dot_dimension_numbers<[1], [0], [0], [1], [0, 0, 1, 1], [], []>} : vector<8x512xbf16>, vector<512x128xbf16>, vector<8x128xf32> -> vector<8x128xf32>
    %c0_28 = arith.constant 0 : index
    %c0_29 = arith.constant 0 : index
    %c0_30 = arith.constant 0 : index
    %99 = vector.load %arg5[%c0_28, %c0_29, %c0_30] : memref<2x1x128xf32, #tpu.memory_space<vmem>>, vector<1x1x128xf32>
    %100 = vector.shape_cast %99 : vector<1x1x128xf32> to vector<1x128xf32>
    %101 = vector.broadcast %100 : vector<1x128xf32> to vector<8x128xf32>
    %102 = arith.addf %98, %101 : vector<8x128xf32>
    %103 = arith.addf %4, %102 : vector<8x128xf32>
    %c0_31 = arith.constant 0 : index
    %c0_32 = arith.constant 0 : index
    %c0_33 = arith.constant 0 : index
    %104 = vector.load %arg6[%c0_31, %c0_32, %c0_33] : memref<2x1x128xf32, #tpu.memory_space<vmem>>, vector<1x1x128xf32>
    %105 = vector.shape_cast %104 : vector<1x1x128xf32> to vector<1x128xf32>
    %c0_34 = arith.constant 0 : index
    %c0_35 = arith.constant 0 : index
    %c0_36 = arith.constant 0 : index
    %106 = vector.load %arg7[%c0_34, %c0_35, %c0_36] : memref<2x1x128xf32, #tpu.memory_space<vmem>>, vector<1x1x128xf32>
    %107 = vector.shape_cast %106 : vector<1x1x128xf32> to vector<1x128xf32>
    %cst_37 = arith.constant dense<0.000000e+00> : vector<8xf32>
    %108 = vector.multi_reduction <add>, %103, %cst_37 [1] : vector<8x128xf32> to vector<8xf32>
    %109 = vector.shape_cast %108 : vector<8xf32> to vector<8x1xf32>
    %cst_38 = arith.constant 3.125000e-02 : f32
    %110 = vector.broadcast %cst_38 : f32 to vector<8x1xf32>
    %111 = arith.mulf %109, %110 : vector<8x1xf32>
    %112 = vector.broadcast %111 : vector<8x1xf32> to vector<8x128xf32>
    %113 = arith.subf %103, %112 : vector<8x128xf32>
    %cst_39 = arith.constant 0.000000e+00 : f32
    %114 = vector.shape_cast %2 : vector<1x128xi1> to vector<1x128xi1>
    %115 = vector.broadcast %114 : vector<1x128xi1> to vector<8x128xi1>
    %116 = vector.broadcast %cst_39 : f32 to vector<8x128xf32>
    %117 = arith.select %115, %113, %116 : vector<8x128xi1>, vector<8x128xf32>
    %118 = arith.mulf %117, %117 : vector<8x128xf32>
    %cst_40 = arith.constant dense<0.000000e+00> : vector<8xf32>
    %119 = vector.multi_reduction <add>, %118, %cst_40 [1] : vector<8x128xf32> to vector<8xf32>
    %120 = vector.shape_cast %119 : vector<8xf32> to vector<8x1xf32>
    %cst_41 = arith.constant 3.125000e-02 : f32
    %121 = vector.broadcast %cst_41 : f32 to vector<8x1xf32>
    %122 = arith.mulf %120, %121 : vector<8x1xf32>
    %cst_42 = arith.constant 9.99999974E-6 : f32
    %123 = vector.broadcast %cst_42 : f32 to vector<8x1xf32>
    %124 = arith.addf %122, %123 : vector<8x1xf32>
    %125 = math.rsqrt %124 : vector<8x1xf32>
    %126 = vector.broadcast %125 : vector<8x1xf32> to vector<8x128xf32>
    %127 = arith.mulf %117, %126 : vector<8x128xf32>
    %128 = vector.broadcast %105 : vector<1x128xf32> to vector<8x128xf32>
    %129 = arith.mulf %127, %128 : vector<8x128xf32>
    %130 = vector.broadcast %107 : vector<1x128xf32> to vector<8x128xf32>
    %131 = arith.addf %129, %130 : vector<8x128xf32>
    %132 = arith.truncf %131 : vector<8x128xf32> to vector<8x128xbf16>
    %c0_43 = arith.constant 0 : index
    %c0_44 = arith.constant 0 : index
    %c0_45 = arith.constant 0 : index
    %133 = vector.load %arg8[%c0_43, %c0_44, %c0_45] : memref<2x128x128xbf16, #tpu.memory_space<vmem>>, vector<1x128x128xbf16>
    %134 = vector.shape_cast %133 : vector<1x128x128xbf16> to vector<128x128xbf16>
    %cst_46 = arith.constant dense<0.000000e+00> : vector<8x128xf32>
    %135 = tpu.matmul %132, %134, %cst_46 {dimension_numbers = #tpu.dot_dimension_numbers<[1], [0], [0], [1], [0, 0, 1, 1], [], []>} : vector<8x128xbf16>, vector<128x128xbf16>, vector<8x128xf32> -> vector<8x128xf32>
    %c0_47 = arith.constant 0 : index
    %c0_48 = arith.constant 0 : index
    %c0_49 = arith.constant 0 : index
    %136 = vector.load %arg9[%c0_47, %c0_48, %c0_49] : memref<2x1x128xf32, #tpu.memory_space<vmem>>, vector<1x1x128xf32>
    %137 = vector.shape_cast %136 : vector<1x1x128xf32> to vector<1x128xf32>
    %138 = vector.broadcast %137 : vector<1x128xf32> to vector<8x128xf32>
    %139 = arith.addf %135, %138 : vector<8x128xf32>
    %cst_50 = arith.constant 0.000000e+00 : f32
    %140 = vector.broadcast %cst_50 : f32 to vector<8x128xf32>
    %141 = arith.maximumf %139, %140 : vector<8x128xf32>
    %142 = arith.truncf %141 : vector<8x128xf32> to vector<8x128xbf16>
    %c0_51 = arith.constant 0 : index
    %c0_52 = arith.constant 0 : index
    %c0_53 = arith.constant 0 : index
    %143 = vector.load %arg10[%c0_51, %c0_52, %c0_53] : memref<2x128x128xbf16, #tpu.memory_space<vmem>>, vector<1x128x128xbf16>
    %144 = vector.shape_cast %143 : vector<1x128x128xbf16> to vector<128x128xbf16>
    %cst_54 = arith.constant dense<0.000000e+00> : vector<8x128xf32>
    %145 = tpu.matmul %142, %144, %cst_54 {dimension_numbers = #tpu.dot_dimension_numbers<[1], [0], [0], [1], [0, 0, 1, 1], [], []>} : vector<8x128xbf16>, vector<128x128xbf16>, vector<8x128xf32> -> vector<8x128xf32>
    %c0_55 = arith.constant 0 : index
    %c0_56 = arith.constant 0 : index
    %c0_57 = arith.constant 0 : index
    %146 = vector.load %arg11[%c0_55, %c0_56, %c0_57] : memref<2x1x128xf32, #tpu.memory_space<vmem>>, vector<1x1x128xf32>
    %147 = vector.shape_cast %146 : vector<1x1x128xf32> to vector<1x128xf32>
    %148 = vector.broadcast %147 : vector<1x128xf32> to vector<8x128xf32>
    %149 = arith.addf %145, %148 : vector<8x128xf32>
    %150 = arith.addf %131, %149 : vector<8x128xf32>
    %c0_58 = arith.constant 0 : index
    %c0_59 = arith.constant 0 : index
    %c0_60 = arith.constant 0 : index
    %151 = vector.load %arg12[%c0_58, %c0_59, %c0_60] : memref<2x1x128xf32, #tpu.memory_space<vmem>>, vector<1x1x128xf32>
    %152 = vector.shape_cast %151 : vector<1x1x128xf32> to vector<1x128xf32>
    %c0_61 = arith.constant 0 : index
    %c0_62 = arith.constant 0 : index
    %c0_63 = arith.constant 0 : index
    %153 = vector.load %arg13[%c0_61, %c0_62, %c0_63] : memref<2x1x128xf32, #tpu.memory_space<vmem>>, vector<1x1x128xf32>
    %154 = vector.shape_cast %153 : vector<1x1x128xf32> to vector<1x128xf32>
    %cst_64 = arith.constant dense<0.000000e+00> : vector<8xf32>
    %155 = vector.multi_reduction <add>, %150, %cst_64 [1] : vector<8x128xf32> to vector<8xf32>
    %156 = vector.shape_cast %155 : vector<8xf32> to vector<8x1xf32>
    %cst_65 = arith.constant 3.125000e-02 : f32
    %157 = vector.broadcast %cst_65 : f32 to vector<8x1xf32>
    %158 = arith.mulf %156, %157 : vector<8x1xf32>
    %159 = vector.broadcast %158 : vector<8x1xf32> to vector<8x128xf32>
    %160 = arith.subf %150, %159 : vector<8x128xf32>
    %cst_66 = arith.constant 0.000000e+00 : f32
    %161 = vector.shape_cast %2 : vector<1x128xi1> to vector<1x128xi1>
    %162 = vector.broadcast %161 : vector<1x128xi1> to vector<8x128xi1>
    %163 = vector.broadcast %cst_66 : f32 to vector<8x128xf32>
    %164 = arith.select %162, %160, %163 : vector<8x128xi1>, vector<8x128xf32>
    %165 = arith.mulf %164, %164 : vector<8x128xf32>
    %cst_67 = arith.constant dense<0.000000e+00> : vector<8xf32>
    %166 = vector.multi_reduction <add>, %165, %cst_67 [1] : vector<8x128xf32> to vector<8xf32>
    %167 = vector.shape_cast %166 : vector<8xf32> to vector<8x1xf32>
    %cst_68 = arith.constant 3.125000e-02 : f32
    %168 = vector.broadcast %cst_68 : f32 to vector<8x1xf32>
    %169 = arith.mulf %167, %168 : vector<8x1xf32>
    %cst_69 = arith.constant 9.99999974E-6 : f32
    %170 = vector.broadcast %cst_69 : f32 to vector<8x1xf32>
    %171 = arith.addf %169, %170 : vector<8x1xf32>
    %172 = math.rsqrt %171 : vector<8x1xf32>
    %173 = vector.broadcast %172 : vector<8x1xf32> to vector<8x128xf32>
    %174 = arith.mulf %164, %173 : vector<8x128xf32>
    %175 = vector.broadcast %152 : vector<1x128xf32> to vector<8x128xf32>
    %176 = arith.mulf %174, %175 : vector<8x128xf32>
    %177 = vector.broadcast %154 : vector<1x128xf32> to vector<8x128xf32>
    %178 = arith.addf %176, %177 : vector<8x128xf32>
    %179 = arith.truncf %178 : vector<8x128xf32> to vector<8x128xbf16>
    %c1 = arith.constant 1 : index
    %c0_70 = arith.constant 0 : index
    %c0_71 = arith.constant 0 : index
    %180 = vector.load %arg2[%c1, %c0_70, %c0_71] : memref<2x128x1536xbf16, #tpu.memory_space<vmem>>, vector<1x128x1536xbf16>
    %181 = vector.shape_cast %180 : vector<1x128x1536xbf16> to vector<128x1536xbf16>
    %cst_72 = arith.constant dense<0.000000e+00> : vector<8x1536xf32>
    %182 = tpu.matmul %179, %181, %cst_72 {dimension_numbers = #tpu.dot_dimension_numbers<[1], [0], [0], [1], [0, 0, 1, 1], [], []>} : vector<8x128xbf16>, vector<128x1536xbf16>, vector<8x1536xf32> -> vector<8x1536xf32>
    %c1_73 = arith.constant 1 : index
    %c0_74 = arith.constant 0 : index
    %c0_75 = arith.constant 0 : index
    %183 = vector.load %arg3[%c1_73, %c0_74, %c0_75] : memref<2x1x1536xf32, #tpu.memory_space<vmem>>, vector<1x1x1536xf32>
    %184 = vector.shape_cast %183 : vector<1x1x1536xf32> to vector<1x1536xf32>
    %185 = vector.broadcast %184 : vector<1x1536xf32> to vector<8x1536xf32>
    %186 = arith.addf %182, %185 : vector<8x1536xf32>
    %187 = arith.truncf %186 : vector<8x1536xf32> to vector<8x1536xbf16>
    %188 = vector.extract_strided_slice %187 {offsets = [0, 0], sizes = [8, 128], strides = [1, 1]} : vector<8x1536xbf16> to vector<8x128xbf16>
    %189 = vector.shape_cast %188 : vector<8x128xbf16> to vector<1x8x128xbf16>
    %190 = vector.extract_strided_slice %187 {offsets = [0, 512], sizes = [8, 128], strides = [1, 1]} : vector<8x1536xbf16> to vector<8x128xbf16>
    %191 = vector.shape_cast %190 : vector<8x128xbf16> to vector<1x8x128xbf16>
    %192 = vector.extract_strided_slice %187 {offsets = [0, 1024], sizes = [8, 128], strides = [1, 1]} : vector<8x1536xbf16> to vector<8x128xbf16>
    %193 = vector.shape_cast %192 : vector<8x128xbf16> to vector<1x8x128xbf16>
    "tpu.trace_start"() <{level = 10 : i32, message = "bqd,bkd->bqk"}> : () -> ()
    %cst_76 = arith.constant dense<0.000000e+00> : vector<1x8x8xf32>
    %194 = tpu.matmul %189, %191, %cst_76 {dimension_numbers = #tpu.dot_dimension_numbers<[2], [2], [1], [1], [0, 0, 0, 1, 1, 1], [0], [0]>} : vector<1x8x128xbf16>, vector<1x8x128xbf16>, vector<1x8x8xf32> -> vector<1x8x8xf32>
    "tpu.trace_stop"() : () -> ()
    %cst_77 = arith.constant dense<0xFF800000> : vector<1x8xf32>
    %195 = vector.multi_reduction <maximumf>, %194, %cst_77 [2] : vector<1x8x8xf32> to vector<1x8xf32>
    %196 = vector.shape_cast %195 : vector<1x8xf32> to vector<1x8x1xf32>
    %197 = vector.broadcast %196 : vector<1x8x1xf32> to vector<1x8x8xf32>
    %198 = arith.subf %194, %197 : vector<1x8x8xf32>
    %199 = math.exp %198 : vector<1x8x8xf32>
    %cst_78 = arith.constant dense<0.000000e+00> : vector<1x8xf32>
    %200 = vector.multi_reduction <add>, %199, %cst_78 [2] : vector<1x8x8xf32> to vector<1x8xf32>
    %201 = vector.shape_cast %200 : vector<1x8xf32> to vector<1x8x1xf32>
    %202 = tpu.reciprocal %201 {approx = true} : vector<1x8x1xf32> -> vector<1x8x1xf32>
    %203 = vector.broadcast %202 : vector<1x8x1xf32> to vector<1x8x8xf32>
    %204 = arith.mulf %199, %203 : vector<1x8x8xf32>
    %205 = arith.truncf %204 : vector<1x8x8xf32> to vector<1x8x8xbf16>
    "tpu.trace_start"() <{level = 10 : i32, message = "bqk,bkd->bqd"}> : () -> ()
    %cst_79 = arith.constant dense<0.000000e+00> : vector<1x8x128xf32>
    %206 = tpu.matmul %205, %193, %cst_79 {dimension_numbers = #tpu.dot_dimension_numbers<[2], [1], [1], [2], [0, 0, 0, 1, 1, 2], [0], [0]>} : vector<1x8x8xbf16>, vector<1x8x128xbf16>, vector<1x8x128xf32> -> vector<1x8x128xf32>
    "tpu.trace_stop"() : () -> ()
    %207 = vector.shape_cast %206 : vector<1x8x128xf32> to vector<8x128xf32>
    %208 = vector.extract_strided_slice %187 {offsets = [0, 128], sizes = [8, 128], strides = [1, 1]} : vector<8x1536xbf16> to vector<8x128xbf16>
    %209 = vector.shape_cast %208 : vector<8x128xbf16> to vector<1x8x128xbf16>
    %210 = vector.extract_strided_slice %187 {offsets = [0, 640], sizes = [8, 128], strides = [1, 1]} : vector<8x1536xbf16> to vector<8x128xbf16>
    %211 = vector.shape_cast %210 : vector<8x128xbf16> to vector<1x8x128xbf16>
    %212 = vector.extract_strided_slice %187 {offsets = [0, 1152], sizes = [8, 128], strides = [1, 1]} : vector<8x1536xbf16> to vector<8x128xbf16>
    %213 = vector.shape_cast %212 : vector<8x128xbf16> to vector<1x8x128xbf16>
    "tpu.trace_start"() <{level = 10 : i32, message = "bqd,bkd->bqk"}> : () -> ()
    %cst_80 = arith.constant dense<0.000000e+00> : vector<1x8x8xf32>
    %214 = tpu.matmul %209, %211, %cst_80 {dimension_numbers = #tpu.dot_dimension_numbers<[2], [2], [1], [1], [0, 0, 0, 1, 1, 1], [0], [0]>} : vector<1x8x128xbf16>, vector<1x8x128xbf16>, vector<1x8x8xf32> -> vector<1x8x8xf32>
    "tpu.trace_stop"() : () -> ()
    %cst_81 = arith.constant dense<0xFF800000> : vector<1x8xf32>
    %215 = vector.multi_reduction <maximumf>, %214, %cst_81 [2] : vector<1x8x8xf32> to vector<1x8xf32>
    %216 = vector.shape_cast %215 : vector<1x8xf32> to vector<1x8x1xf32>
    %217 = vector.broadcast %216 : vector<1x8x1xf32> to vector<1x8x8xf32>
    %218 = arith.subf %214, %217 : vector<1x8x8xf32>
    %219 = math.exp %218 : vector<1x8x8xf32>
    %cst_82 = arith.constant dense<0.000000e+00> : vector<1x8xf32>
    %220 = vector.multi_reduction <add>, %219, %cst_82 [2] : vector<1x8x8xf32> to vector<1x8xf32>
    %221 = vector.shape_cast %220 : vector<1x8xf32> to vector<1x8x1xf32>
    %222 = tpu.reciprocal %221 {approx = true} : vector<1x8x1xf32> -> vector<1x8x1xf32>
    %223 = vector.broadcast %222 : vector<1x8x1xf32> to vector<1x8x8xf32>
    %224 = arith.mulf %219, %223 : vector<1x8x8xf32>
    %225 = arith.truncf %224 : vector<1x8x8xf32> to vector<1x8x8xbf16>
    "tpu.trace_start"() <{level = 10 : i32, message = "bqk,bkd->bqd"}> : () -> ()
    %cst_83 = arith.constant dense<0.000000e+00> : vector<1x8x128xf32>
    %226 = tpu.matmul %225, %213, %cst_83 {dimension_numbers = #tpu.dot_dimension_numbers<[2], [1], [1], [2], [0, 0, 0, 1, 1, 2], [0], [0]>} : vector<1x8x8xbf16>, vector<1x8x128xbf16>, vector<1x8x128xf32> -> vector<1x8x128xf32>
    "tpu.trace_stop"() : () -> ()
    %227 = vector.shape_cast %226 : vector<1x8x128xf32> to vector<8x128xf32>
    %228 = vector.extract_strided_slice %187 {offsets = [0, 256], sizes = [8, 128], strides = [1, 1]} : vector<8x1536xbf16> to vector<8x128xbf16>
    %229 = vector.shape_cast %228 : vector<8x128xbf16> to vector<1x8x128xbf16>
    %230 = vector.extract_strided_slice %187 {offsets = [0, 768], sizes = [8, 128], strides = [1, 1]} : vector<8x1536xbf16> to vector<8x128xbf16>
    %231 = vector.shape_cast %230 : vector<8x128xbf16> to vector<1x8x128xbf16>
    %232 = vector.extract_strided_slice %187 {offsets = [0, 1280], sizes = [8, 128], strides = [1, 1]} : vector<8x1536xbf16> to vector<8x128xbf16>
    %233 = vector.shape_cast %232 : vector<8x128xbf16> to vector<1x8x128xbf16>
    "tpu.trace_start"() <{level = 10 : i32, message = "bqd,bkd->bqk"}> : () -> ()
    %cst_84 = arith.constant dense<0.000000e+00> : vector<1x8x8xf32>
    %234 = tpu.matmul %229, %231, %cst_84 {dimension_numbers = #tpu.dot_dimension_numbers<[2], [2], [1], [1], [0, 0, 0, 1, 1, 1], [0], [0]>} : vector<1x8x128xbf16>, vector<1x8x128xbf16>, vector<1x8x8xf32> -> vector<1x8x8xf32>
    "tpu.trace_stop"() : () -> ()
    %cst_85 = arith.constant dense<0xFF800000> : vector<1x8xf32>
    %235 = vector.multi_reduction <maximumf>, %234, %cst_85 [2] : vector<1x8x8xf32> to vector<1x8xf32>
    %236 = vector.shape_cast %235 : vector<1x8xf32> to vector<1x8x1xf32>
    %237 = vector.broadcast %236 : vector<1x8x1xf32> to vector<1x8x8xf32>
    %238 = arith.subf %234, %237 : vector<1x8x8xf32>
    %239 = math.exp %238 : vector<1x8x8xf32>
    %cst_86 = arith.constant dense<0.000000e+00> : vector<1x8xf32>
    %240 = vector.multi_reduction <add>, %239, %cst_86 [2] : vector<1x8x8xf32> to vector<1x8xf32>
    %241 = vector.shape_cast %240 : vector<1x8xf32> to vector<1x8x1xf32>
    %242 = tpu.reciprocal %241 {approx = true} : vector<1x8x1xf32> -> vector<1x8x1xf32>
    %243 = vector.broadcast %242 : vector<1x8x1xf32> to vector<1x8x8xf32>
    %244 = arith.mulf %239, %243 : vector<1x8x8xf32>
    %245 = arith.truncf %244 : vector<1x8x8xf32> to vector<1x8x8xbf16>
    "tpu.trace_start"() <{level = 10 : i32, message = "bqk,bkd->bqd"}> : () -> ()
    %cst_87 = arith.constant dense<0.000000e+00> : vector<1x8x128xf32>
    %246 = tpu.matmul %245, %233, %cst_87 {dimension_numbers = #tpu.dot_dimension_numbers<[2], [1], [1], [2], [0, 0, 0, 1, 1, 2], [0], [0]>} : vector<1x8x8xbf16>, vector<1x8x128xbf16>, vector<1x8x128xf32> -> vector<1x8x128xf32>
    "tpu.trace_stop"() : () -> ()
    %247 = vector.shape_cast %246 : vector<1x8x128xf32> to vector<8x128xf32>
    %248 = vector.extract_strided_slice %187 {offsets = [0, 384], sizes = [8, 128], strides = [1, 1]} : vector<8x1536xbf16> to vector<8x128xbf16>
    %249 = vector.shape_cast %248 : vector<8x128xbf16> to vector<1x8x128xbf16>
    %250 = vector.extract_strided_slice %187 {offsets = [0, 896], sizes = [8, 128], strides = [1, 1]} : vector<8x1536xbf16> to vector<8x128xbf16>
    %251 = vector.shape_cast %250 : vector<8x128xbf16> to vector<1x8x128xbf16>
    %252 = vector.extract_strided_slice %187 {offsets = [0, 1408], sizes = [8, 128], strides = [1, 1]} : vector<8x1536xbf16> to vector<8x128xbf16>
    %253 = vector.shape_cast %252 : vector<8x128xbf16> to vector<1x8x128xbf16>
    "tpu.trace_start"() <{level = 10 : i32, message = "bqd,bkd->bqk"}> : () -> ()
    %cst_88 = arith.constant dense<0.000000e+00> : vector<1x8x8xf32>
    %254 = tpu.matmul %249, %251, %cst_88 {dimension_numbers = #tpu.dot_dimension_numbers<[2], [2], [1], [1], [0, 0, 0, 1, 1, 1], [0], [0]>} : vector<1x8x128xbf16>, vector<1x8x128xbf16>, vector<1x8x8xf32> -> vector<1x8x8xf32>
    "tpu.trace_stop"() : () -> ()
    %cst_89 = arith.constant dense<0xFF800000> : vector<1x8xf32>
    %255 = vector.multi_reduction <maximumf>, %254, %cst_89 [2] : vector<1x8x8xf32> to vector<1x8xf32>
    %256 = vector.shape_cast %255 : vector<1x8xf32> to vector<1x8x1xf32>
    %257 = vector.broadcast %256 : vector<1x8x1xf32> to vector<1x8x8xf32>
    %258 = arith.subf %254, %257 : vector<1x8x8xf32>
    %259 = math.exp %258 : vector<1x8x8xf32>
    %cst_90 = arith.constant dense<0.000000e+00> : vector<1x8xf32>
    %260 = vector.multi_reduction <add>, %259, %cst_90 [2] : vector<1x8x8xf32> to vector<1x8xf32>
    %261 = vector.shape_cast %260 : vector<1x8xf32> to vector<1x8x1xf32>
    %262 = tpu.reciprocal %261 {approx = true} : vector<1x8x1xf32> -> vector<1x8x1xf32>
    %263 = vector.broadcast %262 : vector<1x8x1xf32> to vector<1x8x8xf32>
    %264 = arith.mulf %259, %263 : vector<1x8x8xf32>
    %265 = arith.truncf %264 : vector<1x8x8xf32> to vector<1x8x8xbf16>
    "tpu.trace_start"() <{level = 10 : i32, message = "bqk,bkd->bqd"}> : () -> ()
    %cst_91 = arith.constant dense<0.000000e+00> : vector<1x8x128xf32>
    %266 = tpu.matmul %265, %253, %cst_91 {dimension_numbers = #tpu.dot_dimension_numbers<[2], [1], [1], [2], [0, 0, 0, 1, 1, 2], [0], [0]>} : vector<1x8x8xbf16>, vector<1x8x128xbf16>, vector<1x8x128xf32> -> vector<1x8x128xf32>
    "tpu.trace_stop"() : () -> ()
    %267 = vector.shape_cast %266 : vector<1x8x128xf32> to vector<8x128xf32>
    %268 = tpu.concatenate %207, %227, %247, %267 in 1 : vector<8x128xf32>, vector<8x128xf32>, vector<8x128xf32>, vector<8x128xf32> -> vector<8x512xf32>
    %269 = arith.truncf %268 : vector<8x512xf32> to vector<8x512xbf16>
    %c1_92 = arith.constant 1 : index
    %c0_93 = arith.constant 0 : index
    %c0_94 = arith.constant 0 : index
    %270 = vector.load %arg4[%c1_92, %c0_93, %c0_94] : memref<2x512x128xbf16, #tpu.memory_space<vmem>>, vector<1x512x128xbf16>
    %271 = vector.shape_cast %270 : vector<1x512x128xbf16> to vector<512x128xbf16>
    %cst_95 = arith.constant dense<0.000000e+00> : vector<8x128xf32>
    %272 = tpu.matmul %269, %271, %cst_95 {dimension_numbers = #tpu.dot_dimension_numbers<[1], [0], [0], [1], [0, 0, 1, 1], [], []>} : vector<8x512xbf16>, vector<512x128xbf16>, vector<8x128xf32> -> vector<8x128xf32>
    %c1_96 = arith.constant 1 : index
    %c0_97 = arith.constant 0 : index
    %c0_98 = arith.constant 0 : index
    %273 = vector.load %arg5[%c1_96, %c0_97, %c0_98] : memref<2x1x128xf32, #tpu.memory_space<vmem>>, vector<1x1x128xf32>
    %274 = vector.shape_cast %273 : vector<1x1x128xf32> to vector<1x128xf32>
    %275 = vector.broadcast %274 : vector<1x128xf32> to vector<8x128xf32>
    %276 = arith.addf %272, %275 : vector<8x128xf32>
    %277 = arith.addf %178, %276 : vector<8x128xf32>
    %c1_99 = arith.constant 1 : index
    %c0_100 = arith.constant 0 : index
    %c0_101 = arith.constant 0 : index
    %278 = vector.load %arg6[%c1_99, %c0_100, %c0_101] : memref<2x1x128xf32, #tpu.memory_space<vmem>>, vector<1x1x128xf32>
    %279 = vector.shape_cast %278 : vector<1x1x128xf32> to vector<1x128xf32>
    %c1_102 = arith.constant 1 : index
    %c0_103 = arith.constant 0 : index
    %c0_104 = arith.constant 0 : index
    %280 = vector.load %arg7[%c1_102, %c0_103, %c0_104] : memref<2x1x128xf32, #tpu.memory_space<vmem>>, vector<1x1x128xf32>
    %281 = vector.shape_cast %280 : vector<1x1x128xf32> to vector<1x128xf32>
    %cst_105 = arith.constant dense<0.000000e+00> : vector<8xf32>
    %282 = vector.multi_reduction <add>, %277, %cst_105 [1] : vector<8x128xf32> to vector<8xf32>
    %283 = vector.shape_cast %282 : vector<8xf32> to vector<8x1xf32>
    %cst_106 = arith.constant 3.125000e-02 : f32
    %284 = vector.broadcast %cst_106 : f32 to vector<8x1xf32>
    %285 = arith.mulf %283, %284 : vector<8x1xf32>
    %286 = vector.broadcast %285 : vector<8x1xf32> to vector<8x128xf32>
    %287 = arith.subf %277, %286 : vector<8x128xf32>
    %cst_107 = arith.constant 0.000000e+00 : f32
    %288 = vector.shape_cast %2 : vector<1x128xi1> to vector<1x128xi1>
    %289 = vector.broadcast %288 : vector<1x128xi1> to vector<8x128xi1>
    %290 = vector.broadcast %cst_107 : f32 to vector<8x128xf32>
    %291 = arith.select %289, %287, %290 : vector<8x128xi1>, vector<8x128xf32>
    %292 = arith.mulf %291, %291 : vector<8x128xf32>
    %cst_108 = arith.constant dense<0.000000e+00> : vector<8xf32>
    %293 = vector.multi_reduction <add>, %292, %cst_108 [1] : vector<8x128xf32> to vector<8xf32>
    %294 = vector.shape_cast %293 : vector<8xf32> to vector<8x1xf32>
    %cst_109 = arith.constant 3.125000e-02 : f32
    %295 = vector.broadcast %cst_109 : f32 to vector<8x1xf32>
    %296 = arith.mulf %294, %295 : vector<8x1xf32>
    %cst_110 = arith.constant 9.99999974E-6 : f32
    %297 = vector.broadcast %cst_110 : f32 to vector<8x1xf32>
    %298 = arith.addf %296, %297 : vector<8x1xf32>
    %299 = math.rsqrt %298 : vector<8x1xf32>
    %300 = vector.broadcast %299 : vector<8x1xf32> to vector<8x128xf32>
    %301 = arith.mulf %291, %300 : vector<8x128xf32>
    %302 = vector.broadcast %279 : vector<1x128xf32> to vector<8x128xf32>
    %303 = arith.mulf %301, %302 : vector<8x128xf32>
    %304 = vector.broadcast %281 : vector<1x128xf32> to vector<8x128xf32>
    %305 = arith.addf %303, %304 : vector<8x128xf32>
    %306 = arith.truncf %305 : vector<8x128xf32> to vector<8x128xbf16>
    %c1_111 = arith.constant 1 : index
    %c0_112 = arith.constant 0 : index
    %c0_113 = arith.constant 0 : index
    %307 = vector.load %arg8[%c1_111, %c0_112, %c0_113] : memref<2x128x128xbf16, #tpu.memory_space<vmem>>, vector<1x128x128xbf16>
    %308 = vector.shape_cast %307 : vector<1x128x128xbf16> to vector<128x128xbf16>
    %cst_114 = arith.constant dense<0.000000e+00> : vector<8x128xf32>
    %309 = tpu.matmul %306, %308, %cst_114 {dimension_numbers = #tpu.dot_dimension_numbers<[1], [0], [0], [1], [0, 0, 1, 1], [], []>} : vector<8x128xbf16>, vector<128x128xbf16>, vector<8x128xf32> -> vector<8x128xf32>
    %c1_115 = arith.constant 1 : index
    %c0_116 = arith.constant 0 : index
    %c0_117 = arith.constant 0 : index
    %310 = vector.load %arg9[%c1_115, %c0_116, %c0_117] : memref<2x1x128xf32, #tpu.memory_space<vmem>>, vector<1x1x128xf32>
    %311 = vector.shape_cast %310 : vector<1x1x128xf32> to vector<1x128xf32>
    %312 = vector.broadcast %311 : vector<1x128xf32> to vector<8x128xf32>
    %313 = arith.addf %309, %312 : vector<8x128xf32>
    %cst_118 = arith.constant 0.000000e+00 : f32
    %314 = vector.broadcast %cst_118 : f32 to vector<8x128xf32>
    %315 = arith.maximumf %313, %314 : vector<8x128xf32>
    %316 = arith.truncf %315 : vector<8x128xf32> to vector<8x128xbf16>
    %c1_119 = arith.constant 1 : index
    %c0_120 = arith.constant 0 : index
    %c0_121 = arith.constant 0 : index
    %317 = vector.load %arg10[%c1_119, %c0_120, %c0_121] : memref<2x128x128xbf16, #tpu.memory_space<vmem>>, vector<1x128x128xbf16>
    %318 = vector.shape_cast %317 : vector<1x128x128xbf16> to vector<128x128xbf16>
    %cst_122 = arith.constant dense<0.000000e+00> : vector<8x128xf32>
    %319 = tpu.matmul %316, %318, %cst_122 {dimension_numbers = #tpu.dot_dimension_numbers<[1], [0], [0], [1], [0, 0, 1, 1], [], []>} : vector<8x128xbf16>, vector<128x128xbf16>, vector<8x128xf32> -> vector<8x128xf32>
    %c1_123 = arith.constant 1 : index
    %c0_124 = arith.constant 0 : index
    %c0_125 = arith.constant 0 : index
    %320 = vector.load %arg11[%c1_123, %c0_124, %c0_125] : memref<2x1x128xf32, #tpu.memory_space<vmem>>, vector<1x1x128xf32>
    %321 = vector.shape_cast %320 : vector<1x1x128xf32> to vector<1x128xf32>
    %322 = vector.broadcast %321 : vector<1x128xf32> to vector<8x128xf32>
    %323 = arith.addf %319, %322 : vector<8x128xf32>
    %324 = arith.addf %305, %323 : vector<8x128xf32>
    %c1_126 = arith.constant 1 : index
    %c0_127 = arith.constant 0 : index
    %c0_128 = arith.constant 0 : index
    %325 = vector.load %arg12[%c1_126, %c0_127, %c0_128] : memref<2x1x128xf32, #tpu.memory_space<vmem>>, vector<1x1x128xf32>
    %326 = vector.shape_cast %325 : vector<1x1x128xf32> to vector<1x128xf32>
    %c1_129 = arith.constant 1 : index
    %c0_130 = arith.constant 0 : index
    %c0_131 = arith.constant 0 : index
    %327 = vector.load %arg13[%c1_129, %c0_130, %c0_131] : memref<2x1x128xf32, #tpu.memory_space<vmem>>, vector<1x1x128xf32>
    %328 = vector.shape_cast %327 : vector<1x1x128xf32> to vector<1x128xf32>
    %cst_132 = arith.constant dense<0.000000e+00> : vector<8xf32>
    %329 = vector.multi_reduction <add>, %324, %cst_132 [1] : vector<8x128xf32> to vector<8xf32>
    %330 = vector.shape_cast %329 : vector<8xf32> to vector<8x1xf32>
    %cst_133 = arith.constant 3.125000e-02 : f32
    %331 = vector.broadcast %cst_133 : f32 to vector<8x1xf32>
    %332 = arith.mulf %330, %331 : vector<8x1xf32>
    %333 = vector.broadcast %332 : vector<8x1xf32> to vector<8x128xf32>
    %334 = arith.subf %324, %333 : vector<8x128xf32>
    %cst_134 = arith.constant 0.000000e+00 : f32
    %335 = vector.shape_cast %2 : vector<1x128xi1> to vector<1x128xi1>
    %336 = vector.broadcast %335 : vector<1x128xi1> to vector<8x128xi1>
    %337 = vector.broadcast %cst_134 : f32 to vector<8x128xf32>
    %338 = arith.select %336, %334, %337 : vector<8x128xi1>, vector<8x128xf32>
    %339 = arith.mulf %338, %338 : vector<8x128xf32>
    %cst_135 = arith.constant dense<0.000000e+00> : vector<8xf32>
    %340 = vector.multi_reduction <add>, %339, %cst_135 [1] : vector<8x128xf32> to vector<8xf32>
    %341 = vector.shape_cast %340 : vector<8xf32> to vector<8x1xf32>
    %cst_136 = arith.constant 3.125000e-02 : f32
    %342 = vector.broadcast %cst_136 : f32 to vector<8x1xf32>
    %343 = arith.mulf %341, %342 : vector<8x1xf32>
    %cst_137 = arith.constant 9.99999974E-6 : f32
    %344 = vector.broadcast %cst_137 : f32 to vector<8x1xf32>
    %345 = arith.addf %343, %344 : vector<8x1xf32>
    %346 = math.rsqrt %345 : vector<8x1xf32>
    %347 = vector.broadcast %346 : vector<8x1xf32> to vector<8x128xf32>
    %348 = arith.mulf %338, %347 : vector<8x128xf32>
    %349 = vector.broadcast %326 : vector<1x128xf32> to vector<8x128xf32>
    %350 = arith.mulf %348, %349 : vector<8x128xf32>
    %351 = vector.broadcast %328 : vector<1x128xf32> to vector<8x128xf32>
    %352 = arith.addf %350, %351 : vector<8x128xf32>
    %353 = arith.truncf %352 : vector<8x128xf32> to vector<8x128xbf16>
    %c0_138 = arith.constant 0 : index
    %c0_139 = arith.constant 0 : index
    %354 = vector.load %arg14[%c0_138, %c0_139] : memref<128x128xbf16, #tpu.memory_space<vmem>>, vector<128x128xbf16>
    %cst_140 = arith.constant dense<0.000000e+00> : vector<8x128xf32>
    %355 = tpu.matmul %353, %354, %cst_140 {dimension_numbers = #tpu.dot_dimension_numbers<[1], [0], [0], [1], [0, 0, 1, 1], [], []>} : vector<8x128xbf16>, vector<128x128xbf16>, vector<8x128xf32> -> vector<8x128xf32>
    %c0_141 = arith.constant 0 : index
    %c0_142 = arith.constant 0 : index
    %356 = vector.load %arg15[%c0_141, %c0_142] : memref<1x128xf32, #tpu.memory_space<vmem>>, vector<1x128xf32>
    %357 = vector.broadcast %356 : vector<1x128xf32> to vector<8x128xf32>
    %358 = arith.addf %355, %357 : vector<8x128xf32>
    %359 = vector.shape_cast %358 : vector<8x128xf32> to vector<1x8x128xf32>
    %c0_143 = arith.constant 0 : index
    %c0_144 = arith.constant 0 : index
    %c0_145 = arith.constant 0 : index
    %360 = vector.load %arg16[%c0_143, %c0_144, %c0_145] : memref<1x8x128xf32, #tpu.memory_space<vmem>>, vector<1x8x128xf32>
    tpu.vector_store %arg16[%c0_143, %c0_144, %c0_145], %359 {strides = array<i32>} : memref<1x8x128xf32, #tpu.memory_space<vmem>>, vector<1x8x128xf32>,
    return
  }
  func.func @transform_0(%arg0: i32) -> (i32, i32, i32) {
    %c0_i32 = arith.constant 0 : i32
    %c0_i32_0 = arith.constant 0 : i32
    %c0_i32_1 = arith.constant 0 : i32
    return %arg0, %c0_i32, %c0_i32_0 : i32, i32, i32
  }
  func.func @transform_1(%arg0: i32) -> (i32, i32, i32) {
    %c0_i32 = arith.constant 0 : i32
    %c0_i32_0 = arith.constant 0 : i32
    %c0_i32_1 = arith.constant 0 : i32
    %c0_i32_2 = arith.constant 0 : i32
    return %c0_i32, %c0_i32_0, %c0_i32_1 : i32, i32, i32
  }
  func.func @transform_2(%arg0: i32) -> (i32, i32, i32) {
    %c0_i32 = arith.constant 0 : i32
    %c0_i32_0 = arith.constant 0 : i32
    %c0_i32_1 = arith.constant 0 : i32
    %c0_i32_2 = arith.constant 0 : i32
    return %c0_i32, %c0_i32_0, %c0_i32_1 : i32, i32, i32
  }
  func.func @transform_3(%arg0: i32) -> (i32, i32, i32) {
    %c0_i32 = arith.constant 0 : i32
    %c0_i32_0 = arith.constant 0 : i32
    %c0_i32_1 = arith.constant 0 : i32
    %c0_i32_2 = arith.constant 0 : i32
    return %c0_i32, %c0_i32_0, %c0_i32_1 : i32, i32, i32
  }
  func.func @transform_4(%arg0: i32) -> (i32, i32, i32) {
    %c0_i32 = arith.constant 0 : i32
    %c0_i32_0 = arith.constant 0 : i32
    %c0_i32_1 = arith.constant 0 : i32
    %c0_i32_2 = arith.constant 0 : i32
    return %c0_i32, %c0_i32_0, %c0_i32_1 : i32, i32, i32
  }
  func.func @transform_5(%arg0: i32) -> (i32, i32, i32) {
    %c0_i32 = arith.constant 0 : i32
    %c0_i32_0 = arith.constant 0 : i32
    %c0_i32_1 = arith.constant 0 : i32
    %c0_i32_2 = arith.constant 0 : i32
    return %c0_i32, %c0_i32_0, %c0_i32_1 : i32, i32, i32
  }
  func.func @transform_6(%arg0: i32) -> (i32, i32, i32) {
    %c0_i32 = arith.constant 0 : i32
    %c0_i32_0 = arith.constant 0 : i32
    %c0_i32_1 = arith.constant 0 : i32
    %c0_i32_2 = arith.constant 0 : i32
    return %c0_i32, %c0_i32_0, %c0_i32_1 : i32, i32, i32
  }
  func.func @transform_7(%arg0: i32) -> (i32, i32, i32) {
    %c0_i32 = arith.constant 0 : i32
    %c0_i32_0 = arith.constant 0 : i32
    %c0_i32_1 = arith.constant 0 : i32
    %c0_i32_2 = arith.constant 0 : i32
    return %c0_i32, %c0_i32_0, %c0_i32_1 : i32, i32, i32
  }
  func.func @transform_8(%arg0: i32) -> (i32, i32, i32) {
    %c0_i32 = arith.constant 0 : i32
    %c0_i32_0 = arith.constant 0 : i32
    %c0_i32_1 = arith.constant 0 : i32
    %c0_i32_2 = arith.constant 0 : i32
    return %c0_i32, %c0_i32_0, %c0_i32_1 : i32, i32, i32
  }
  func.func @transform_9(%arg0: i32) -> (i32, i32, i32) {
    %c0_i32 = arith.constant 0 : i32
    %c0_i32_0 = arith.constant 0 : i32
    %c0_i32_1 = arith.constant 0 : i32
    %c0_i32_2 = arith.constant 0 : i32
    return %c0_i32, %c0_i32_0, %c0_i32_1 : i32, i32, i32
  }
  func.func @transform_10(%arg0: i32) -> (i32, i32, i32) {
    %c0_i32 = arith.constant 0 : i32
    %c0_i32_0 = arith.constant 0 : i32
    %c0_i32_1 = arith.constant 0 : i32
    %c0_i32_2 = arith.constant 0 : i32
    return %c0_i32, %c0_i32_0, %c0_i32_1 : i32, i32, i32
  }
  func.func @transform_11(%arg0: i32) -> (i32, i32, i32) {
    %c0_i32 = arith.constant 0 : i32
    %c0_i32_0 = arith.constant 0 : i32
    %c0_i32_1 = arith.constant 0 : i32
    %c0_i32_2 = arith.constant 0 : i32
    return %c0_i32, %c0_i32_0, %c0_i32_1 : i32, i32, i32
  }
  func.func @transform_12(%arg0: i32) -> (i32, i32, i32) {
    %c0_i32 = arith.constant 0 : i32
    %c0_i32_0 = arith.constant 0 : i32
    %c0_i32_1 = arith.constant 0 : i32
    %c0_i32_2 = arith.constant 0 : i32
    return %c0_i32, %c0_i32_0, %c0_i32_1 : i32, i32, i32
  }
  func.func @transform_13(%arg0: i32) -> (i32, i32) {
    %c0_i32 = arith.constant 0 : i32
    %c0_i32_0 = arith.constant 0 : i32
    %c0_i32_1 = arith.constant 0 : i32
    return %c0_i32, %c0_i32_0 : i32, i32
  }
  func.func @transform_14(%arg0: i32) -> (i32, i32) {
    %c0_i32 = arith.constant 0 : i32
    %c0_i32_0 = arith.constant 0 : i32
    %c0_i32_1 = arith.constant 0 : i32
    return %c0_i32, %c0_i32_0 : i32, i32
  }
  func.func @transform_15(%arg0: i32) -> (i32, i32, i32) {
    %c0_i32 = arith.constant 0 : i32
    %c0_i32_0 = arith.constant 0 : i32
    %c0_i32_1 = arith.constant 0 : i32
    return %arg0, %c0_i32, %c0_i32_0 : i32, i32, i32
  }
}

</mosaic_0001>

<bundles_post_ra>
// kernel: transformer_forward.1
= control target key start
LH: loop header
LB: loop body
LE: loop exit
PB: predicated region body
PF: predicated region fallthrough
CT: control target
= control target key end

     0   :  { %s6089_s0 = inlined_call_operand.vmem [shape: f32[2,8,128], index: 0, kind: input, shape index: {}]   ;;  %s6090_s1 = inlined_call_operand.hbm [shape: bf16[2,128,1536], index: 1, kind: input, shape index: {}]   ;;  %s6091_s2 = inlined_call_operand.hbm [shape: f32[2,1,1536], index: 2, kind: input, shape index: {}]   ;;  %s6092_s3 = inlined_call_operand.hbm [shape: bf16[2,512,128], index: 3, kind: input, shape index: {}]   ;;  %s6093_s4 = inlined_call_operand.vmem [shape: f32[2,1,128], index: 4, kind: input, shape index: {}]   ;;  %s6094_s5 = inlined_call_operand.vmem [shape: f32[2,1,128], index: 5, kind: input, shape index: {}]   ;;  %s6095_s6 = inlined_call_operand.vmem [shape: f32[2,1,128], index: 6, kind: input, shape index: {}]   ;;  %s6096_s7 = inlined_call_operand.vmem [shape: bf16[2,128,128], index: 7, kind: input, shape index: {}]   ;;  %s6097_s8 = inlined_call_operand.vmem [shape: f32[2,1,128], index: 8, kind: input, shape index: {}]   ;;  %s6098_s9 = inlined_call_operand.hbm [shape: bf16[2,128,128], index: 9, kind: input, shape index: {}]   ;;  %s6099_s10 = inlined_call_operand.vmem [shape: f32[2,1,128], index: 10, kind: input, shape index: {}]   ;;  %s6100_s11 = inlined_call_operand.vmem [shape: f32[2,1,128], index: 11, kind: input, shape index: {}]   ;;  %s6101_s12 = inlined_call_operand.vmem [shape: f32[2,1,128], index: 12, kind: input, shape index: {}]   ;;  %s6102_s13 = inlined_call_operand.vmem [shape: bf16[128,128], index: 13, kind: input, shape index: {}]   ;;  %s6103_s14 = inlined_call_operand.vmem [shape: f32[1,128], index: 14, kind: input, shape index: {}]   ;;  %s6104_s15 = inlined_call_operand.hbm [shape: f32[2,8,128], index: 15, kind: output, shape index: {}]  }
   0x1   :  { %6115 = sst [smem:[#allocation23_spill]] %s6090_s1 }
   0x2   :  { %6116 = sst [smem:[#allocation24_spill]] %s6091_s2 }
   0x3   :  { %6117 = sst [smem:[#allocation25_spill]] %s6103_s14 }
   0x4   :  { %6118 = sst [smem:[#allocation26_spill]] %s6104_s15 }
   0x5   :  { %20 = vsyncpa [#allocation3], 0 }
   0x6   :  { %21 = vsyncpa [#allocation6], 0 }
   0x7   :  { %22 = vsyncpa [#allocation9], 0 }
   0x8   :  { %23 = vsyncpa [#allocation4], 0 }
   0x9   :  { %25 = vsyncpa [#allocation4 + $0x1], 0  ;;  %s5742_s18 = smov 0   ;;  %s5744_s19 = smov 0  }
   0xa   :  { %s5746_s20 = smov 0   ;;  %s5748_s21 = smov 0  }
   0xb LB: > { %6119 = sst [smem:[#allocation15_spill]] %s5638_s18  ;;  %s5763_s22 = sadd.s32 4294967295, %s5650_s21   ;;  %s5650_s21 = sphi %s5748_s21, %s6140_s21   ;;  %s5646_s20 = sphi %s5746_s20, %s6143_s20   ;;  %s5642_s19 = sphi %s5744_s19, %s6142_s19   ;;  %s5638_s18 = sphi %s5742_s18, %s6141_s18  }
   0xc   : > { %6120 = sst [smem:[#allocation16_spill]] %s5642_s19  ;;  %s3785_s23 = sadd.s32 4294967294, %s5650_s21  }
   0xd   : > { %6121 = sst [smem:[#allocation17_spill]] %s5646_s20  ;;  %s5767_s24 = sadd.s32 1, %s5650_s21  }
   0xe   : > { %6122 = sst [smem:[#allocation18_spill]] %s5650_s21  ;;  %s358_s25 = sadd.s32 1, %s5646_s20 }
   0xf   : > { %6123 = sst [smem:[#allocation19_spill]] %s5767_s24  ;;  %s355_s26 = ssub.s32 %s5650_s21, %s5767_s24 }
  0x10   : > { %p368_p0 = scmp.ne.s32.totalorder %s5646_s20, %s5642_s19  ;;  %p356_p1 = scmp.eq.s32.totalorder %s355_s26, 0 }
  0x11   : > { %p369_p2 = scmp.eq.s32.totalorder %s5763_s22, 1  ;;  %p374_p3 = scmp.ne.s32.totalorder %s5642_s19, %s5638_s18 }
  0x12   : > { %p375_p4 = scmp.eq.s32.totalorder %s3785_s23, 1  ;;  %p3786_p7 = scmp.ge.s32.totalorder %s5650_s21, 1 }
  0x13   : > { %s5778_s27 = scalar_select %p356_p1, %s5646_s20, %s358_s25  }
  0x14   : > { %p5780_p5 = por %p369_p2, %p368_p0  ;;  %p5784_p6 = por %p375_p4, %p374_p3 }
  0x15   : > { %6124 = sst [smem:[#allocation20_spill]] %s5778_s27  ;;  %p382_p8 = scmp.lt.s32.totalorder %s5650_s21, 3 }
  0x16   : > { %s6125_s28 = scalar_select %p5780_p5, 1, 0 }
  0x17   : > { %s6127_s29 = scalar_select %p5784_p6, 1, 0 }
  0x18   : > { %6126 = sst [smem:[#allocation21_spill]] %s6125_s28  ;;  %p5349_p9 = scmp.eq.s32.totalorder %s5763_s22, 0 }
  0x19   : > { %6128 = sst [smem:[#allocation22_spill]] %s6127_s29  ;;  %p5791_p10 = pnand %p3786_p7, %p382_p8 }
  0x1a   : > { %s6130_s2 = sld [smem:[#allocation24_spill]]  ;;  %s5652_s25 = smov [#allocation5]  }
  0x1b   : > { %p5332_p11 = pneg %p5791_p10  ;;  %s409_s26 = sshll.u32 %s5652_s25, 4  ;;  %s410_s26 = int_to_ptr.vmem [resolvable:$true] %s409_s26 }
  0x1c   : > { %s6132_s1 = sld [smem:[#allocation23_spill]]  ;;  %s5653_s16 = smov 192  }
  0x1d   : > { %p5802_p12 = pnand %p5349_p9, %p5332_p11  ;;  %s5654_s17 = smov 12  }
  0x1e   : > { %s5656_s18 = smov 768   ;;  %s5657_s21 = smov 48  }
  0x1f   : > { %s421_s20 = sshll.u32 %s6092_s3, 4  ;;  %s5658_s24 = smov [#allocation7]   ;;  %s422_s20 = int_to_ptr.hbm [resolvable:$true] %s421_s20 }
  0x20   : > { %s407_s23 = sshll.u32 %s6130_s2, 4  ;;  %s5655_s2 = smov [#allocation2]   ;;  %s408_s23 = int_to_ptr.hbm [resolvable:$true] %s407_s23 }
  0x21   : > { %5338 = dma.hbm_to_vmem [thread:$0]  (!%p5802_p12), %s408_s23, 384, %s410_s26, [#allocation6], %s5653_s16, %s5653_s16, %s5654_s17  }
  0x22   : > { %s393_s29 = sshll.u32 %s6132_s1, 4  ;;  %s395_s25 = sshll.u32 %s5655_s2, 4  ;;  %s394_s29 = int_to_ptr.hbm [resolvable:$true] %s393_s29  ;;  %s396_s25 = int_to_ptr.vmem [resolvable:$true] %s395_s25 }
  0x23   : > { %5335 = dma.hbm_to_vmem [thread:$0]  (!%p5802_p12), %s394_s29, 24576, %s396_s25, [#allocation3], %s5656_s18, %s5656_s18, %s5657_s21  }
  0x24   : > { %s423_s1 = sshll.u32 %s5658_s24, 4  ;;  %s450_s23 = sshll.u32 %s6098_s9, 4  ;;  %s424_s1 = int_to_ptr.vmem [resolvable:$true] %s423_s1  ;;  %s451_s23 = int_to_ptr.hbm [resolvable:$true] %s450_s23 }
  0x25   : > { %s5659_s26 = smov 64   ;;  %s5660_s2 = smov 4  }
  0x26   : > { %5341 = dma.hbm_to_vmem [thread:$0]  (!%p5802_p12), %s422_s20, 8192, %s424_s1, [#allocation6], %s5659_s26, %s5659_s26, %s5660_s2  }
  0x27   : > { %s5661_s16 = smov [#allocation8]   ;;  %490 = sbr.rel (%p5791_p10) target bundleno = 3522 (0xdc2), region = 80 }
  0x28   : > { %s452_s17 = sshll.u32 %s5661_s16, 4  ;;  %s453_s17 = int_to_ptr.vmem [resolvable:$true] %s452_s17 }
  0x29   : > { %5344 = dma.hbm_to_vmem [thread:$0]  (!%p5802_p12), %s451_s23, 2048, %s453_s17, [#allocation9], %s5659_s26, %s5659_s26, %s5660_s2  }
  0x2c   : > { %5621 = dma.done.wait (%p5349_p9), [#allocation3], 24576  }
  0x2d   : > { %5623 = vsyncadd (%p5349_p9), [#allocation3], 4294942720 }
  0x2e   : > { %5625 = dma.done.wait (%p5349_p9), [#allocation6], 8576  }
  0x2f   : > { %5627 = vsyncadd (%p5349_p9), [#allocation6], 4294958720 }
  0x30   : > { %5629 = dma.done.wait (%p5349_p9), [#allocation9], 2048  }
  0x31   : > { %5631 = vsyncadd (%p5349_p9), [#allocation9], 4294965248  ;;  %v4137_v0 = vld [vmem:[#allocation2 + $0x2a0] sm:$0xf]  ;;  %v5108_v1 = vld [vmem:[#allocation2 + $0x2cc] sm:$0xf0] }
  0x32   : > { %v5102_v2 = vld [vmem:[#allocation2 + $0x2a4] sm:$0xf]  ;;  %v4138_v3 = vor.u32 %v5108_v1, %v4137_v0  ;;  %v4139_v4 = vld [vmem:[#allocation2 + $0x2d0] sm:$0xf0]  ;;  %v4145_v5 = vld [vmem:[#allocation2 + $0x2a8] sm:$0xf] }
  0x33   : > { %v5109_v6 = vld [vmem:[#allocation2 + $0x2d4] sm:$0xf0]  ;;  %v4142_v7 = vor.u32 %v5102_v2, %v4139_v4  ;;  %v5103_v9 = vld [vmem:[#allocation2 + $0x2ac] sm:$0xf]  ;;  %v4147_v10 = vld [vmem:[#allocation2 + $0x2d8] sm:$0xf0] }
  0x34   : > { %v4146_v8 = vor.u32 %v5109_v6, %v4145_v5  ;;  %v4089_v11 = vld [vmem:[#allocation2 + $0x240] sm:$0xf]  ;;  %1167 = vmatpush.bf16.msra.mxu0 %v4138_v3  ;;  %v4150_v12 = vor.u32 %v5103_v9, %v4147_v10  ;;  %v5096_v13 = vld [vmem:[#allocation2 + $0x26c] sm:$0xf0]  ;;  %v5090_v14 = vld [vmem:[#allocation2 + $0x244] sm:$0xf] }
  0x35   : > { %v4091_v15 = vld [vmem:[#allocation2 + $0x270] sm:$0xf0]  ;;  %1180 = vmatpush.bf16.msra.mxu1 %v4142_v7  ;;  %v4090_v16 = vor.u32 %v5096_v13, %v4089_v11  ;;  %v4097_v18 = vld [vmem:[#allocation2 + $0x248] sm:$0xf]  ;;  %v5097_v19 = vld [vmem:[#allocation2 + $0x274] sm:$0xf0] }
  0x36   : > { %1193 = vmatpush.bf16.msra.mxu2 %v4146_v8  ;;  %v4094_v17 = vor.u32 %v5090_v14, %v4091_v15  ;;  %v5091_v20 = vld [vmem:[#allocation2 + $0x24c] sm:$0xf]  ;;  %1206 = vmatpush.bf16.msra.mxu3 %v4150_v12  ;;  %v4098_v21 = vor.u32 %v5097_v19, %v4097_v18  ;;  %v4099_v22 = vld [vmem:[#allocation2 + $0x278] sm:$0xf0]  ;;  %v4041_v23 = vld [vmem:[#allocation2 + $0x1e0] sm:$0xf] }
  0x37   : > { %v5084_v24 = vld [vmem:[#allocation2 + $0x20c] sm:$0xf0]  ;;  %v4102_v25 = vor.u32 %v5091_v20, %v4099_v22  ;;  %v5078_v26 = vld [vmem:[#allocation2 + $0x1e4] sm:$0xf]  ;;  %v4043_v27 = vld [vmem:[#allocation2 + $0x210] sm:$0xf0] }
  0x38   : > { %v4049_v28 = vld [vmem:[#allocation2 + $0x1e8] sm:$0xf]  ;;  %1168 = vmatpush.bf16.msra.mxu0 %v4090_v16  ;;  %v4042_v29 = vor.u32 %v5084_v24, %v4041_v23  ;;  %v5085_v30 = vld [vmem:[#allocation2 + $0x214] sm:$0xf0]  ;;  %v5079_v31 = vld [vmem:[#allocation2 + $0x1ec] sm:$0xf]  ;;  %v4046_v33 = vor.u32 %v5078_v26, %v4043_v27 }
  0x39   : > { %v4051_v32 = vld [vmem:[#allocation2 + $0x218] sm:$0xf0]  ;;  %1181 = vmatpush.bf16.msra.mxu1 %v4094_v17  ;;  %v4050_v34 = vor.u32 %v5085_v30, %v4049_v28  ;;  %v3993_v35 = vld [vmem:[#allocation2 + $0x180] sm:$0xf]  ;;  %v5072_v36 = vld [vmem:[#allocation2 + $0x1ac] sm:$0xf0] }
  0x3a   : > { %1194 = vmatpush.bf16.msra.mxu2 %v4098_v21  ;;  %v5066_v37 = vld [vmem:[#allocation2 + $0x184] sm:$0xf]  ;;  %1207 = vmatpush.bf16.msra.mxu3 %v4102_v25  ;;  %v4054_v38 = vor.u32 %v5079_v31, %v4051_v32  ;;  %v3995_v39 = vld [vmem:[#allocation2 + $0x1b0] sm:$0xf0]  ;;  %v4001_v40 = vld [vmem:[#allocation2 + $0x188] sm:$0xf]  ;;  %v3994_v44 = vor.u32 %v5072_v36, %v3993_v35 }
  0x3b   : > { %v5073_v41 = vld [vmem:[#allocation2 + $0x1b4] sm:$0xf0]  ;;  %v5067_v42 = vld [vmem:[#allocation2 + $0x18c] sm:$0xf]  ;;  %v4003_v43 = vld [vmem:[#allocation2 + $0x1b8] sm:$0xf0]  ;;  %v3998_v45 = vor.u32 %v5066_v37, %v3995_v39 }
  0x3c   : > { %1169 = vmatpush.bf16.msra.mxu0 %v4042_v29  ;;  %v4002_v46 = vor.u32 %v5073_v41, %v4001_v40  ;;  %v3945_v47 = vld [vmem:[#allocation2 + $0x120] sm:$0xf]  ;;  %v5060_v48 = vld [vmem:[#allocation2 + $0x14c] sm:$0xf0]  ;;  %v5054_v49 = vld [vmem:[#allocation2 + $0x124] sm:$0xf]  ;;  %v4006_v50 = vor.u32 %v5067_v42, %v4003_v43 }
  0x3d   : > { %1182 = vmatpush.bf16.msra.mxu1 %v4046_v33  ;;  %v3947_v51 = vld [vmem:[#allocation2 + $0x150] sm:$0xf0]  ;;  %v3953_v52 = vld [vmem:[#allocation2 + $0x128] sm:$0xf]  ;;  %v5061_v53 = vld [vmem:[#allocation2 + $0x154] sm:$0xf0]  ;;  %v3946_v56 = vor.u32 %v5060_v48, %v3945_v47 }
  0x3e   : > { %1195 = vmatpush.bf16.msra.mxu2 %v4050_v34  ;;  %1208 = vmatpush.bf16.msra.mxu3 %v4054_v38  ;;  %v5055_v54 = vld [vmem:[#allocation2 + $0x12c] sm:$0xf]  ;;  %v3955_v55 = vld [vmem:[#allocation2 + $0x158] sm:$0xf0]  ;;  %p553_p13 = scmp.lt.s32.totalorder %s5763_s22, 1  ;;  %v3950_v57 = vor.u32 %v5054_v49, %v3947_v51  ;;  %v3954_v58 = vor.u32 %v5061_v53, %v3953_v52  ;;  %vm1358_vm0 = vcmask 1043456  }
  0x3f   : > { %v3897_v59 = vld [vmem:[#allocation2 + $0xc0] sm:$0xf]  ;;  %v5048_v60 = vld [vmem:[#allocation2 + $0xec] sm:$0xf0]  ;;  %v5042_v61 = vld [vmem:[#allocation2 + $0xc4] sm:$0xf]  ;;  %v3958_v62 = vor.u32 %v5055_v54, %v3955_v55 }
  0x40   : > { %1170 = vmatpush.bf16.msra.mxu0 %v3994_v44  ;;  %v3899_v63 = vld [vmem:[#allocation2 + $0xf0] sm:$0xf0]  ;;  %v3905_v0 = vld [vmem:[#allocation2 + $0xc8] sm:$0xf]  ;;  %v5049_v1 = vld [vmem:[#allocation2 + $0xf4] sm:$0xf0]  ;;  %v3898_v4 = vor.u32 %v5048_v60, %v3897_v59 }
  0x41   : > { %1183 = vmatpush.bf16.msra.mxu1 %v3998_v45  ;;  %v5043_v2 = vld [vmem:[#allocation2 + $0xcc] sm:$0xf]  ;;  %v3907_v3 = vld [vmem:[#allocation2 + $0xf8] sm:$0xf0]  ;;  %s5841_s1 = scalar_select %p553_p13, %s5763_s22, 1  ;;  %v3902_v5 = vor.u32 %v5042_v61, %v3899_v63  ;;  %v3906_v6 = vor.u32 %v5049_v1, %v3905_v0  ;;  %vm1342_vm1 = vcmask 64512  }
  0x42   : > { %1196 = vmatpush.bf16.msra.mxu2 %v4002_v46  ;;  %1209 = vmatpush.bf16.msra.mxu3 %v4006_v50  ;;  %v3849_v7 = vld [vmem:[#allocation2 + $0x60] sm:$0xf]  ;;  %v5036_v8 = vld [vmem:[#allocation2 + $0x8c] sm:$0xf0]  ;;  %v5030_v9 = vld [vmem:[#allocation2 + $0x64] sm:$0xf]  ;;  %v3910_v10 = vor.u32 %v5043_v2, %v3907_v3 }
  0x43   : > { %v3851_v11 = vld [vmem:[#allocation2 + $0x90] sm:$0xf0]  ;;  %v3857_v12 = vld [vmem:[#allocation2 + $0x68] sm:$0xf]  ;;  %v5037_v13 = vld [vmem:[#allocation2 + $0x94] sm:$0xf0]  ;;  %v3850_v16 = vor.u32 %v5036_v8, %v3849_v7 }
  0x44   : > { %1171 = vmatpush.bf16.msra.mxu0 %v3946_v56  ;;  %v5031_v14 = vld [vmem:[#allocation2 + $0x6c] sm:$0xf]  ;;  %v3859_v15 = vld [vmem:[#allocation2 + $0x98] sm:$0xf0]  ;;  %s3798_s14 = sshll.u32 %s5841_s1, 3  ;;  %v3854_v19 = vor.u32 %v5030_v9, %v3851_v11  ;;  %v3858_v20 = vor.u32 %v5037_v13, %v3857_v12  ;;  %s6133_s21 = sld [smem:[#allocation16_spill]] }
  0x45   : > { %1184 = vmatpush.bf16.msra.mxu1 %v3950_v57  ;;  %v3801_v17 = vld [vmem:[#allocation2] sm:$0xf]  ;;  %v5024_v18 = vld [vmem:[#allocation2 + $0x2c] sm:$0xf0]  ;;  %v5018_v21 = vld [vmem:[#allocation2 + $0x4] sm:$0xf]  ;;  %v3862_v24 = vor.u32 %v5031_v14, %v3859_v15  ;;  %s5847_s19 = scalar_lea.vmem %s6089_s0, %s3798_s14 }
  0x46   : > { %1197 = vmatpush.bf16.msra.mxu2 %v3954_v58  ;;  %1210 = vmatpush.bf16.msra.mxu3 %v3958_v62  ;;  %v3803_v22 = vld [vmem:[#allocation2 + $0x30] sm:$0xf0]  ;;  %v3809_v23 = vld [vmem:[#allocation2 + $0x8] sm:$0xf]  ;;  %v5025_v25 = vld [vmem:[#allocation2 + $0x34] sm:$0xf0]  ;;  %v3802_v31 = vor.u32 %v5024_v18, %v3801_v17 }
  0x47   : > { %v5019_v26 = vld [vmem:[#allocation2 + $0xc] sm:$0xf]  ;;  %v3811_v27 = vld [vmem:[#allocation2 + $0x38] sm:$0xf0]  ;;  %v4153_v28 = vld [vmem:[#allocation2 + $0x2b0] sm:$0xf]  ;;  %v3806_v35 = vor.u32 %v5018_v21, %v3803_v22  ;;  %v3810_v36 = vor.u32 %v5025_v25, %v3809_v23 }
  0x48   : > { %1172 = vmatpush.bf16.msra.mxu0 %v3898_v4  ;;  %v5110_v29 = vld [vmem:[#allocation2 + $0x2dc] sm:$0xf0]  ;;  %v5104_v30 = vld [vmem:[#allocation2 + $0x2b4] sm:$0xf]  ;;  %v4155_v32 = vld [vmem:[#allocation2 + $0x2e0] sm:$0xf0]  ;;  %v3814_v40 = vor.u32 %v5019_v26, %v3811_v27 }
  0x49   : > { %1185 = vmatpush.bf16.msra.mxu1 %v3902_v5  ;;  %v4161_v33 = vld [vmem:[#allocation2 + $0x2b8] sm:$0xf]  ;;  %v5111_v34 = vld [vmem:[#allocation2 + $0x2e4] sm:$0xf0]  ;;  %v5105_v37 = vld [vmem:[#allocation2 + $0x2bc] sm:$0xf]  ;;  %v4154_v41 = vor.u32 %v5110_v29, %v4153_v28  ;;  %v4158_v42 = vor.u32 %v5104_v30, %v4155_v32 }
  0x4a   : > { %1198 = vmatpush.bf16.msra.mxu2 %v3906_v6  ;;  %1211 = vmatpush.bf16.msra.mxu3 %v3910_v10  ;;  %v4163_v38 = vld [vmem:[#allocation2 + $0x2e8] sm:$0xf0]  ;;  %v561_v39 = vld [vmem:[%s5847_s19] sm:$0xff]  ;;  %v4162_v43 = vor.u32 %v5111_v34, %v4161_v33  ;;  %v4105_v44 = vld [vmem:[#allocation2 + $0x250] sm:$0xf]  ;;  %s550_s25 = sand.u32 1, %s6133_s21  }
  0x4b   : > { %v5098_v45 = vld [vmem:[#allocation2 + $0x27c] sm:$0xf0]  ;;  %v5092_v46 = vld [vmem:[#allocation2 + $0x254] sm:$0xf]  ;;  %v4166_v47 = vor.u32 %v5105_v37, %v4163_v38  ;;  %v4107_v48 = vld [vmem:[#allocation2 + $0x280] sm:$0xf0]  ;;  %v5850_v51 = vpack.c.bf16 %v561_v39, %v561_v39 }
  0x4c   : > { %1173 = vmatpush.bf16.msra.mxu0 %v3850_v16  ;;  %v4113_v49 = vld [vmem:[#allocation2 + $0x258] sm:$0xf]  ;;  %v5099_v50 = vld [vmem:[#allocation2 + $0x284] sm:$0xf0]  ;;  %v5093_v52 = vld [vmem:[#allocation2 + $0x25c] sm:$0xf]  ;;  %v4106_v54 = vor.u32 %v5098_v45, %v4105_v44  ;;  %v4110_v55 = vor.u32 %v5092_v46, %v4107_v48 }
  0x4d   : > { %1186 = vmatpush.bf16.msra.mxu1 %v3854_v19  ;;  %v4115_v53 = vld [vmem:[#allocation2 + $0x288] sm:$0xf0]  ;;  %v4114_v56 = vor.u32 %v5099_v50, %v4113_v49  ;;  %v4057_v57 = vld [vmem:[#allocation2 + $0x1f0] sm:$0xf]  ;;  %v5086_v58 = vld [vmem:[#allocation2 + $0x21c] sm:$0xf0] }
  0x4e   : > { %1199 = vmatpush.bf16.msra.mxu2 %v3858_v20  ;;  %1212 = vmatpush.bf16.msra.mxu3 %v3862_v24  ;;  %v5080_v59 = vld [vmem:[#allocation2 + $0x1f4] sm:$0xf]  ;;  %v4118_v60 = vor.u32 %v5093_v52, %v4115_v53  ;;  %v4059_v61 = vld [vmem:[#allocation2 + $0x220] sm:$0xf0]  ;;  %v4065_v62 = vld [vmem:[#allocation2 + $0x1f8] sm:$0xf]  ;;  %v4058_v2 = vor.u32 %v5086_v58, %v4057_v57 }
  0x4f   : > { %v5087_v63 = vld [vmem:[#allocation2 + $0x224] sm:$0xf0]  ;;  %v5081_v0 = vld [vmem:[#allocation2 + $0x1fc] sm:$0xf]  ;;  %v4067_v1 = vld [vmem:[#allocation2 + $0x228] sm:$0xf0]  ;;  %v4062_v3 = vor.u32 %v5080_v59, %v4059_v61 }
  0x50   : > { %1174 = vmatpush.bf16.msra.mxu0 %v3802_v31  ;;  %v4066_v4 = vor.u32 %v5087_v63, %v4065_v62  ;;  %v4009_v5 = vld [vmem:[#allocation2 + $0x190] sm:$0xf]  ;;  %v5074_v6 = vld [vmem:[#allocation2 + $0x1bc] sm:$0xf0]  ;;  %v5068_v7 = vld [vmem:[#allocation2 + $0x194] sm:$0xf]  ;;  %v4070_v8 = vor.u32 %v5081_v0, %v4067_v1 }
  0x51   : > { %1187 = vmatpush.bf16.msra.mxu1 %v3806_v35  ;;  %v4011_v9 = vld [vmem:[#allocation2 + $0x1c0] sm:$0xf0]  ;;  %v4017_v10 = vld [vmem:[#allocation2 + $0x198] sm:$0xf]  ;;  %v5075_v11 = vld [vmem:[#allocation2 + $0x1c4] sm:$0xf0]  ;;  %v4010_v14 = vor.u32 %v5074_v6, %v4009_v5 }
  0x52   : > { %1200 = vmatpush.bf16.msra.mxu2 %v3810_v36  ;;  %1213 = vmatpush.bf16.msra.mxu3 %v3814_v40  ;;  %v5069_v12 = vld [vmem:[#allocation2 + $0x19c] sm:$0xf]  ;;  %v4019_v13 = vld [vmem:[#allocation2 + $0x1c8] sm:$0xf0]  ;;  %v4014_v15 = vor.u32 %v5068_v7, %v4011_v9  ;;  %v4018_v16 = vor.u32 %v5075_v11, %v4017_v10  ;;  %v3961_v17 = vld [vmem:[#allocation2 + $0x130] sm:$0xf] }
  0x53   : > { %1175 = vmatmul.bf16.vlgmr.msra.gmra.mxu0 %v5850_v51  ;;  %v5062_v18 = vld [vmem:[#allocation2 + $0x15c] sm:$0xf0]  ;;  %v5056_v19 = vld [vmem:[#allocation2 + $0x134] sm:$0xf]  ;;  %v4022_v20 = vor.u32 %v5069_v12, %v4019_v13  ;;  %v3963_v21 = vld [vmem:[#allocation2 + $0x160] sm:$0xf0] }
  0x54   : > { %1219 = vmatpush.bf16.msrb.mxu0 %v4154_v41  ;;  %1188 = vmatmul.bf16.vlgmr.msra.gmra.mxu1 %v5850_v51  ;;  %v3969_v22 = vld [vmem:[#allocation2 + $0x138] sm:$0xf]  ;;  %v5063_v23 = vld [vmem:[#allocation2 + $0x164] sm:$0xf0]  ;;  %v5057_v24 = vld [vmem:[#allocation2 + $0x13c] sm:$0xf]  ;;  %v3962_v26 = vor.u32 %v5062_v18, %v3961_v17  ;;  %v3966_v28 = vor.u32 %v5056_v19, %v3963_v21 }
  0x55   : > { %1232 = vmatpush.bf16.msrb.mxu1 %v4158_v42  ;;  %1201 = vmatmul.bf16.vlgmr.msra.gmra.mxu2 %v5850_v51  ;;  %v3971_v25 = vld [vmem:[#allocation2 + $0x168] sm:$0xf0]  ;;  %v3913_v27 = vld [vmem:[#allocation2 + $0xd0] sm:$0xf]  ;;  %v3970_v29 = vor.u32 %v5063_v23, %v3969_v22  ;;  %v5050_v30 = vld [vmem:[#allocation2 + $0xfc] sm:$0xf0] }
  0x56   : > { %1245 = vmatpush.bf16.msrb.mxu2 %v4162_v43  ;;  %1258 = vmatpush.bf16.msrb.mxu3 %v4166_v47  ;;  %v5044_v31 = vld [vmem:[#allocation2 + $0xd4] sm:$0xf]  ;;  %v3915_v32 = vld [vmem:[#allocation2 + $0x100] sm:$0xf0]  ;;  %v3974_v33 = vor.u32 %v5057_v24, %v3971_v25  ;;  %v3921_v34 = vld [vmem:[#allocation2 + $0xd8] sm:$0xf]  ;;  %v3914_v40 = vor.u32 %v5050_v30, %v3913_v27 }
  0x57   : > { %1214 = vmatmul.bf16.vlgmr.msra.gmra.mxu3 %v5850_v51  ;;  %v5051_v35 = vld [vmem:[#allocation2 + $0x104] sm:$0xf0]  ;;  %v5045_v36 = vld [vmem:[#allocation2 + $0xdc] sm:$0xf]  ;;  %v3923_v37 = vld [vmem:[#allocation2 + $0x108] sm:$0xf0]  ;;  %v3918_v44 = vor.u32 %v5044_v31, %v3915_v32 }
  0x58   : > { %1220 = vmatpush.bf16.msrb.mxu0 %v4106_v54  ;;  %v3865_v38 = vld [vmem:[#allocation2 + $0x70] sm:$0xf]  ;;  %v5038_v39 = vld [vmem:[#allocation2 + $0x9c] sm:$0xf0]  ;;  %v5032_v41 = vld [vmem:[#allocation2 + $0x74] sm:$0xf]  ;;  %v3922_v45 = vor.u32 %v5051_v35, %v3921_v34  ;;  %v3926_v48 = vor.u32 %v5045_v36, %v3923_v37 }
  0x59   : > { %1233 = vmatpush.bf16.msrb.mxu1 %v4110_v55  ;;  %v3867_v42 = vld [vmem:[#allocation2 + $0xa0] sm:$0xf0]  ;;  %v3873_v43 = vld [vmem:[#allocation2 + $0x78] sm:$0xf]  ;;  %v5039_v46 = vld [vmem:[#allocation2 + $0xa4] sm:$0xf0]  ;;  %v3866_v53 = vor.u32 %v5038_v39, %v3865_v38 }
  0x5a   : > { %1246 = vmatpush.bf16.msrb.mxu2 %v4114_v56  ;;  %1259 = vmatpush.bf16.msrb.mxu3 %v4118_v60  ;;  %v5033_v47 = vld [vmem:[#allocation2 + $0x7c] sm:$0xf]  ;;  %v3875_v49 = vld [vmem:[#allocation2 + $0xa8] sm:$0xf0]  ;;  %v3817_v50 = vld [vmem:[#allocation2 + $0x10] sm:$0xf]  ;;  %v3870_v58 = vor.u32 %v5032_v41, %v3867_v42  ;;  %v3874_v59 = vor.u32 %v5039_v46, %v3873_v43 }
  0x5b   : > { %v5026_v52 = vld [vmem:[#allocation2 + $0x3c] sm:$0xf0]  ;;  %v5020_v54 = vld [vmem:[#allocation2 + $0x14] sm:$0xf]  ;;  %v3819_v55 = vld [vmem:[#allocation2 + $0x40] sm:$0xf0]  ;;  %v3878_v61 = vor.u32 %v5033_v47, %v3875_v49 }
  0x5c   : > { %1221 = vmatpush.bf16.msrb.mxu0 %v4058_v2  ;;  %v3825_v56 = vld [vmem:[#allocation2 + $0x18] sm:$0xf]  ;;  %v5027_v57 = vld [vmem:[#allocation2 + $0x44] sm:$0xf0]  ;;  %v5021_v60 = vld [vmem:[#allocation2 + $0x1c] sm:$0xf]  ;;  %v3818_v1 = vor.u32 %v5026_v52, %v3817_v50 }
  0x5d   : > { %1234 = vmatpush.bf16.msrb.mxu1 %v4062_v3  ;;  %v3827_v62 = vld [vmem:[#allocation2 + $0x48] sm:$0xf0]  ;;  %v4177_v63 = vld [vmem:[#allocation2 + $0x2c8] sm:$0xf]  ;;  %v5113_v0 = vld [vmem:[#allocation2 + $0x2f4] sm:$0xf0]  ;;  %v3826_v5 = vor.u32 %v5027_v57, %v3825_v56 }
  0x5e   : > { %1247 = vmatpush.bf16.msrb.mxu2 %v4066_v4  ;;  %1260 = vmatpush.bf16.msrb.mxu3 %v4070_v8  ;;  %v5107_v2 = vld [vmem:[#allocation2 + $0x2cc] sm:$0xf]  ;;  %v4179_v3 = vld [vmem:[#allocation2 + $0x2f8] sm:$0xf0]  ;;  %v3822_v4 = vor.u32 %v5020_v54, %v3819_v55  ;;  %v3830_v6 = vor.u32 %v5021_v60, %v3827_v62  ;;  %v4178_v7 = vor.u32 %v5113_v0, %v4177_v63  ;;  %v4129_v8 = vld [vmem:[#allocation2 + $0x268] sm:$0xf] }
  0x5f   : > { %v4169_v9 = vld [vmem:[#allocation2 + $0x2c0] sm:$0xf]  ;;  %v5112_v10 = vld [vmem:[#allocation2 + $0x2ec] sm:$0xf0]  ;;  %v5101_v11 = vld [vmem:[#allocation2 + $0x294] sm:$0xf0]  ;;  %v4182_v12 = vor.u32 %v5107_v2, %v4179_v3 }
  0x60   : > { %1222 = vmatpush.bf16.msrb.mxu0 %v4010_v14  ;;  %v5106_v13 = vld [vmem:[#allocation2 + $0x2c4] sm:$0xf]  ;;  %v4171_v14 = vld [vmem:[#allocation2 + $0x2f0] sm:$0xf0]  ;;  %v4170_v17 = vor.u32 %v5112_v10, %v4169_v9  ;;  %v4130_v18 = vor.u32 %v5101_v11, %v4129_v8  ;;  %v5100_v21 = vld [vmem:[#allocation2 + $0x28c] sm:$0xf0] }
  0x61   : > { %1235 = vmatpush.bf16.msrb.mxu1 %v4014_v15  ;;  %v5095_v15 = vld [vmem:[#allocation2 + $0x26c] sm:$0xf]  ;;  %v4174_v19 = vor.u32 %v5106_v13, %v4171_v14  ;;  %v4081_v22 = vld [vmem:[#allocation2 + $0x208] sm:$0xf]  ;;  %v5089_v23 = vld [vmem:[#allocation2 + $0x234] sm:$0xf0] }
  0x62   : > { %1248 = vmatpush.bf16.msrb.mxu2 %v4018_v16  ;;  %1261 = vmatpush.bf16.msrb.mxu3 %v4022_v20  ;;  %v4131_v16 = vld [vmem:[#allocation2 + $0x298] sm:$0xf0]  ;;  %v4121_v20 = vld [vmem:[#allocation2 + $0x260] sm:$0xf]  ;;  %v5083_v25 = vld [vmem:[#allocation2 + $0x20c] sm:$0xf] }
  0x63   : > { %v4134_v24 = vor.u32 %v5095_v15, %v4131_v16  ;;  %v4122_v27 = vor.u32 %v5100_v21, %v4121_v20  ;;  %v5077_v30 = vld [vmem:[#allocation2 + $0x1d4] sm:$0xf0]  ;;  %v5094_v36 = vld [vmem:[#allocation2 + $0x264] sm:$0xf]  ;;  %v4123_v37 = vld [vmem:[#allocation2 + $0x290] sm:$0xf0] }
  0x64   : > { %1223 = vmatpush.bf16.msrb.mxu0 %v3962_v26  ;;  %v4083_v26 = vld [vmem:[#allocation2 + $0x238] sm:$0xf0]  ;;  %v5065_v34 = vld [vmem:[#allocation2 + $0x174] sm:$0xf0]  ;;  %v4126_v38 = vor.u32 %v5094_v36, %v4123_v37  ;;  %v5071_v39 = vld [vmem:[#allocation2 + $0x1ac] sm:$0xf] }
  0x65   : > { %1236 = vmatpush.bf16.msrb.mxu1 %v3966_v28  ;;  %v4082_v28 = vor.u32 %v5089_v23, %v4081_v22  ;;  %v4086_v31 = vor.u32 %v5083_v25, %v4083_v26  ;;  %v4073_v42 = vld [vmem:[#allocation2 + $0x200] sm:$0xf]  ;;  %v5088_v43 = vld [vmem:[#allocation2 + $0x22c] sm:$0xf0]  ;;  %v5053_v46 = vld [vmem:[#allocation2 + $0x114] sm:$0xf0] }
  0x66   : > { %1249 = vmatpush.bf16.msrb.mxu2 %v3970_v29  ;;  %1262 = vmatpush.bf16.msrb.mxu3 %v3974_v33  ;;  %v4033_v29 = vld [vmem:[#allocation2 + $0x1a8] sm:$0xf]  ;;  %v5082_v47 = vld [vmem:[#allocation2 + $0x204] sm:$0xf]  ;;  %v5059_v52 = vld [vmem:[#allocation2 + $0x14c] sm:$0xf] }
  0x67   : > { %v4034_v32 = vor.u32 %v5077_v30, %v4033_v29  ;;  %v3985_v33 = vld [vmem:[#allocation2 + $0x148] sm:$0xf]  ;;  %v4025_v54 = vld [vmem:[#allocation2 + $0x1a0] sm:$0xf]  ;;  %v5076_v56 = vld [vmem:[#allocation2 + $0x1cc] sm:$0xf0] }
  0x68   : > { %1224 = vmatpush.bf16.msrb.mxu0 %v3914_v40  ;;  %v3986_v35 = vor.u32 %v5065_v34, %v3985_v33  ;;  %v4035_v40 = vld [vmem:[#allocation2 + $0x1d8] sm:$0xf0]  ;;  %v3889_v57 = vld [vmem:[#allocation2 + $0x88] sm:$0xf]  ;;  %v4027_v62 = vld [vmem:[#allocation2 + $0x1d0] sm:$0xf0] }
  0x69   : > { %1237 = vmatpush.bf16.msrb.mxu1 %v3918_v44  ;;  %v4038_v41 = vor.u32 %v5071_v39, %v4035_v40  ;;  %v3937_v44 = vld [vmem:[#allocation2 + $0xe8] sm:$0xf]  ;;  %v5047_v63 = vld [vmem:[#allocation2 + $0xec] sm:$0xf]  ;;  %v3977_v2 = vld [vmem:[#allocation2 + $0x140] sm:$0xf] }
  0x6a   : > { %1250 = vmatpush.bf16.msrb.mxu2 %v3922_v45  ;;  %1263 = vmatpush.bf16.msrb.mxu3 %v3926_v48  ;;  %v4074_v45 = vor.u32 %v5088_v43, %v4073_v42  ;;  %v4075_v48 = vld [vmem:[#allocation2 + $0x230] sm:$0xf0]  ;;  %v3938_v49 = vor.u32 %v5053_v46, %v3937_v44  ;;  %v5064_v3 = vld [vmem:[#allocation2 + $0x16c] sm:$0xf0]  ;;  %v5035_v10 = vld [vmem:[#allocation2 + $0x8c] sm:$0xf] }
  0x6b   : > { %v4078_v50 = vor.u32 %v5082_v47, %v4075_v48  ;;  %v3978_v8 = vor.u32 %v5064_v3, %v3977_v2  ;;  %v3979_v9 = vld [vmem:[#allocation2 + $0x170] sm:$0xf0]  ;;  %v3891_v11 = vld [vmem:[#allocation2 + $0xb8] sm:$0xf0]  ;;  %v3929_v13 = vld [vmem:[#allocation2 + $0xe0] sm:$0xf] }
  0x6c   : > { %1225 = vmatpush.bf16.msrb.mxu0 %v3866_v53  ;;  %v3987_v53 = vld [vmem:[#allocation2 + $0x178] sm:$0xf0]  ;;  %v5052_v14 = vld [vmem:[#allocation2 + $0x10c] sm:$0xf0]  ;;  %v3894_v16 = vor.u32 %v5035_v10, %v3891_v11  ;;  %v5023_v20 = vld [vmem:[#allocation2 + $0x2c] sm:$0xf] }
  0x6d   : > { %1238 = vmatpush.bf16.msrb.mxu1 %v3870_v58  ;;  %v3990_v55 = vor.u32 %v5059_v52, %v3987_v53  ;;  %v5041_v58 = vld [vmem:[#allocation2 + $0xb4] sm:$0xf0]  ;;  %v3843_v21 = vld [vmem:[#allocation2 + $0x58] sm:$0xf0]  ;;  %v3881_v22 = vld [vmem:[#allocation2 + $0x80] sm:$0xf] }
  0x6e   : > { %1251 = vmatpush.bf16.msrb.mxu2 %v3874_v59  ;;  %1264 = vmatpush.bf16.msrb.mxu3 %v3878_v61  ;;  %v4026_v59 = vor.u32 %v5076_v56, %v4025_v54  ;;  %v3890_v60 = vor.u32 %v5041_v58, %v3889_v57  ;;  %v5070_v61 = vld [vmem:[#allocation2 + $0x1a4] sm:$0xf]  ;;  %v5040_v23 = vld [vmem:[#allocation2 + $0xac] sm:$0xf0]  ;;  %v3846_v25 = vor.u32 %v5023_v20, %v3843_v21  ;;  %v3833_v29 = vld [vmem:[#allocation2 + $0x20] sm:$0xf] }
  0x6f   : > { %v4030_v0 = vor.u32 %v5070_v61, %v4027_v62  ;;  %v5034_v26 = vld [vmem:[#allocation2 + $0x84] sm:$0xf]  ;;  %v5028_v30 = vld [vmem:[#allocation2 + $0x4c] sm:$0xf0]  ;;  %v3835_v34 = vld [vmem:[#allocation2 + $0x50] sm:$0xf0] }
  0x70   : > { %1226 = vmatpush.bf16.msrb.mxu0 %v3818_v1  ;;  %v3939_v1 = vld [vmem:[#allocation2 + $0x118] sm:$0xf0]  ;;  %v5022_v33 = vld [vmem:[#allocation2 + $0x24] sm:$0xf]  ;;  %s5015_s20 = sshll.u32 %s5763_s22, 3  ;;  %s3797_s24 = sshll.u32 %s550_s25, 3 }
  0x71   : > { %1239 = vmatpush.bf16.msrb.mxu1 %v3822_v4  ;;  %v3942_v4 = vor.u32 %v5047_v63, %v3939_v1  ;;  %v659_v44 = vld [vmem:[#allocation5] sm:$0xff]  ;;  %s6134_s2 = sld [smem:[#allocation26_spill]]  ;;  %s552_s18 = scalar_lea.vmem [#allocation10], %s3797_s24 }
  0x72   : > { %1252 = vmatpush.bf16.msrb.mxu2 %v3826_v5  ;;  %1265 = vmatpush.bf16.msrb.mxu3 %v3830_v6  ;;  %v3841_v5 = vld [vmem:[#allocation2 + $0x28] sm:$0xf]  ;;  %v5029_v6 = vld [vmem:[#allocation2 + $0x54] sm:$0xf0]  ;;  %v668_v46 = vperm.slane %v659_v44, 5  ;;  %v663_v48 = vperm.slane %v659_v44, 0 }
  0x73   : > { %1227 = vmatmul.bf16.vlgmr.msrb.gmra.mxu0 %v5850_v51  ;;  %v665_v2 = vperm.slane %v659_v44, 2  ;;  %v666_v3 = vperm.slane %v659_v44, 3  ;;  %s6136_s15 = sld [smem:[#allocation25_spill]]  ;;  %s3670_s21 = scalar_lea.sflag [#allocation4], %s550_s25 }
  0x74   : > { %1240 = vmatmul.bf16.vlgmr.msrb.gmra.mxu1 %v5850_v51  ;;  %1271 = vmatpush.bf16.msra.mxu0 %v4170_v17  ;;  %v5046_v17 = vld [vmem:[#allocation2 + $0xe4] sm:$0xf] }
  0x75   : > { %1253 = vmatmul.bf16.vlgmr.msrb.gmra.mxu2 %v5850_v51  ;;  %1266 = vmatmul.bf16.vlgmr.msrb.gmra.mxu3 %v5850_v51 }
  0x76   : > { %1297 = vmatpush.bf16.msra.mxu2 %v4178_v7  ;;  %1310 = vmatpush.bf16.msra.mxu3 %v4182_v12  ;;  %v5058_v7 = vld [vmem:[#allocation2 + $0x144] sm:$0xf]  ;;  %v3842_v12 = vor.u32 %v5029_v6, %v3841_v5 }
  0x77   : > { %1284 = vmatpush.bf16.msra.mxu1 %v4174_v19  ;;  %v3982_v15 = vor.u32 %v5058_v7, %v3979_v9  ;;  %v3930_v19 = vor.u32 %v5052_v14, %v3929_v13  ;;  %v660_v13 = vld [vmem:[#allocation5 + $0x8] sm:$0xf]  ;;  %s3680_s17 = scalar_lea.hbm %s6134_s2, %s5015_s20  ;;  %s5596_s20 = scalar_lea.hbm %s6134_s2, 16 }
  0x78   : > { %1272 = vmatpush.bf16.msra.mxu0 %v4122_v27  ;;  %v3883_v27 = vld [vmem:[#allocation2 + $0xb0] sm:$0xf0]  ;;  %s3684_s27 = sshll.u32 %s3680_s17, 4  ;;  %s3685_s27 = int_to_ptr.hbm [resolvable:$true] %s3684_s27 }
  0x79   : > { %s5590_s22 = sshra.s32 %s3685_s27, 4  ;;  %s5591_s22 = int_to_ptr.hbm [resolvable:$true] %s5590_s22 }
  0x7a   : > { %1298 = vmatpush.bf16.msra.mxu2 %v4130_v18  ;;  %1311 = vmatpush.bf16.msra.mxu3 %v4134_v24  ;;  %v3931_v18 = vld [vmem:[#allocation2 + $0x110] sm:$0xf0]  ;;  %s5592_s28 = scalar_lea.hbm %s5591_s22, 8  ;;  %p5597_p3 = scmp.lt.s32.totalorder %s5591_s22, %s6134_s2 }
  0x7b   : > { %1285 = vmatpush.bf16.msra.mxu1 %v4126_v38  ;;  %v3934_v24 = vor.u32 %v5046_v17, %v3931_v18  ;;  %v674_v17 = vperm.slane %v660_v13, 3  ;;  %v672_v18 = vperm.slane %v660_v13, 1  ;;  %p5593_p0 = scmp.ne.s32.totalorder %s5591_s22, %s5592_s28  ;;  %p5598_p4 = scmp.lt.s32.totalorder %s5596_s20, %s5592_s28 }
  0x7c   : > { %1273 = vmatpush.bf16.msra.mxu0 %v4074_v45  ;;  %v667_v45 = vperm.slane %v659_v44, 4 }
  0x7d   : > { %p5594_p1 = pnand %p5593_p0, %p5780_p5  ;;  %p5599_p7 = por %p5598_p4, %p5597_p3 }
  0x7e   : > { %1299 = vmatpush.bf16.msra.mxu2 %v4082_v28  ;;  %1312 = vmatpush.bf16.msra.mxu3 %v4086_v31  ;;  %v3882_v28 = vor.u32 %v5040_v23, %v3881_v22  ;;  %v3886_v31 = vor.u32 %v5034_v26, %v3883_v27 }
  0x7f   : > { %1286 = vmatpush.bf16.msra.mxu1 %v4078_v50  ;;  %p5595_p2 = pneg %p5594_p1 }
  0x80   : > { %1274 = vmatpush.bf16.msra.mxu0 %v4026_v59 }
  0x81   : > { %p5600_p8 = pnand %p5599_p7, %p5595_p2 }
  0x82   : > { %1300 = vmatpush.bf16.msra.mxu2 %v4034_v32  ;;  %1313 = vmatpush.bf16.msra.mxu3 %v4038_v41  ;;  %v3834_v32 = vor.u32 %v5028_v30, %v3833_v29 }
  0x83   : > { %1287 = vmatpush.bf16.msra.mxu1 %v4030_v0 }
  0x84   : > { %1275 = vmatpush.bf16.msra.mxu0 %v3978_v8 }
  0x86   : > { %1301 = vmatpush.bf16.msra.mxu2 %v3986_v35  ;;  %1314 = vmatpush.bf16.msra.mxu3 %v3990_v55  ;;  %v3838_v35 = vor.u32 %v5022_v33, %v3835_v34  ;;  %v669_v55 = vperm.slane %v659_v44, 6 }
  0x87   : > { %1288 = vmatpush.bf16.msra.mxu1 %v3982_v15  ;;  %v673_v15 = vperm.slane %v660_v13, 2 }
  0x88   : > { %1276 = vmatpush.bf16.msra.mxu0 %v3930_v19 }
  0x8a   : > { %1302 = vmatpush.bf16.msra.mxu2 %v3938_v49  ;;  %1315 = vmatpush.bf16.msra.mxu3 %v3942_v4  ;;  %v664_v49 = vperm.slane %v659_v44, 1 }
  0x8b   : > { %1289 = vmatpush.bf16.msra.mxu1 %v3934_v24 }
  0x8c   : > { %1277 = vmatpush.bf16.msra.mxu0 %v3882_v28 }
  0x8e   : > { %1303 = vmatpush.bf16.msra.mxu2 %v3890_v60  ;;  %1316 = vmatpush.bf16.msra.mxu3 %v3894_v16  ;;  %v671_v16 = vperm.slane %v660_v13, 0  ;;  %v5145_v13 = vld [vmem:[#allocation7 + $0xf8] sm:$0xff] }
  0x8f   : > { %1290 = vmatpush.bf16.msra.mxu1 %v3886_v31 }
  0x90   : > { %1278 = vmatpush.bf16.msra.mxu0 %v3834_v32 }
  0x92   : > { %1304 = vmatpush.bf16.msra.mxu2 %v3842_v12  ;;  %1317 = vmatpush.bf16.msra.mxu3 %v3846_v25 }
  0x93   : > { %1291 = vmatpush.bf16.msra.mxu1 %v3838_v35  ;;  %1279 = vmatmul.bf16.vlgmr.msra.gmra.mxu0 %v5850_v51 }
  0x95   : > { %1305 = vmatmul.bf16.vlgmr.msra.gmra.mxu2 %v5850_v51  ;;  %1318 = vmatmul.bf16.vlgmr.msra.gmra.mxu3 %v5850_v51 }
  0x96   : > { %1292 = vmatmul.bf16.vlgmr.msra.gmra.mxu1 %v5850_v51  ;;  %v670_v51 = vperm.slane %v659_v44, 7 }
  0xd0   : > { %v1176_v36 = vpop.f32.mrf.mxu0 }
  0xd1   : > { %v1189_v37 = vpop.f32.mrf.mxu1  ;;  %v1177_v56 = vadd.f32 %v1176_v36, %v663_v48 }
  0xd2   : > { %v1190_v57 = vadd.f32 %v1189_v37, %v664_v49 }
  0xd4   : > { %v1323_v63 = vpack.c.bf16 %v1190_v57, %v1177_v56 }
  0xd6   : > { %v1376_v5 = vrot.slane %v1323_v63, 4 }
  0xd8   : > { %v1202_v38 = vpop.f32.mrf.mxu2  ;;  %v1178_v39 = vpop.f32.mrf.mxu0 }
  0xd9   : > { %v1191_v41 = vpop.f32.mrf.mxu1  ;;  %v1203_v7 = vadd.f32 %v1202_v38, %v665_v2 }
  0xda   : > { %v1215_v40 = vpop.f32.mrf.mxu3 }
  0xdb   : > { %v1216_v8 = vadd.f32 %v1215_v40, %v666_v3 }
  0xdd   : > { %v1324_v11 = vpack.c.bf16 %v1216_v8, %v1203_v7  ;;  %v5121_v7 = vld [vmem:[#allocation7 + $0x38] sm:$0xff]  ;;  %v5120_v8 = vld [vmem:[#allocation7 + $0x30] sm:$0xff] }
  0xdf   : > { %v1472_v12 = vrot.slane %v1324_v11, 4 }
  0xe0   : > { %v1204_v42 = vpop.f32.mrf.mxu2 }
  0xe2   : > { %v1217_v43 = vpop.f32.mrf.mxu3 }
  0xf0   : > { %v1228_v47 = vpop.f32.mrf.mxu0 }
  0xf1   : > { %v1229_v50 = vadd.f32 %v1228_v47, %v667_v45  ;;  %v1241_v52 = vpop.f32.mrf.mxu1 }
  0xf2   : > { %v1242_v53 = vadd.f32 %v1241_v52, %v668_v46 }
  0xf4   : > { %v1325_v54 = vpack.c.bf16 %v1242_v53, %v1229_v50 }
  0xf6   : > { %v1379_v58 = vrot.slane %v1325_v54, 4  ;;  %1336 = vmatpush.bf16.xpose.msrb.mxu3 %v1325_v54 }
  0xf8   : > { %v1254_v59 = vpop.f32.mrf.mxu2  ;;  %v1267_v61 = vpop.f32.mrf.mxu3  ;;  %1390 = vmatpush.bf16.xpose.msrb.mxu2 %v1379_v58 }
  0xf9   : > { %v1255_v60 = vadd.f32 %v1254_v59, %v669_v55  ;;  %v1230_v62 = vpop.f32.mrf.mxu0  ;;  %v1268_v0 = vadd.f32 %v1267_v61, %v670_v51  ;;  %v1243_v1 = vpop.f32.mrf.mxu1 }
  0xfb   : > { %v1326_v4 = vpack.c.bf16 %v1268_v0, %v1255_v60 }
  0xfd   : > { %v1475_v6 = vrot.slane %v1326_v4, 4  ;;  %1434 = vmatpush.bf16.xpose.msrb.mxu0 %v1326_v4  ;;  %1337 = vmatmul.bf16.vlgmr.msrb.gmra.mxu3 %v1323_v63 }
  0xff   : > { %1391 = vmatmul.bf16.vlgmr.msrb.gmra.mxu2 %v1376_v5 }
 0x100   : > { %v1256_v9 = vpop.f32.mrf.mxu2  ;;  %v1269_v10 = vpop.f32.mrf.mxu3  ;;  %1486 = vmatpush.bf16.xpose.msra.mxu2 %v1475_v6 }
 0x101   : > { %v5137_v10 = vld [vmem:[#allocation7 + $0xb8] sm:$0xff] }
 0x104   : > { %1435 = vmatmul.bf16.vlgmr.msrb.gmra.mxu0 %v1324_v11 }
 0x105   : > { %1787 = vmatpush.bf16.msra.mxu0 %v5121_v7 }
 0x108   : > { %1813 = vmatpush.bf16.msrb.mxu2 %v5137_v10 }
 0x109   : > { %1788 = vmatpush.bf16.msra.mxu0 %v5120_v8 }
 0x10f   : > { %1487 = vmatmul.bf16.vlgmr.msra.gmra.mxu2 %v1472_v12 }
 0x110   : > { %v1280_v20 = vpop.f32.mrf.mxu0 }
 0x111   : > { %v1281_v21 = vadd.f32 %v1280_v20, %v671_v16  ;;  %v5119_v16 = vld [vmem:[#allocation7 + $0x28] sm:$0xff] }
 0x112   : > { %1789 = vmatpush.bf16.msra.mxu0 %v5119_v16 }
 0x113   : > { %v1293_v24 = vpop.f32.mrf.mxu1 }
 0x114   : > { %v1294_v25 = vadd.f32 %v1293_v24, %v672_v18  ;;  %v5135_v18 = vld [vmem:[#allocation7 + $0xa8] sm:$0xff] }
 0x115   : > { %v5143_v24 = vld [vmem:[#allocation7 + $0xe8] sm:$0xff] }
 0x116   : > { %v1327_v28 = vpack.c.bf16 %v1294_v25, %v1281_v21 }
 0x118   : > { %v1306_v14 = vpop.f32.mrf.mxu2  ;;  %v1319_v22 = vpop.f32.mrf.mxu3  ;;  %v1382_v31 = vrot.slane %v1327_v28, 4  ;;  %v1360_v32 = vsel %vm1358_vm0, %v1327_v28, 0  ;;  %v5116_v28 = vld [vmem:[#allocation7 + $0x10] sm:$0xff] }
 0x119   : > { %v1307_v19 = vadd.f32 %v1306_v14, %v673_v15  ;;  %v1320_v23 = vadd.f32 %v1319_v22, %v674_v17  ;;  %1369 = vmatpush.bf16.msrb.mxu1 %v1360_v32  ;;  %v1282_v33 = vpop.f32.mrf.mxu0  ;;  %v5136_v14 = vld [vmem:[#allocation7 + $0xb0] sm:$0xff]  ;;  %v5127_v32 = vld [vmem:[#allocation7 + $0x68] sm:$0xff] }
 0x11a   : > { %v1412_v36 = vsel %vm1358_vm0, %v1382_v31, 0  ;;  %v5144_v17 = vld [vmem:[#allocation7 + $0xf0] sm:$0xff]  ;;  %1814 = vmatpush.bf16.msrb.mxu2 %v5136_v14 }
 0x11b   : > { %v1328_v27 = vpack.c.bf16 %v1320_v23, %v1307_v19  ;;  %1421 = vmatpush.bf16.msra.mxu3 %v1412_v36  ;;  %v1295_v37 = vpop.f32.mrf.mxu1  ;;  %v5118_v19 = vld [vmem:[#allocation7 + $0x20] sm:$0xff]  ;;  %v5129_v23 = vld [vmem:[#allocation7 + $0x78] sm:$0xff] }
 0x11c   : > { %1790 = vmatpush.bf16.msra.mxu0 %v5118_v19 }
 0x11d   : > { %v1478_v29 = vrot.slane %v1328_v27, 4  ;;  %v1456_v30 = vsel %vm1358_vm0, %v1328_v27, 0  ;;  %v5128_v27 = vld [vmem:[#allocation7 + $0x70] sm:$0xff] }
 0x11e   : > { %1465 = vmatpush.bf16.msra.mxu1 %v1456_v30  ;;  %1815 = vmatpush.bf16.msrb.mxu2 %v5135_v18  ;;  %v558_v18 = vlaneseq }
 0x11f   : > { %v1508_v34 = vsel %vm1358_vm0, %v1478_v29, 0 }
 0x120   : > { %v1308_v26 = vpop.f32.mrf.mxu2  ;;  %v1321_v35 = vpop.f32.mrf.mxu3  ;;  %1517 = vmatpush.bf16.msrb.mxu3 %v1508_v34  ;;  %v5115_v34 = vld [vmem:[#allocation7 + $0x8] sm:$0xff]  ;;  %v5887_v19 = vand.u32 127, %v558_v18  ;;  %v4671_v18 = vld [vmem:[#allocation2 + $0x570] sm:$0xf0] }
 0x121   : > { %v5117_v26 = vld [vmem:[#allocation7 + $0x18] sm:$0xff]  ;;  %v5126_v35 = vld [vmem:[#allocation7 + $0x60] sm:$0xff] }
 0x122   : > { %1791 = vmatpush.bf16.msra.mxu0 %v5117_v26  ;;  %vm560_vm2 = vcmp.lt.s32.totalorder %v5887_v19, 32  ;;  %v5151_v26 = vld [vmem:[%s6096_s7 + $0x28] sm:$0xff]  ;;  %v5309_v19 = vld [vmem:[%s6102_s13 + $0x18] sm:$0xff] }
 0x126   : > { %1792 = vmatpush.bf16.msra.mxu0 %v5116_v28  ;;  %v5149_v28 = vld [vmem:[%s6096_s7 + $0x18] sm:$0xff] }
 0x12a   : > { %1793 = vmatpush.bf16.msra.mxu0 %v5115_v34 }
 0x180   : > { %v1338_v38 = vpop.f32.mrf.mxu3 }
 0x181   : > { %v1436_v39 = vpop.f32.mrf.mxu0  ;;  %v1343_v45 = vsel %vm1342_vm1, %v1338_v38, -inf }
 0x182   : > { %v1392_v40 = vpop.f32.mrf.mxu2  ;;  %v1440_v49 = vsel %vm1342_vm1, %v1436_v39, -inf }
 0x183   : > { %v1396_v41 = vsel %vm1342_vm1, %v1392_v40, -inf }
 0x184   : > { %1397 = vmax.xlane.f32.xlu0 %v1396_v41  ;;  %v5123_v41 = vld [vmem:[#allocation7 + $0x48] sm:$0xff] }
 0x188   : > { %v1340_v42 = vpop.f32.mrf.mxu3 }
 0x189   : > { %v1438_v43 = vpop.f32.mrf.mxu0  ;;  %v5122_v42 = vld [vmem:[#allocation7 + $0x40] sm:$0xff] }
 0x18a   : > { %v1394_v44 = vpop.f32.mrf.mxu2  ;;  %v5142_v43 = vld [vmem:[#allocation7 + $0xe0] sm:$0xff] }
 0x18b   : > { %v5114_v44 = vld [vmem:[#allocation7] sm:$0xff] }
 0x18c   : > { %1344 = vmax.xlane.f32.xlu0 %v1343_v45  ;;  %v5134_v45 = vld [vmem:[#allocation7 + $0xa0] sm:$0xff]  ;;  %1794 = vmatpush.bf16.msra.mxu0 %v5114_v44  ;;  %v5156_v44 = vld [vmem:[#allocation8 + $0x10] sm:$0xff] }
 0x18d   : > { %1816 = vmatpush.bf16.msrb.mxu2 %v5134_v45 }
 0x192   : > { %v1488_v46 = vpop.f32.mrf.mxu2 }
 0x193   : > { %v1492_v47 = vsel %vm1342_vm1, %v1488_v46, -inf }
 0x194   : > { %1493 = vmax.xlane.f32.xlu1 %v1492_v47  ;;  %v5133_v47 = vld [vmem:[#allocation7 + $0x98] sm:$0xff] }
 0x195   : > { %1817 = vmatpush.bf16.msrb.mxu2 %v5133_v47  ;;  %v5401_v47 = vld [vmem:[%s6094_s5] ss:$0 sm:$0xff] }
 0x19a   : > { %v1490_v48 = vpop.f32.mrf.mxu2 }
 0x19b   : > { %v5140_v48 = vld [vmem:[#allocation7 + $0xd0] sm:$0xff] }
 0x19c   : > { %1441 = vmax.xlane.f32.xlu1 %v1440_v49  ;;  %v5132_v49 = vld [vmem:[#allocation7 + $0x90] sm:$0xff] }
 0x19d   : > { %1818 = vmatpush.bf16.msrb.mxu2 %v5132_v49 }
 0x1f7   : > { %v1398_v50 = vpop.xlane.xlu0 %1397 }
 0x1f8   : > { %v1399_v52 = vsub.f32 %v1392_v40, %v1398_v50  ;;  %v5124_v40 = vld [vmem:[#allocation7 + $0x50] sm:$0xff]  ;;  %v5139_v50 = vld [vmem:[#allocation7 + $0xc8] sm:$0xff] }
 0x1fa   : > { %v1400_v53 = vmul.f32 1.442695, %v1399_v52  ;;  %v5131_v52 = vld [vmem:[#allocation7 + $0x88] sm:$0xff] }
 0x1fb   : > { %1819 = vmatpush.bf16.msrb.mxu2 %v5131_v52 }
 0x1fc   : > { %5415 = vpow2.f32 %v1400_v53  ;;  %v5138_v53 = vld [vmem:[#allocation7 + $0xc0] sm:$0xff] }
 0x1ff   : > { %v1345_v54 = vpop.xlane.xlu0 %1344 }
 0x200   : > { %v1346_v55 = vsub.f32 %v1338_v38, %v1345_v54  ;;  %v5125_v38 = vld [vmem:[#allocation7 + $0x58] sm:$0xff]  ;;  %v5130_v54 = vld [vmem:[#allocation7 + $0x80] sm:$0xff] }
 0x201   : > { %1820 = vmatpush.bf16.msrb.mxu2 %v5130_v54 }
 0x202   : > { %v5416_v56 = vpop.eup %5415  ;;  %v1347_v57 = vmul.f32 1.442695, %v1346_v55 }
 0x203   : > { %v1402_v51 = vsel %vm1342_vm1, %v5416_v56, 0.0 }
 0x204   : > { %5417 = vpow2.f32 %v1347_v57  ;;  %1403 = vadd.xlane.f32.xlu2 %v1402_v51 }
 0x207   : > { %v1494_v58 = vpop.xlane.xlu1 %1493 }
 0x208   : > { %v1495_v59 = vsub.f32 %v1488_v46, %v1494_v58  ;;  %v5141_v46 = vld [vmem:[#allocation7 + $0xd8] sm:$0xff] }
 0x20a   : > { %v5418_v60 = vpop.eup %5417  ;;  %v1496_v61 = vmul.f32 1.442695, %v1495_v59 }
 0x20b   : > { %v1349_v62 = vsel %vm1342_vm1, %v5418_v60, 0.0 }
 0x20c   : > { %5419 = vpow2.f32 %v1496_v61  ;;  %1350 = vadd.xlane.f32.xlu2 %v1349_v62 }
 0x20f   : > { %v1442_v63 = vpop.xlane.xlu1 %1441 }
 0x210   : > { %v1443_v0 = vsub.f32 %v1436_v39, %v1442_v63 }
 0x212   : > { %v5420_v1 = vpop.eup %5419  ;;  %v1444_v2 = vmul.f32 1.442695, %v1443_v0 }
 0x213   : > { %v1498_v3 = vsel %vm1342_vm1, %v5420_v1, 0.0 }
 0x214   : > { %5421 = vpow2.f32 %v1444_v2  ;;  %1499 = vadd.xlane.f32.xlu0 %v1498_v3 }
 0x21a   : > { %v5422_v4 = vpop.eup %5421 }
 0x21b   : > { %v1446_v5 = vsel %vm1342_vm1, %v5422_v4, 0.0 }
 0x21c   : > { %1447 = vadd.xlane.f32.xlu1 %v1446_v5 }
 0x277   : > { %v1404_v6 = vpop.xlane.xlu2 %1403 }
 0x278   : > { %5423 = vrcp.f32 %v1404_v6  ;;  %v5400_v6 = vld [vmem:[%s6093_s4] ss:$0 sm:$0xff] }
 0x27e   : > { %v5424_v9 = vpop.eup %5423 }
 0x27f   : > { %v1406_v11 = vmul.f32 %v5424_v9, %v5416_v56  ;;  %v1351_v12 = vpop.xlane.xlu2 %1350 }
 0x280   : > { %5425 = vrcp.f32 %v1351_v12 }
 0x281   : > { %v1407_v15 = vpack.c.bf16 %v1406_v11, %v1406_v11 }
 0x283   : > { %4184 = vmatmul.msk.bf16.vlgmr.msra.gmra.mxu3 %vm1342_vm1, %v1407_v15 }
 0x284   : > { %1826 = vmatpush.bf16.msra.mxu3 %v5145_v13  ;;  %v5455_v13 = vld [vmem:[%s5847_s19] sm:$0xff]  ;;  %s3682_s19 = sshll.u32 %s552_s18, 4  ;;  %s3683_s19 = int_to_ptr.vmem [resolvable:$true] %s3682_s19 }
 0x286   : > { %v5426_v20 = vpop.eup %5425 }
 0x287   : > { %v1353_v21 = vmul.f32 %v5426_v20, %v5418_v60  ;;  %v1500_v22 = vpop.xlane.xlu0 %1499 }
 0x288   : > { %5427 = vrcp.f32 %v1500_v22  ;;  %1827 = vmatpush.bf16.msra.mxu3 %v5144_v17  ;;  %v5153_v17 = vld [vmem:[%s6096_s7 + $0x38] sm:$0xff] }
 0x289   : > { %v1354_v25 = vpack.c.bf16 %v1353_v21, %v1353_v21  ;;  %1942 = vmatpush.bf16.msrb.mxu0 %v5153_v17  ;;  %v5234_v17 = vld [vmem:[#allocation2 + $0x544] sm:$0xf] }
 0x28b   : > { %4183 = vmatmul.msk.bf16.vlgmr.msrb.gmra.mxu1 %vm1342_vm1, %v1354_v25  ;;  %v5152_v25 = vld [vmem:[%s6096_s7 + $0x30] sm:$0xff] }
 0x28c   : > { %1800 = vmatpush.bf16.msrb.mxu1 %v5129_v23  ;;  %1828 = vmatpush.bf16.msra.mxu3 %v5143_v24 }
 0x28d   : > { %1943 = vmatpush.bf16.msrb.mxu0 %v5152_v25 }
 0x28e   : > { %v5428_v29 = vpop.eup %5427 }
 0x28f   : > { %v1502_v30 = vmul.f32 %v5428_v29, %v5420_v1  ;;  %v1448_v31 = vpop.xlane.xlu1 %1447  ;;  %v5148_v29 = vld [vmem:[%s6096_s7 + $0x10] sm:$0xff] }
 0x290   : > { %5429 = vrcp.f32 %v1448_v31  ;;  %1801 = vmatpush.bf16.msrb.mxu1 %v5128_v27  ;;  %1829 = vmatpush.bf16.msra.mxu3 %v5142_v43  ;;  %v5150_v27 = vld [vmem:[%s6096_s7 + $0x20] sm:$0xff] }
 0x291   : > { %v1503_v33 = vpack.c.bf16 %v1502_v30, %v1502_v30  ;;  %1944 = vmatpush.bf16.msrb.mxu0 %v5151_v26  ;;  %v5147_v30 = vld [vmem:[%s6096_s7 + $0x8] sm:$0xff]  ;;  %v5146_v31 = vld [vmem:[%s6096_s7] sm:$0xff]  ;;  %v4679_v26 = vld [vmem:[#allocation2 + $0x578] sm:$0xf0] }
 0x293   : > { %4186 = vmatmul.msk.bf16.vlgmr.msrb.gmra.mxu3 %vm1342_vm1, %v1503_v33 }
 0x294   : > { %1802 = vmatpush.bf16.msrb.mxu1 %v5127_v32  ;;  %1830 = vmatpush.bf16.msra.mxu3 %v5141_v46  ;;  %v5161_v32 = vld [vmem:[#allocation8 + $0x38] sm:$0xff] }
 0x295   : > { %1945 = vmatpush.bf16.msrb.mxu0 %v5150_v27  ;;  %v4621_v27 = vld [vmem:[#allocation2 + $0x4e0] sm:$0xf] }
 0x296   : > { %v5430_v36 = vpop.eup %5429 }
 0x297   : > { %v1450_v37 = vmul.f32 %v5430_v36, %v5422_v4 }
 0x298   : > { %1803 = vmatpush.bf16.msrb.mxu1 %v5126_v35  ;;  %1831 = vmatpush.bf16.msra.mxu3 %v5140_v48  ;;  %v5160_v35 = vld [vmem:[#allocation8 + $0x30] sm:$0xff] }
 0x299   : > { %v1451_v39 = vpack.c.bf16 %v1450_v37, %v1450_v37  ;;  %1946 = vmatpush.bf16.msrb.mxu0 %v5149_v28  ;;  %v5159_v37 = vld [vmem:[#allocation8 + $0x28] sm:$0xff]  ;;  %v5228_v28 = vld [vmem:[#allocation2 + $0x50c] sm:$0xf0] }
 0x29b   : > { %4185 = vmatmul.msk.bf16.vlgmr.msra.gmra.mxu1 %vm1342_vm1, %v1451_v39 }
 0x29c   : > { %1804 = vmatpush.bf16.msrb.mxu1 %v5125_v38  ;;  %1832 = vmatpush.bf16.msra.mxu3 %v5139_v50  ;;  %v5158_v38 = vld [vmem:[#allocation8 + $0x20] sm:$0xff]  ;;  %v5402_v50 = vld [vmem:[%s6095_s6] ss:$0 sm:$0xff] }
 0x29d   : > { %1947 = vmatpush.bf16.msrb.mxu0 %v5148_v29 }
 0x2a0   : > { %1805 = vmatpush.bf16.msrb.mxu1 %v5124_v40  ;;  %1833 = vmatpush.bf16.msra.mxu3 %v5138_v53 }
 0x2a1   : > { %1948 = vmatpush.bf16.msrb.mxu0 %v5147_v30  ;;  %v5222_v30 = vld [vmem:[#allocation2 + $0x4e4] sm:$0xf] }
 0x2a4   : > { %1806 = vmatpush.bf16.msrb.mxu1 %v5123_v41  ;;  %v5157_v41 = vld [vmem:[#allocation8 + $0x18] sm:$0xff] }
 0x2a5   : > { %1949 = vmatpush.bf16.msrb.mxu0 %v5146_v31  ;;  %v4623_v31 = vld [vmem:[#allocation2 + $0x510] sm:$0xf0] }
 0x2a8   : > { %1807 = vmatpush.bf16.msrb.mxu1 %v5122_v42 }
 0x2ac   : > { %2025 = vmatpush.bf16.msra.mxu1 %v5161_v32  ;;  %v4629_v32 = vld [vmem:[#allocation2 + $0x4e8] sm:$0xf] }
 0x2b0   : > { %2026 = vmatpush.bf16.msra.mxu1 %v5160_v35  ;;  %v5223_v35 = vld [vmem:[#allocation2 + $0x4ec] sm:$0xf] }
 0x2b4   : > { %2027 = vmatpush.bf16.msra.mxu1 %v5159_v37  ;;  %v4626_v37 = vor.u32 %v5222_v30, %v4623_v31  ;;  %v4381_v31 = vld [vmem:[#allocation2 + $0x300] sm:$0xf] }
 0x2b8   : > { %2028 = vmatpush.bf16.msra.mxu1 %v5158_v38 }
 0x2bc   : > { %2029 = vmatpush.bf16.msra.mxu1 %v5157_v41  ;;  %v5210_v41 = vld [vmem:[#allocation2 + $0x484] sm:$0xf] }
 0x2c0   : > { %2030 = vmatpush.bf16.msra.mxu1 %v5156_v44  ;;  %v4581_v44 = vld [vmem:[#allocation2 + $0x488] sm:$0xf] }
 0x306   : > { %v1423_v55 = vpop.f32.mrf.mxu3 }
 0x307   : > { %v1524_v56 = vpack.c.bf16 %v1423_v55, %v1423_v55  ;;  %v5155_v55 = vld [vmem:[#allocation8 + $0x8] sm:$0xff] }
 0x308   : > { %v1371_v57 = vpop.f32.mrf.mxu1  ;;  %2031 = vmatpush.bf16.msra.mxu1 %v5155_v55 }
 0x309   : > { %v1523_v51 = vpack.c.bf16 %v1371_v57, %v1371_v57  ;;  %1808 = vmatmul.bf16.vlgmr.msrb.gmra.mxu1 %v1524_v56  ;;  %v5154_v56 = vld [vmem:[#allocation8] sm:$0xff]  ;;  %v5403_v57 = vld [vmem:[%s6097_s8] ss:$0 sm:$0xff] }
 0x30b   : > { %1795 = vmatmul.bf16.vlgmr.msra.gmra.mxu0 %v1523_v51 }
 0x30c   : > { %2032 = vmatpush.bf16.msra.mxu1 %v5154_v56  ;;  %v4527_v56 = vld [vmem:[#allocation2 + $0x450] sm:$0xf0] }
 0x30e   : > { %v1425_v58 = vpop.f32.mrf.mxu3 }
 0x310   : > { %v1373_v59 = vpop.f32.mrf.mxu1 }
 0x316   : > { %v1519_v60 = vpop.f32.mrf.mxu3 }
 0x317   : > { %v1526_v61 = vpack.c.bf16 %v1519_v60, %v1519_v60 }
 0x318   : > { %v1467_v62 = vpop.f32.mrf.mxu1 }
 0x319   : > { %v1525_v63 = vpack.c.bf16 %v1467_v62, %v1467_v62  ;;  %1834 = vmatmul.bf16.vlgmr.msra.gmra.mxu3 %v1526_v61  ;;  %v5404_v62 = vld [vmem:[%s6099_s10] ss:$0 sm:$0xff] }
 0x31b   : > { %1821 = vmatmul.bf16.vlgmr.msrb.gmra.mxu2 %v1525_v63 }
 0x31e   : > { %v1521_v0 = vpop.f32.mrf.mxu3 }
 0x320   : > { %v1469_v1 = vpop.f32.mrf.mxu1 }
 0x386   : > { %v1809_v2 = vpop.f32.mrf.mxu1 }
 0x388   : > { %v1796_v3 = vpop.f32.mrf.mxu0 }
 0x389   : > { %v1797_v7 = vadd.f32 %v5400_v6, %v1796_v3  ;;  %v4717_v3 = vld [vmem:[#allocation2 + $0x5a0] sm:$0xf] }
 0x38b   : > { %v1810_v9 = vadd.f32 %v1809_v2, %v1797_v7  ;;  %v4719_v7 = vld [vmem:[#allocation2 + $0x5d0] sm:$0xf0] }
 0x38e   : > { %v1811_v4 = vpop.f32.mrf.mxu1 }
 0x38f   : > { %v5252_v4 = vld [vmem:[#allocation2 + $0x5cc] sm:$0xf0] }
 0x390   : > { %v1798_v5 = vpop.f32.mrf.mxu0  ;;  %v4718_v6 = vor.u32 %v5252_v4, %v4717_v3  ;;  %v4479_v4 = vld [vmem:[#allocation2 + $0x3f0] sm:$0xf0] }
 0x391   : > { %v5246_v5 = vld [vmem:[#allocation2 + $0x5a4] sm:$0xf] }
 0x392   : > { %2677 = vmatpush.bf16.msra.mxu2 %v4718_v6  ;;  %v5193_v6 = vld [vmem:[#allocation2 + $0x3f4] sm:$0xf0] }
 0x39c   : > { %v1835_v8 = vpop.f32.mrf.mxu3 }
 0x39e   : > { %v1822_v10 = vpop.f32.mrf.mxu2 }
 0x39f   : > { %v1823_v11 = vadd.f32 %v1822_v10, %v1810_v9  ;;  %v5253_v9 = vld [vmem:[#allocation2 + $0x5d4] sm:$0xf0]  ;;  %v4722_v10 = vor.u32 %v5246_v5, %v4719_v7  ;;  %v4485_v5 = vld [vmem:[#allocation2 + $0x3c8] sm:$0xf]  ;;  %v5187_v7 = vld [vmem:[#allocation2 + $0x3cc] sm:$0xf] }
 0x3a1   : > { %v1836_v12 = vadd.f32 %v1835_v8, %v1823_v11  ;;  %v4725_v8 = vld [vmem:[#allocation2 + $0x5a8] sm:$0xf]  ;;  %2690 = vmatpush.bf16.msrb.mxu3 %v4722_v10 }
 0x3a2   : > { %v4726_v11 = vor.u32 %v5253_v9, %v4725_v8  ;;  %v4487_v8 = vld [vmem:[#allocation2 + $0x3f8] sm:$0xf0] }
 0x3a3   : > { %v1839_v14 = vadd.f32 %v5455_v13, %v1836_v12  ;;  %v5247_v12 = vld [vmem:[#allocation2 + $0x5ac] sm:$0xf]  ;;  %v4727_v13 = vld [vmem:[#allocation2 + $0x5d8] sm:$0xf0] }
 0x3a4   : > { %v1837_v15 = vpop.f32.mrf.mxu3  ;;  %2703 = vmatpush.bf16.msra.mxu0 %v4726_v11  ;;  %v4486_v11 = vor.u32 %v5193_v6, %v4485_v5  ;;  %v5224_v5 = vld [vmem:[#allocation2 + $0x4f4] sm:$0xf] }
 0x3a5   : > { %1842 = vadd.xlane.f32.xlu2 %v1839_v14  ;;  %v4730_v15 = vor.u32 %v5247_v12, %v4727_v13  ;;  %v4429_v12 = vld [vmem:[#allocation2 + $0x360] sm:$0xf]  ;;  %v5180_v13 = vld [vmem:[#allocation2 + $0x38c] sm:$0xf0] }
 0x3a6   : > { %v1824_v16 = vpop.f32.mrf.mxu2 }
 0x3a7   : > { %v5240_v16 = vld [vmem:[#allocation2 + $0x56c] sm:$0xf0]  ;;  %2716 = vmatpush.bf16.msrb.mxu1 %v4730_v15  ;;  %v4490_v15 = vor.u32 %v5187_v7, %v4487_v8  ;;  %v4639_v7 = vld [vmem:[#allocation2 + $0x520] sm:$0xf0]  ;;  %v4645_v8 = vld [vmem:[#allocation2 + $0x4f8] sm:$0xf] }
 0x418   : > { %v1843_v20 = vpop.xlane.xlu2 %1842 }
 0x419   : > { %v1844_v21 = vmul.f32 0.03125, %v1843_v20 }
 0x41b   : > { %v1845_v22 = vsub.f32 %v1839_v14, %v1844_v21  ;;  %v4669_v14 = vld [vmem:[#allocation2 + $0x540] sm:$0xf]  ;;  %v4674_v21 = vor.u32 %v5234_v17, %v4671_v18  ;;  %v4437_v17 = vld [vmem:[#allocation2 + $0x368] sm:$0xf]  ;;  %v5181_v18 = vld [vmem:[#allocation2 + $0x394] sm:$0xf0] }
 0x41c   : > { %v4670_v20 = vor.u32 %v5240_v16, %v4669_v14  ;;  %v5174_v14 = vld [vmem:[#allocation2 + $0x364] sm:$0xf]  ;;  %v4431_v16 = vld [vmem:[#allocation2 + $0x390] sm:$0xf0] }
 0x41d   : > { %v1848_v23 = vsel %vm560_vm2, %v1845_v22, 0.0  ;;  %v4677_v22 = vld [vmem:[#allocation2 + $0x548] sm:$0xf]  ;;  %2691 = vmatpush.bf16.msrb.mxu3 %v4674_v21  ;;  %v4439_v21 = vld [vmem:[#allocation2 + $0x398] sm:$0xf0] }
 0x41e   : > { %v1849_v24 = vmul.f32 %v1848_v23, %v1848_v23  ;;  %2678 = vmatpush.bf16.msra.mxu2 %v4670_v20  ;;  %v5175_v20 = vld [vmem:[#allocation2 + $0x36c] sm:$0xf] }
 0x420   : > { %1850 = vadd.xlane.f32.xlu0 %v1849_v24  ;;  %v5235_v24 = vld [vmem:[#allocation2 + $0x54c] sm:$0xf] }
 0x421   : > { %v4682_v29 = vor.u32 %v5235_v24, %v4679_v26  ;;  %2692 = vmatpush.bf16.msrb.mxu3 %v4626_v37  ;;  %v4434_v24 = vor.u32 %v5174_v14, %v4431_v16  ;;  %v5169_v37 = vld [vmem:[#allocation2 + $0x334] sm:$0xf0]  ;;  %v5218_v16 = vld [vmem:[#allocation2 + $0x4bc] sm:$0xf0] }
 0x423   : > { %2717 = vmatpush.bf16.msrb.mxu1 %v4682_v29 }
 0x493   : > { %v1851_v33 = vpop.xlane.xlu0 %1850 }
 0x494   : > { %v1852_v34 = vmul.f32 0.03125, %v1851_v33  ;;  %v4622_v33 = vor.u32 %v5228_v28, %v4621_v27  ;;  %v4442_v27 = vor.u32 %v5175_v20, %v4439_v21  ;;  %v4591_v20 = vld [vmem:[#allocation2 + $0x4c0] sm:$0xf0]  ;;  %v4597_v21 = vld [vmem:[#allocation2 + $0x498] sm:$0xf] }
 0x496   : > { %v1853_v36 = vadd.f32 1e-05, %v1852_v34  ;;  %v5229_v34 = vld [vmem:[#allocation2 + $0x514] sm:$0xf0]  ;;  %2679 = vmatpush.bf16.msra.mxu2 %v4622_v33  ;;  %v5162_v33 = vld [vmem:[#allocation2 + $0x304] sm:$0xf] }
 0x497   : > { %v4630_v38 = vor.u32 %v5229_v34, %v4629_v32  ;;  %v5168_v32 = vld [vmem:[#allocation2 + $0x32c] sm:$0xf0] }
 0x498   : > { %5431 = vrsqrt.f32 %v1853_v36  ;;  %vm1860_vm4 = vweird.f32 %v1853_v36  ;;  %v4382_v34 = vor.u32 %v5168_v32, %v4381_v31  ;;  %v5200_v31 = vld [vmem:[#allocation2 + $0x434] sm:$0xf] }
 0x49e   : > { %v5432_v39 = vpop.eup %5431 }
 0x49f   : > { %v1855_v40 = vmul.f32 %v5432_v39, %v1853_v36  ;;  %vm1861_vm3 = vweird.f32 %v5432_v39  ;;  %v4631_v36 = vld [vmem:[#allocation2 + $0x518] sm:$0xf0] }
 0x4a0   : > { %vm1862_vm5 = vmor %vm1860_vm4, %vm1861_vm3 }
 0x4a1   : > { %v1856_v42 = vmul.f32 %v5432_v39, %v1855_v40  ;;  %v5216_v40 = vld [vmem:[#allocation2 + $0x4ac] sm:$0xf0] }
 0x4a3   : > { %v1857_v43 = vmul.f32 0.5, %v1856_v42  ;;  %v4634_v42 = vor.u32 %v5223_v35, %v4631_v36  ;;  %v4383_v35 = vld [vmem:[#allocation2 + $0x330] sm:$0xf0]  ;;  %v4389_v36 = vld [vmem:[#allocation2 + $0x308] sm:$0xf] }
 0x4a5   : > { %v1858_v45 = vsub.f32 1.5, %v1857_v43  ;;  %v4575_v43 = vld [vmem:[#allocation2 + $0x4b0] sm:$0xf0]  ;;  %2718 = vmatpush.bf16.msrb.mxu1 %v4634_v42 }
 0x4a7   : > { %v1859_v46 = vmul.f32 %v5432_v39, %v1858_v45  ;;  %v5217_v45 = vld [vmem:[#allocation2 + $0x4b4] sm:$0xf0] }
 0x4a9   : > { %v1863_v48 = vsel %vm1862_vm5, %v5432_v39, %v1859_v46  ;;  %v4573_v39 = vld [vmem:[#allocation2 + $0x480] sm:$0xf]  ;;  %v5211_v46 = vld [vmem:[#allocation2 + $0x48c] sm:$0xf] }
 0x4aa   : > { %v1864_v49 = vmul.f32 %v1863_v48, %v1848_v23  ;;  %v5241_v23 = vld [vmem:[#allocation2 + $0x574] sm:$0xf0]  ;;  %v4574_v48 = vor.u32 %v5216_v40, %v4573_v39  ;;  %v5163_v39 = vld [vmem:[#allocation2 + $0x30c] sm:$0xf]  ;;  %v4391_v40 = vld [vmem:[#allocation2 + $0x338] sm:$0xf0] }
 0x4ab   : > { %v4678_v25 = vor.u32 %v5241_v23, %v4677_v22  ;;  %v4430_v22 = vor.u32 %v5180_v13, %v4429_v12  ;;  %v4394_v42 = vor.u32 %v5163_v39, %v4391_v40  ;;  %v5225_v12 = vld [vmem:[#allocation2 + $0x4fc] sm:$0xf]  ;;  %v4647_v13 = vld [vmem:[#allocation2 + $0x528] sm:$0xf0]  ;;  %v4493_v40 = vld [vmem:[#allocation2 + $0x3d0] sm:$0xf] }
 0x4ac   : > { %v1868_v52 = vmul.f32 %v5401_v47, %v1864_v49  ;;  %v4583_v47 = vld [vmem:[#allocation2 + $0x4b8] sm:$0xf0]  ;;  %v4578_v49 = vor.u32 %v5210_v41, %v4575_v43  ;;  %2680 = vmatpush.bf16.msra.mxu2 %v4574_v48  ;;  %v4733_v41 = vld [vmem:[#allocation2 + $0x5b0] sm:$0xf]  ;;  %v5254_v43 = vld [vmem:[#allocation2 + $0x5dc] sm:$0xf0]  ;;  %v4650_v14 = vor.u32 %v5225_v12, %v4647_v13 }
 0x4ad   : > { %2704 = vmatpush.bf16.msra.mxu0 %v4678_v25  ;;  %v4586_v55 = vor.u32 %v5211_v46, %v4583_v47  ;;  %v4438_v25 = vor.u32 %v5181_v18, %v4437_v17  ;;  %v4734_v46 = vor.u32 %v5254_v43, %v4733_v41  ;;  %v4741_v48 = vld [vmem:[#allocation2 + $0x5b8] sm:$0xf]  ;;  %v5212_v17 = vld [vmem:[#allocation2 + $0x494] sm:$0xf]  ;;  %v5194_v41 = vld [vmem:[#allocation2 + $0x3fc] sm:$0xf0] }
 0x4ae   : > { %v1872_v53 = vadd.f32 %v5402_v50, %v1868_v52  ;;  %v4582_v50 = vor.u32 %v5217_v45, %v4581_v44  ;;  %v4525_v52 = vld [vmem:[#allocation2 + $0x420] sm:$0xf]  ;;  %2693 = vmatpush.bf16.msrb.mxu3 %v4578_v49  ;;  %v5248_v44 = vld [vmem:[#allocation2 + $0x5b4] sm:$0xf]  ;;  %v4735_v45 = vld [vmem:[#allocation2 + $0x5e0] sm:$0xf0]  ;;  %v4494_v43 = vor.u32 %v5194_v41, %v4493_v40 }
 0x4af   : > { %2719 = vmatpush.bf16.msrb.mxu1 %v4586_v55  ;;  %v4738_v47 = vor.u32 %v5248_v44, %v4735_v45  ;;  %v5255_v49 = vld [vmem:[#allocation2 + $0x5e4] sm:$0xf0]  ;;  %v5242_v55 = vld [vmem:[#allocation2 + $0x57c] sm:$0xf0]  ;;  %v4495_v44 = vld [vmem:[#allocation2 + $0x400] sm:$0xf0] }
 0x4b0   : > { %v1873_v54 = vpack.c.bf16 %v1872_v53, %v1872_v53  ;;  %v4501_v45 = vld [vmem:[#allocation2 + $0x3d8] sm:$0xf]  ;;  %v4701_v40 = vld [vmem:[#allocation2 + $0x560] sm:$0xf]  ;;  %v5244_v41 = vld [vmem:[#allocation2 + $0x58c] sm:$0xf0] }
 0x4b1   : > { %2705 = vmatpush.bf16.msra.mxu0 %v4630_v38  ;;  %v4390_v38 = vor.u32 %v5169_v37, %v4389_v36 }
 0x4b2   : > { %1950 = vmatmul.bf16.vlgmr.msrb.gmra.mxu0 %v1873_v54  ;;  %v5198_v54 = vld [vmem:[#allocation2 + $0x424] sm:$0xf] }
 0x4b5   : > { %2706 = vmatpush.bf16.msra.mxu0 %v4582_v50  ;;  %v5249_v50 = vld [vmem:[#allocation2 + $0x5bc] sm:$0xf] }
 0x52f   : > { %v1951_v51 = vpop.f32.mrf.mxu0 }
 0x530   : > { %v1952_v58 = vadd.f32 %v5403_v57, %v1951_v51  ;;  %v4533_v57 = vld [vmem:[#allocation2 + $0x428] sm:$0xf]  ;;  %v5205_v51 = vld [vmem:[#allocation2 + $0x454] sm:$0xf0] }
 0x532   : > { %v1955_v59 = vmax.f32 %v1952_v58, 0.0  ;;  %v5199_v58 = vld [vmem:[#allocation2 + $0x42c] sm:$0xf] }
 0x534   : > { %v1956_v60 = vpack.c.bf16 %v1955_v59, %v1955_v59  ;;  %v4535_v59 = vld [vmem:[#allocation2 + $0x458] sm:$0xf0] }
 0x535   : > { %v4538_v3 = vor.u32 %v5199_v58, %v4535_v59  ;;  %v4687_v58 = vld [vmem:[#allocation2 + $0x580] sm:$0xf0]  ;;  %v4693_v59 = vld [vmem:[#allocation2 + $0x558] sm:$0xf] }
 0x536   : > { %2033 = vmatmul.bf16.vlgmr.msra.gmra.mxu1 %v1956_v60 }
 0x537   : > { %v1953_v61 = vpop.f32.mrf.mxu0  ;;  %2720 = vmatpush.bf16.msrb.mxu1 %v4538_v3  ;;  %v4637_v3 = vld [vmem:[#allocation2 + $0x4f0] sm:$0xf] }
 0x538   : > { %v4530_v61 = vor.u32 %v5198_v54, %v4527_v56  ;;  %v4685_v54 = vld [vmem:[#allocation2 + $0x550] sm:$0xf] }
 0x53a   : > { %2694 = vmatpush.bf16.msrb.mxu3 %v4530_v61  ;;  %v5243_v61 = vld [vmem:[#allocation2 + $0x584] sm:$0xf0] }
 0x53b   : > { %2721 = vmatpush.bf16.msrb.mxu1 %v4490_v15  ;;  %v4589_v15 = vld [vmem:[#allocation2 + $0x490] sm:$0xf] }
 0x53c   : > { %v4590_v18 = vor.u32 %v5218_v16, %v4589_v15 }
 0x53f   : > { %2722 = vmatpush.bf16.msrb.mxu1 %v4442_v27 }
 0x543   : > { %2723 = vmatpush.bf16.msrb.mxu1 %v4394_v42  ;;  %v5188_v42 = vld [vmem:[#allocation2 + $0x3d4] sm:$0xf] }
 0x5b3   : > { %v2034_v63 = vpop.f32.mrf.mxu1 }
 0x5b4   : > { %v2035_v0 = vadd.f32 %v5404_v62, %v2034_v63  ;;  %v4534_v62 = vor.u32 %v5205_v51, %v4533_v57  ;;  %v4477_v63 = vld [vmem:[#allocation2 + $0x3c0] sm:$0xf]  ;;  %v4686_v57 = vor.u32 %v5242_v55, %v4685_v54  ;;  %v5236_v51 = vld [vmem:[#allocation2 + $0x554] sm:$0xf] }
 0x5b5   : > { %v5182_v54 = vld [vmem:[#allocation2 + $0x39c] sm:$0xf0]  ;;  %v5176_v55 = vld [vmem:[#allocation2 + $0x374] sm:$0xf] }
 0x5b6   : > { %v5925_v1 = vadd.f32 %v2035_v0, %v1872_v53  ;;  %v5204_v53 = vld [vmem:[#allocation2 + $0x44c] sm:$0xf0]  ;;  %2707 = vmatpush.bf16.msra.mxu0 %v4534_v62  ;;  %v5237_v62 = vld [vmem:[#allocation2 + $0x55c] sm:$0xf] }
 0x5b7   : > { %v4526_v60 = vor.u32 %v5204_v53, %v4525_v52  ;;  %v5192_v0 = vld [vmem:[#allocation2 + $0x3ec] sm:$0xf0]  ;;  %v4742_v52 = vor.u32 %v5255_v49, %v4741_v48  ;;  %v4743_v53 = vld [vmem:[#allocation2 + $0x5e8] sm:$0xf0]  ;;  %v5189_v49 = vld [vmem:[#allocation2 + $0x3dc] sm:$0xf] }
 0x5b8   : > { %2041 = vadd.xlane.f32.xlu1 %v5925_v1  ;;  %v4478_v9 = vor.u32 %v5192_v0, %v4477_v63  ;;  %v4746_v56 = vor.u32 %v5249_v50, %v4743_v53  ;;  %v4695_v63 = vld [vmem:[#allocation2 + $0x588] sm:$0xf0]  ;;  %v4694_v0 = vor.u32 %v5243_v61, %v4693_v59  ;;  %v4445_v53 = vld [vmem:[#allocation2 + $0x370] sm:$0xf]  ;;  %v5177_v61 = vld [vmem:[#allocation2 + $0x37c] sm:$0xf] }
 0x5b9   : > { %2681 = vmatpush.bf16.msra.mxu2 %v4526_v60  ;;  %v4690_v60 = vor.u32 %v5236_v51, %v4687_v58  ;;  %v4503_v50 = vld [vmem:[#allocation2 + $0x408] sm:$0xf0]  ;;  %v4453_v51 = vld [vmem:[#allocation2 + $0x378] sm:$0xf]  ;;  %v5183_v58 = vld [vmem:[#allocation2 + $0x3a4] sm:$0xf0] }
 0x5ba   : > { %2708 = vmatpush.bf16.msra.mxu0 %v4486_v11  ;;  %2768 = vmatpush.bf16.msra.mxu1 %v4746_v56  ;;  %v4446_v56 = vor.u32 %v5182_v54, %v4445_v53  ;;  %v5232_v53 = vld [vmem:[#allocation2 + $0x52c] sm:$0xf0] }
 0x5bb   : > { %v2036_v2 = vpop.f32.mrf.mxu1 }
 0x5bc   : > { %v5186_v2 = vld [vmem:[#allocation2 + $0x3c4] sm:$0xf] }
 0x5bd   : > { %v4482_v10 = vor.u32 %v5186_v2, %v4479_v4  ;;  %2682 = vmatpush.bf16.msra.mxu2 %v4478_v9  ;;  %v4698_v2 = vor.u32 %v5237_v62, %v4695_v63  ;;  %v5230_v4 = vld [vmem:[#allocation2 + $0x51c] sm:$0xf0]  ;;  %v5231_v9 = vld [vmem:[#allocation2 + $0x524] sm:$0xf0]  ;;  %v4455_v62 = vld [vmem:[#allocation2 + $0x3a8] sm:$0xf0] }
 0x5be   : > { %2709 = vmatpush.bf16.msra.mxu0 %v4438_v25  ;;  %v4638_v6 = vor.u32 %v5230_v4, %v4637_v3  ;;  %v4646_v11 = vor.u32 %v5231_v9, %v4645_v8  ;;  %v5213_v25 = vld [vmem:[#allocation2 + $0x49c] sm:$0xf]  ;;  %v4458_v63 = vor.u32 %v5177_v61, %v4455_v62  ;;  %v5164_v3 = vld [vmem:[#allocation2 + $0x314] sm:$0xf] }
 0x5bf   : > { %2695 = vmatpush.bf16.msrb.mxu3 %v4482_v10  ;;  %v4642_v10 = vor.u32 %v5224_v5, %v4639_v7  ;;  %2769 = vmatpush.bf16.msra.mxu1 %v4698_v2  ;;  %v5170_v2 = vld [vmem:[#allocation2 + $0x33c] sm:$0xf0]  ;;  %v4399_v5 = vld [vmem:[#allocation2 + $0x340] sm:$0xf0]  ;;  %v5171_v7 = vld [vmem:[#allocation2 + $0x344] sm:$0xf0] }
 0x5c0   : > { %v4402_v8 = vor.u32 %v5164_v3, %v4399_v5  ;;  %v4607_v5 = vld [vmem:[#allocation2 + $0x4d0] sm:$0xf0] }
 0x5c1   : > { %2683 = vmatpush.bf16.msra.mxu2 %v4430_v22  ;;  %v5219_v22 = vld [vmem:[#allocation2 + $0x4c4] sm:$0xf0] }
 0x5c2   : > { %2710 = vmatpush.bf16.msra.mxu0 %v4390_v38  ;;  %v4551_v38 = vld [vmem:[#allocation2 + $0x468] sm:$0xf0] }
 0x5c3   : > { %2696 = vmatpush.bf16.msrb.mxu3 %v4434_v24  ;;  %v4598_v24 = vor.u32 %v5219_v22, %v4597_v21  ;;  %2770 = vmatpush.bf16.msra.mxu1 %v4650_v14 }
 0x5c5   : > { %2684 = vmatpush.bf16.msra.mxu2 %v4382_v34  ;;  %v4549_v34 = vld [vmem:[#allocation2 + $0x438] sm:$0xf] }
 0x5c6   : > { %2755 = vmatpush.bf16.msrb.mxu0 %v4742_v52  ;;  %v4506_v52 = vor.u32 %v5189_v49, %v4503_v50  ;;  %v4702_v49 = vor.u32 %v5244_v41, %v4701_v40  ;;  %v5184_v40 = vld [vmem:[#allocation2 + $0x3ac] sm:$0xf0] }
 0x5c9   : > { %2729 = vmatpush.bf16.msrb.mxu2 %v4734_v46  ;;  %v5195_v46 = vld [vmem:[#allocation2 + $0x404] sm:$0xf0] }
 0x5ca   : > { %2756 = vmatpush.bf16.msrb.mxu0 %v4694_v0  ;;  %v4502_v48 = vor.u32 %v5195_v46, %v4501_v45  ;;  %v4397_v0 = vld [vmem:[#allocation2 + $0x310] sm:$0xf]  ;;  %v4709_v45 = vld [vmem:[#allocation2 + $0x568] sm:$0xf]  ;;  %v5245_v46 = vld [vmem:[#allocation2 + $0x594] sm:$0xf0] }
 0x5cb   : > { %v4398_v4 = vor.u32 %v5170_v2, %v4397_v0  ;;  %v4710_v54 = vor.u32 %v5245_v46, %v4709_v45  ;;  %v5220_v0 = vld [vmem:[#allocation2 + $0x4cc] sm:$0xf0]  ;;  %v5185_v45 = vld [vmem:[#allocation2 + $0x3b4] sm:$0xf0]  ;;  %v5179_v46 = vld [vmem:[#allocation2 + $0x38c] sm:$0xf] }
 0x5cd   : > { %2730 = vmatpush.bf16.msrb.mxu2 %v4686_v57  ;;  %v4447_v57 = vld [vmem:[#allocation2 + $0x3a0] sm:$0xf0] }
 0x5ce   : > { %2757 = vmatpush.bf16.msrb.mxu0 %v4646_v11  ;;  %v4450_v59 = vor.u32 %v5176_v55, %v4447_v57  ;;  %v4407_v11 = vld [vmem:[#allocation2 + $0x348] sm:$0xf0]  ;;  %v4655_v57 = vld [vmem:[#allocation2 + $0x530] sm:$0xf0] }
 0x5d1   : > { %2731 = vmatpush.bf16.msrb.mxu2 %v4638_v6  ;;  %v4405_v6 = vld [vmem:[#allocation2 + $0x318] sm:$0xf] }
 0x5d2   : > { %2758 = vmatpush.bf16.msrb.mxu0 %v4598_v24  ;;  %v4406_v9 = vor.u32 %v5171_v7, %v4405_v6  ;;  %v4613_v6 = vld [vmem:[#allocation2 + $0x4a8] sm:$0xf]  ;;  %v5221_v7 = vld [vmem:[#allocation2 + $0x4d4] sm:$0xf0] }
 0x5d5   : > { %2732 = vmatpush.bf16.msrb.mxu2 %v4590_v18 }
 0x62b   : > { %v2042_v23 = vpop.xlane.xlu1 %2041 }
 0x62c   : > { %v2043_v26 = vmul.f32 0.03125, %v2042_v23  ;;  %v4594_v23 = vor.u32 %v5212_v17, %v4591_v20 }
 0x62e   : > { %v2044_v28 = vsub.f32 %v5925_v1, %v2043_v26  ;;  %v4386_v1 = vor.u32 %v5162_v33, %v4383_v35  ;;  %v4599_v26 = vld [vmem:[#allocation2 + $0x4c8] sm:$0xf0]  ;;  %v4543_v33 = vld [vmem:[#allocation2 + $0x460] sm:$0xf0]  ;;  %v5207_v35 = vld [vmem:[#allocation2 + $0x464] sm:$0xf0] }
 0x62f   : > { %v4602_v27 = vor.u32 %v5213_v25, %v4599_v26  ;;  %v4546_v36 = vor.u32 %v5200_v31, %v4543_v33  ;;  %v4550_v37 = vor.u32 %v5207_v35, %v4549_v34  ;;  %v5406_v25 = vld [vmem:[%s6101_s12] ss:$0 sm:$0xff]  ;;  %v5250_v31 = vld [vmem:[#allocation2 + $0x5c4] sm:$0xf]  ;;  %v4757_v33 = vld [vmem:[#allocation2 + $0x5c8] sm:$0xf] }
 0x630   : > { %v5931_v29 = vsel %vm560_vm2, %v2044_v28, 0.0  ;;  %2697 = vmatpush.bf16.msrb.mxu3 %v4386_v1  ;;  %v4541_v28 = vld [vmem:[#allocation2 + $0x430] sm:$0xf]  ;;  %v5201_v1 = vld [vmem:[#allocation2 + $0x43c] sm:$0xf] }
 0x631   : > { %v2046_v30 = vmul.f32 %v5931_v29, %v5931_v29  ;;  %2771 = vmatpush.bf16.msra.mxu1 %v4602_v27  ;;  %v4554_v39 = vor.u32 %v5201_v1, %v4551_v38  ;;  %2759 = vmatpush.bf16.msrb.mxu0 %v4550_v37  ;;  %v5257_v35 = vld [vmem:[#allocation2 + $0x5f4] sm:$0xf0]  ;;  %v4759_v37 = vld [vmem:[#allocation2 + $0x5f8] sm:$0xf0] }
 0x633   : > { %2047 = vadd.xlane.f32.xlu2 %v2046_v30  ;;  %v5206_v30 = vld [vmem:[#allocation2 + $0x45c] sm:$0xf0] }
 0x634   : > { %2742 = vmatpush.bf16.msra.mxu3 %v4738_v47  ;;  %v4542_v32 = vor.u32 %v5206_v30, %v4541_v28  ;;  %v4498_v47 = vor.u32 %v5188_v42, %v4495_v44  ;;  %v4749_v28 = vld [vmem:[#allocation2 + $0x5c0] sm:$0xf]  ;;  %v5256_v30 = vld [vmem:[#allocation2 + $0x5ec] sm:$0xf0]  ;;  %v4703_v44 = vld [vmem:[#allocation2 + $0x590] sm:$0xf0] }
 0x635   : > { %2772 = vmatpush.bf16.msra.mxu1 %v4554_v39  ;;  %2760 = vmatpush.bf16.msrb.mxu0 %v4502_v48  ;;  %v4750_v38 = vor.u32 %v5256_v30, %v4749_v28  ;;  %v4711_v48 = vld [vmem:[#allocation2 + $0x598] sm:$0xf0]  ;;  %v5190_v30 = vld [vmem:[#allocation2 + $0x3e4] sm:$0xf] }
 0x636   : > { %2733 = vmatpush.bf16.msrb.mxu2 %v4542_v32  ;;  %v4751_v32 = vld [vmem:[#allocation2 + $0x5f0] sm:$0xf0] }
 0x637   : > { %v4754_v39 = vor.u32 %v5250_v31, %v4751_v32  ;;  %v4511_v31 = vld [vmem:[#allocation2 + $0x410] sm:$0xf0]  ;;  %v4517_v32 = vld [vmem:[#allocation2 + $0x3e8] sm:$0xf] }
 0x638   : > { %2743 = vmatpush.bf16.msra.mxu3 %v4690_v60  ;;  %v4454_v60 = vor.u32 %v5183_v58, %v4453_v51  ;;  %v4661_v51 = vld [vmem:[#allocation2 + $0x508] sm:$0xf]  ;;  %v5233_v58 = vld [vmem:[#allocation2 + $0x534] sm:$0xf0] }
 0x639   : > { %2773 = vmatpush.bf16.msra.mxu1 %v4506_v52  ;;  %v4653_v52 = vld [vmem:[#allocation2 + $0x500] sm:$0xf]  ;;  %v4662_v2 = vor.u32 %v5233_v58, %v4661_v51  ;;  %v5173_v51 = vld [vmem:[#allocation2 + $0x354] sm:$0xf0]  ;;  %v5167_v58 = vld [vmem:[#allocation2 + $0x32c] sm:$0xf] }
 0x63a   : > { %2734 = vmatpush.bf16.msrb.mxu2 %v4494_v43  ;;  %2761 = vmatpush.bf16.msrb.mxu0 %v4454_v60  ;;  %v5238_v43 = vld [vmem:[#allocation2 + $0x564] sm:$0xf]  ;;  %v4663_v60 = vld [vmem:[#allocation2 + $0x538] sm:$0xf0]  ;;  %v4654_v61 = vor.u32 %v5232_v53, %v4653_v52  ;;  %v5172_v52 = vld [vmem:[#allocation2 + $0x34c] sm:$0xf0] }
 0x63b   : > { %v4706_v50 = vor.u32 %v5238_v43, %v4703_v44  ;;  %v4463_v43 = vld [vmem:[#allocation2 + $0x3b0] sm:$0xf0]  ;;  %v4469_v44 = vld [vmem:[#allocation2 + $0x388] sm:$0xf] }
 0x63c   : > { %2744 = vmatpush.bf16.msra.mxu3 %v4642_v10  ;;  %v5165_v10 = vld [vmem:[#allocation2 + $0x31c] sm:$0xf]  ;;  %v4470_v53 = vor.u32 %v5185_v45, %v4469_v44 }
 0x63d   : > { %2774 = vmatpush.bf16.msra.mxu1 %v4458_v63  ;;  %v4410_v13 = vor.u32 %v5165_v10, %v4407_v11  ;;  %v4605_v63 = vld [vmem:[#allocation2 + $0x4a0] sm:$0xf] }
 0x63e   : > { %2735 = vmatpush.bf16.msrb.mxu2 %v4446_v56  ;;  %2762 = vmatpush.bf16.msrb.mxu0 %v4406_v9  ;;  %v5226_v56 = vld [vmem:[#allocation2 + $0x504] sm:$0xf]  ;;  %v4615_v9 = vld [vmem:[#allocation2 + $0x4d8] sm:$0xf0]  ;;  %v4606_v10 = vor.u32 %v5220_v0, %v4605_v63 }
 0x63f   : > { %v4658_v62 = vor.u32 %v5226_v56, %v4655_v57  ;;  %v4415_v56 = vld [vmem:[#allocation2 + $0x350] sm:$0xf0]  ;;  %v4421_v57 = vld [vmem:[#allocation2 + $0x328] sm:$0xf] }
 0x640   : > { %2745 = vmatpush.bf16.msra.mxu3 %v4594_v23  ;;  %v5405_v23 = vld [vmem:[%s6100_s11] ss:$0 sm:$0xff] }
 0x641   : > { %2775 = vmatpush.bf16.msra.mxu1 %v4410_v13  ;;  %v5208_v13 = vld [vmem:[#allocation2 + $0x46c] sm:$0xf0] }
 0x642   : > { %2736 = vmatpush.bf16.msrb.mxu2 %v4398_v4  ;;  %v5214_v4 = vld [vmem:[#allocation2 + $0x4a4] sm:$0xf] }
 0x643   : > { %v4610_v11 = vor.u32 %v5214_v4, %v4607_v5 }
 0x644   : > { %2746 = vmatpush.bf16.msra.mxu3 %v4546_v36  ;;  %v5251_v36 = vld [vmem:[#allocation2 + $0x5cc] sm:$0xf] }
 0x645   : > { %v4762_v42 = vor.u32 %v5251_v36, %v4759_v37  ;;  %v4519_v36 = vld [vmem:[#allocation2 + $0x418] sm:$0xf0] }
 0x648   : > { %2747 = vmatpush.bf16.msra.mxu3 %v4498_v47  ;;  %v5239_v47 = vld [vmem:[#allocation2 + $0x56c] sm:$0xf] }
 0x649   : > { %v4714_v55 = vor.u32 %v5239_v47, %v4711_v48  ;;  %v4471_v47 = vld [vmem:[#allocation2 + $0x3b8] sm:$0xf0] }
 0x64c   : > { %2748 = vmatpush.bf16.msra.mxu3 %v4450_v59  ;;  %v5227_v59 = vld [vmem:[#allocation2 + $0x50c] sm:$0xf] }
 0x64d   : > { %v4666_v3 = vor.u32 %v5227_v59, %v4663_v60  ;;  %v4423_v59 = vld [vmem:[#allocation2 + $0x358] sm:$0xf0] }
 0x64e   : > { %v4426_v63 = vor.u32 %v5167_v58, %v4423_v59 }
 0x650   : > { %2749 = vmatpush.bf16.msra.mxu3 %v4402_v8  ;;  %v5215_v8 = vld [vmem:[#allocation2 + $0x4ac] sm:$0xf] }
 0x6a6   : > { %v2048_v12 = vpop.xlane.xlu2 %2047 }
 0x6a7   : > { %v2049_v14 = vmul.f32 0.03125, %v2048_v12  ;;  %v4557_v12 = vld [vmem:[#allocation2 + $0x440] sm:$0xf] }
 0x6a9   : > { %v2050_v15 = vadd.f32 1e-05, %v2049_v14  ;;  %v4614_v14 = vor.u32 %v5221_v7, %v4613_v6  ;;  %v2169_v7 = vld [vmem:[#allocation5 + $0xc] sm:$0xff] }
 0x6ab   : > { %5433 = vrsqrt.f32 %v2050_v15  ;;  %vm2057_vm7 = vweird.f32 %v2050_v15 }
 0x6b1   : > { %v5434_v16 = vpop.eup %5433 }
 0x6b2   : > { %v2052_v17 = vmul.f32 %v5434_v16, %v2050_v15  ;;  %vm2058_vm6 = vweird.f32 %v5434_v16  ;;  %v4618_v15 = vor.u32 %v5215_v8, %v4615_v9 }
 0x6b3   : > { %vm2059_vm8 = vmor %vm2057_vm7, %vm2058_vm6 }
 0x6b4   : > { %v2053_v18 = vmul.f32 %v5434_v16, %v2052_v17  ;;  %v4559_v17 = vld [vmem:[#allocation2 + $0x470] sm:$0xf0] }
 0x6b6   : > { %v2054_v20 = vmul.f32 0.5, %v2053_v18  ;;  %v4565_v18 = vld [vmem:[#allocation2 + $0x448] sm:$0xf] }
 0x6b8   : > { %v2055_v21 = vsub.f32 1.5, %v2054_v20  ;;  %v5209_v20 = vld [vmem:[#allocation2 + $0x474] sm:$0xf0] }
 0x6ba   : > { %v2056_v22 = vmul.f32 %v5434_v16, %v2055_v21  ;;  %v5203_v21 = vld [vmem:[#allocation2 + $0x44c] sm:$0xf] }
 0x6bc   : > { %v2060_v24 = vsel %vm2059_vm8, %v5434_v16, %v2056_v22  ;;  %v5202_v16 = vld [vmem:[#allocation2 + $0x444] sm:$0xf]  ;;  %v4567_v22 = vld [vmem:[#allocation2 + $0x478] sm:$0xf0] }
 0x6bd   : > { %v2061_v26 = vmul.f32 %v2060_v24, %v5931_v29  ;;  %v4758_v29 = vor.u32 %v5257_v35, %v4757_v33  ;;  %v4562_v24 = vor.u32 %v5202_v16, %v4559_v17  ;;  %v4570_v28 = vor.u32 %v5203_v21, %v4567_v22  ;;  %v5197_v33 = vld [vmem:[#allocation2 + $0x414] sm:$0xf0]  ;;  %v5191_v35 = vld [vmem:[#allocation2 + $0x3ec] sm:$0xf] }
 0x6be   : > { %v4518_v41 = vor.u32 %v5197_v33, %v4517_v32  ;;  %v2175_v16 = vperm.slane %v2169_v7, 2  ;;  %v2176_v17 = vperm.slane %v2169_v7, 3 }
 0x6bf   : > { %v2065_v27 = vmul.f32 %v5405_v23, %v2061_v26  ;;  %v4558_v23 = vor.u32 %v5208_v13, %v4557_v12  ;;  %v5196_v26 = vld [vmem:[#allocation2 + $0x40c] sm:$0xf0] }
 0x6c1   : > { %v5942_v34 = vadd.f32 %v5406_v25, %v2065_v27  ;;  %v4509_v25 = vld [vmem:[#allocation2 + $0x3e0] sm:$0xf]  ;;  %v4566_v27 = vor.u32 %v5209_v20, %v4565_v18  ;;  %v2177_v18 = vperm.slane %v2169_v7, 4  ;;  %v2178_v20 = vperm.slane %v2169_v7, 5 }
 0x6c2   : > { %v4510_v37 = vor.u32 %v5196_v26, %v4509_v25 }
 0x6c3   : > { %v5946_v1 = vpack.c.bf16 %v5942_v34, %v5942_v34 }
 0x6c5   : > { %2685 = vmatmul.bf16.vlgmr.msra.gmra.mxu2 %v5946_v1  ;;  %2698 = vmatmul.bf16.vlgmr.msrb.gmra.mxu3 %v5946_v1 }
 0x6c6   : > { %2711 = vmatmul.bf16.vlgmr.msra.gmra.mxu0 %v5946_v1  ;;  %2724 = vmatmul.bf16.vlgmr.msrb.gmra.mxu1 %v5946_v1 }
 0x6c7   : > { %2781 = vmatpush.bf16.msra.mxu2 %v4750_v38  ;;  %2794 = vmatpush.bf16.msrb.mxu3 %v4754_v39  ;;  %v4514_v38 = vor.u32 %v5190_v30, %v4511_v31  ;;  %v4461_v39 = vld [vmem:[#allocation2 + $0x380] sm:$0xf] }
 0x6c8   : > { %2807 = vmatpush.bf16.msra.mxu0 %v4758_v29  ;;  %2820 = vmatpush.bf16.msrb.mxu1 %v4762_v42  ;;  %v4522_v29 = vor.u32 %v5191_v35, %v4519_v36  ;;  %v5178_v42 = vld [vmem:[#allocation2 + $0x384] sm:$0xf]  ;;  %v4462_v48 = vor.u32 %v5184_v40, %v4461_v39 }
 0x6cb   : > { %2782 = vmatpush.bf16.msra.mxu2 %v4702_v49  ;;  %2795 = vmatpush.bf16.msrb.mxu3 %v4706_v50  ;;  %v4466_v49 = vor.u32 %v5178_v42, %v4463_v43  ;;  %v4413_v50 = vld [vmem:[#allocation2 + $0x320] sm:$0xf] }
 0x6cc   : > { %2808 = vmatpush.bf16.msra.mxu0 %v4710_v54  ;;  %2821 = vmatpush.bf16.msrb.mxu1 %v4714_v55  ;;  %v4474_v54 = vor.u32 %v5179_v46, %v4471_v47  ;;  %v5166_v55 = vld [vmem:[#allocation2 + $0x324] sm:$0xf]  ;;  %v4414_v60 = vor.u32 %v5172_v52, %v4413_v50 }
 0x6cf   : > { %2783 = vmatpush.bf16.msra.mxu2 %v4654_v61  ;;  %2796 = vmatpush.bf16.msrb.mxu3 %v4658_v62  ;;  %v4418_v61 = vor.u32 %v5166_v55, %v4415_v56  ;;  %v4422_v62 = vor.u32 %v5173_v51, %v4421_v57 }
 0x6d0   : > { %2809 = vmatpush.bf16.msra.mxu0 %v4662_v2  ;;  %2822 = vmatpush.bf16.msrb.mxu1 %v4666_v3 }
 0x6d3   : > { %2784 = vmatpush.bf16.msra.mxu2 %v4606_v10  ;;  %2797 = vmatpush.bf16.msrb.mxu3 %v4610_v11  ;;  %v2179_v10 = vperm.slane %v2169_v7, 6  ;;  %v2180_v11 = vperm.slane %v2169_v7, 7 }
 0x6d4   : > { %2810 = vmatpush.bf16.msra.mxu0 %v4614_v14  ;;  %2823 = vmatpush.bf16.msrb.mxu1 %v4618_v15 }
 0x6d5   : > { %2737 = vmatmul.bf16.vlgmr.msrb.gmra.mxu2 %v5946_v1  ;;  %2750 = vmatmul.bf16.vlgmr.msra.gmra.mxu3 %v5946_v1 }
 0x6d6   : > { %2763 = vmatmul.bf16.vlgmr.msrb.gmra.mxu0 %v5946_v1  ;;  %2776 = vmatmul.bf16.vlgmr.msra.gmra.mxu1 %v5946_v1 }
 0x6d7   : > { %2785 = vmatpush.bf16.msra.mxu2 %v4558_v23  ;;  %2798 = vmatpush.bf16.msrb.mxu3 %v4562_v24 }
 0x6d8   : > { %2811 = vmatpush.bf16.msra.mxu0 %v4566_v27  ;;  %2824 = vmatpush.bf16.msrb.mxu1 %v4570_v28  ;;  %v2173_v27 = vperm.slane %v2169_v7, 0  ;;  %v2174_v28 = vperm.slane %v2169_v7, 1 }
 0x6db   : > { %2786 = vmatpush.bf16.msra.mxu2 %v4510_v37  ;;  %2799 = vmatpush.bf16.msrb.mxu3 %v4514_v38  ;;  %v2170_v38 = vld [vmem:[#allocation5 + $0x14] sm:$0xf] }
 0x6dc   : > { %2812 = vmatpush.bf16.msra.mxu0 %v4518_v41  ;;  %2825 = vmatpush.bf16.msrb.mxu1 %v4522_v29  ;;  %v2183_v41 = vperm.slane %v2170_v38, 2  ;;  %v2184_v29 = vperm.slane %v2170_v38, 3 }
 0x6df   : > { %2787 = vmatpush.bf16.msra.mxu2 %v4462_v48  ;;  %2800 = vmatpush.bf16.msrb.mxu3 %v4466_v49  ;;  %v2181_v48 = vperm.slane %v2170_v38, 0  ;;  %v2182_v49 = vperm.slane %v2170_v38, 1 }
 0x6e0   : > { %2813 = vmatpush.bf16.msra.mxu0 %v4470_v53  ;;  %2826 = vmatpush.bf16.msrb.mxu1 %v4474_v54 }
 0x6e3   : > { %2788 = vmatpush.bf16.msra.mxu2 %v4414_v60  ;;  %2801 = vmatpush.bf16.msrb.mxu3 %v4418_v61 }
 0x6e4   : > { %2814 = vmatpush.bf16.msra.mxu0 %v4422_v62  ;;  %2827 = vmatpush.bf16.msrb.mxu1 %v4426_v63 }
 0x6e6   : > { %2789 = vmatmul.bf16.vlgmr.msra.gmra.mxu2 %v5946_v1  ;;  %2802 = vmatmul.bf16.vlgmr.msrb.gmra.mxu3 %v5946_v1 }
 0x6e7   : > { %2815 = vmatmul.bf16.vlgmr.msra.gmra.mxu0 %v5946_v1  ;;  %2828 = vmatmul.bf16.vlgmr.msrb.gmra.mxu1 %v5946_v1 }
 0x743   : > { %v2712_v0 = vpop.f32.mrf.mxu0  ;;  %v2725_v2 = vpop.f32.mrf.mxu1 }
 0x744   : > { %v2713_v23 = vadd.f32 %v2712_v0, %v2175_v16  ;;  %v2726_v24 = vadd.f32 %v2725_v2, %v2176_v17 }
 0x746   : > { %v2834_v33 = vpack.c.bf16 %v2726_v24, %v2713_v23 }
 0x748   : > { %v2686_v3 = vpop.f32.mrf.mxu2  ;;  %v2699_v4 = vpop.f32.mrf.mxu3  ;;  %v2980_v2 = vrot.slane %v2834_v33, 4 }
 0x749   : > { %v2687_v36 = vadd.f32 %v2686_v3, %v2173_v27  ;;  %v2700_v37 = vadd.f32 %v2699_v4, %v2174_v28 }
 0x74b   : > { %v2714_v5 = vpop.f32.mrf.mxu0  ;;  %v2727_v6 = vpop.f32.mrf.mxu1  ;;  %v2833_v42 = vpack.c.bf16 %v2700_v37, %v2687_v36 }
 0x74d   : > { %v2884_v0 = vrot.slane %v2833_v42, 4 }
 0x750   : > { %v2688_v8 = vpop.f32.mrf.mxu2  ;;  %v2701_v9 = vpop.f32.mrf.mxu3 }
 0x753   : > { %v2764_v12 = vpop.f32.mrf.mxu0  ;;  %v2777_v13 = vpop.f32.mrf.mxu1 }
 0x754   : > { %v2765_v14 = vadd.f32 %v2764_v12, %v2179_v10  ;;  %v2778_v15 = vadd.f32 %v2777_v13, %v2180_v11 }
 0x756   : > { %v2836_v1 = vpack.c.bf16 %v2778_v15, %v2765_v14 }
 0x758   : > { %2942 = vmatpush.bf16.xpose.msrb.mxu0 %v2836_v1  ;;  %v2738_v21 = vpop.f32.mrf.mxu2  ;;  %v2751_v22 = vpop.f32.mrf.mxu3  ;;  %v2983_v43 = vrot.slane %v2836_v1, 4 }
 0x759   : > { %v2739_v25 = vadd.f32 %v2738_v21, %v2177_v18  ;;  %v2752_v26 = vadd.f32 %v2751_v22, %v2178_v20 }
 0x75b   : > { %v2835_v30 = vpack.c.bf16 %v2752_v26, %v2739_v25  ;;  %v2766_v31 = vpop.f32.mrf.mxu0  ;;  %v2779_v32 = vpop.f32.mrf.mxu1 }
 0x75d   : > { %v2887_v35 = vrot.slane %v2835_v30, 4  ;;  %2846 = vmatpush.bf16.xpose.msrb.mxu2 %v2835_v30 }
 0x75f   : > { %2943 = vmatmul.bf16.vlgmr.msrb.gmra.mxu0 %v2834_v33 }
 0x760   : > { %v2740_v39 = vpop.f32.mrf.mxu2  ;;  %v2753_v40 = vpop.f32.mrf.mxu3 }
 0x764   : > { %v2816_v44 = vpop.f32.mrf.mxu0  ;;  %v2829_v45 = vpop.f32.mrf.mxu1  ;;  %2847 = vmatmul.bf16.vlgmr.msrb.gmra.mxu2 %v2833_v42 }
 0x765   : > { %2898 = vmatpush.bf16.xpose.msra.mxu2 %v2887_v35  ;;  %v2817_v46 = vadd.f32 %v2816_v44, %v2183_v41  ;;  %v2830_v47 = vadd.f32 %v2829_v45, %v2184_v29  ;;  %v5281_v44 = vld [vmem:[#allocation7 + $0x1b8] sm:$0xff]  ;;  %v5264_v45 = vld [vmem:[#allocation7 + $0x130] sm:$0xff] }
 0x767   : > { %v5960_v50 = vpack.c.bf16 %v2830_v47, %v2817_v46  ;;  %v5280_v46 = vld [vmem:[#allocation7 + $0x1b0] sm:$0xff] }
 0x769   : > { %v2790_v52 = vpop.f32.mrf.mxu2  ;;  %v2803_v53 = vpop.f32.mrf.mxu3  ;;  %v2964_v54 = vsel %vm1358_vm0, %v5960_v50, 0  ;;  %v2986_v39 = vrot.slane %v5960_v50, 4  ;;  %v5272_v50 = vld [vmem:[#allocation7 + $0x170] sm:$0xff] }
 0x76a   : > { %v2791_v55 = vadd.f32 %v2790_v52, %v2181_v48  ;;  %v2804_v56 = vadd.f32 %v2803_v53, %v2182_v49  ;;  %2973 = vmatpush.bf16.msra.mxu1 %v2964_v54  ;;  %v5273_v48 = vld [vmem:[#allocation7 + $0x178] sm:$0xff]  ;;  %v5263_v54 = vld [vmem:[#allocation7 + $0x128] sm:$0xff] }
 0x76b   : > { %v3016_v42 = vsel %vm1358_vm0, %v2986_v39, 0 }
 0x76c   : > { %v2837_v57 = vpack.c.bf16 %v2804_v56, %v2791_v55  ;;  %v2818_v51 = vpop.f32.mrf.mxu0  ;;  %v2831_v58 = vpop.f32.mrf.mxu1  ;;  %v5279_v55 = vld [vmem:[#allocation7 + $0x1a8] sm:$0xff] }
 0x76d   : > { %2994 = vmatpush.bf16.xpose.msrb.mxu2 %v2983_v43  ;;  %v5265_v43 = vld [vmem:[#allocation7 + $0x138] sm:$0xff]  ;;  %v5271_v56 = vld [vmem:[#allocation7 + $0x168] sm:$0xff]  ;;  %v5278_v51 = vld [vmem:[#allocation7 + $0x1a0] sm:$0xff] }
 0x76e   : > { %v2890_v59 = vrot.slane %v2837_v57, 4  ;;  %v2868_v60 = vsel %vm1358_vm0, %v2837_v57, 0  ;;  %3297 = vmatpush.bf16.msra.mxu0 %v5265_v43  ;;  %3310 = vmatpush.bf16.msrb.mxu1 %v5273_v48  ;;  %v5262_v57 = vld [vmem:[#allocation7 + $0x120] sm:$0xff] }
 0x76f   : > { %2877 = vmatpush.bf16.msra.mxu3 %v2868_v60 }
 0x770   : > { %v2920_v61 = vsel %vm1358_vm0, %v2890_v59, 0 }
 0x771   : > { %v2792_v62 = vpop.f32.mrf.mxu2  ;;  %v2805_v63 = vpop.f32.mrf.mxu3 }
 0x772   : > { %3298 = vmatpush.bf16.msra.mxu0 %v5264_v45  ;;  %3311 = vmatpush.bf16.msrb.mxu1 %v5272_v50  ;;  %v5277_v62 = vld [vmem:[#allocation7 + $0x198] sm:$0xff]  ;;  %v5260_v63 = vld [vmem:[#allocation7 + $0x110] sm:$0xff] }
 0x773   : > { %2929 = vmatpush.bf16.msrb.mxu3 %v2920_v61  ;;  %v5261_v61 = vld [vmem:[#allocation7 + $0x118] sm:$0xff] }
 0x774   : > { %2899 = vmatmul.bf16.vlgmr.msra.gmra.mxu2 %v2884_v0  ;;  %v5276_v0 = vld [vmem:[#allocation7 + $0x190] sm:$0xff] }
 0x775   : > { %3323 = vmatpush.bf16.msra.mxu2 %v5281_v44 }
 0x776   : > { %3299 = vmatpush.bf16.msra.mxu0 %v5263_v54  ;;  %3312 = vmatpush.bf16.msrb.mxu1 %v5271_v56 }
 0x779   : > { %3324 = vmatpush.bf16.msra.mxu2 %v5280_v46 }
 0x77a   : > { %3300 = vmatpush.bf16.msra.mxu0 %v5262_v57  ;;  %v5296_v57 = vld [vmem:[%s6096_s7 + $0x70] sm:$0xff] }
 0x77d   : > { %3325 = vmatpush.bf16.msra.mxu2 %v5279_v55 }
 0x77e   : > { %3301 = vmatpush.bf16.msra.mxu0 %v5261_v61  ;;  %v5290_v61 = vld [vmem:[%s6096_s7 + $0x40] sm:$0xff] }
 0x781   : > { %3326 = vmatpush.bf16.msra.mxu2 %v5278_v51  ;;  %v5294_v51 = vld [vmem:[%s6096_s7 + $0x60] sm:$0xff] }
 0x782   : > { %3302 = vmatpush.bf16.msra.mxu0 %v5260_v63 }
 0x784   : > { %2995 = vmatmul.bf16.vlgmr.msrb.gmra.mxu2 %v2980_v2 }
 0x785   : > { %3327 = vmatpush.bf16.msra.mxu2 %v5277_v62  ;;  %v5305_v62 = vld [vmem:[#allocation8 + $0x78] sm:$0xff] }
 0x789   : > { %3328 = vmatpush.bf16.msra.mxu2 %v5276_v0 }
 0x7dc   : > { %v2944_v3 = vpop.f32.mrf.mxu0 }
 0x7dd   : > { %v2948_v8 = vsel %vm1342_vm1, %v2944_v3, -inf }
 0x7e4   : > { %v2946_v4 = vpop.f32.mrf.mxu0 }
 0x7e5   : > { %v5275_v4 = vld [vmem:[#allocation7 + $0x188] sm:$0xff] }
 0x7e6   : > { %3329 = vmatpush.bf16.msra.mxu2 %v5275_v4  ;;  %v5303_v4 = vld [vmem:[#allocation8 + $0x68] sm:$0xff] }
 0x7e7   : > { %v2848_v5 = vpop.f32.mrf.mxu2 }
 0x7e8   : > { %v2852_v6 = vsel %vm1342_vm1, %v2848_v5, -inf }
 0x7e9   : > { %2853 = vmax.xlane.f32.xlu0 %v2852_v6 }
 0x7ef   : > { %v2850_v7 = vpop.f32.mrf.mxu2 }
 0x7f1   : > { %2949 = vmax.xlane.f32.xlu0 %v2948_v8  ;;  %v5258_v8 = vld [vmem:[#allocation7 + $0x100] sm:$0xff] }
 0x7f7   : > { %v2900_v9 = vpop.f32.mrf.mxu2 }
 0x7f8   : > { %v2904_v10 = vsel %vm1342_vm1, %v2900_v9, -inf }
 0x7f9   : > { %2905 = vmax.xlane.f32.xlu1 %v2904_v10  ;;  %v5274_v10 = vld [vmem:[#allocation7 + $0x180] sm:$0xff] }
 0x7fa   : > { %3330 = vmatpush.bf16.msra.mxu2 %v5274_v10 }
 0x7ff   : > { %v2902_v11 = vpop.f32.mrf.mxu2 }
 0x800   : > { %v5269_v11 = vld [vmem:[#allocation7 + $0x158] sm:$0xff] }
 0x807   : > { %v2996_v12 = vpop.f32.mrf.mxu2 }
 0x808   : > { %v3000_v13 = vsel %vm1342_vm1, %v2996_v12, -inf }
 0x809   : > { %3001 = vmax.xlane.f32.xlu2 %v3000_v13  ;;  %v5268_v13 = vld [vmem:[#allocation7 + $0x150] sm:$0xff] }
 0x80f   : > { %v2998_v14 = vpop.f32.mrf.mxu2 }
 0x810   : > { %v5288_v14 = vld [vmem:[#allocation7 + $0x1f0] sm:$0xff] }
 0x85c   : > { %v2854_v15 = vpop.xlane.xlu0 %2853 }
 0x85d   : > { %v2855_v16 = vsub.f32 %v2848_v5, %v2854_v15  ;;  %v5267_v15 = vld [vmem:[#allocation7 + $0x148] sm:$0xff] }
 0x85f   : > { %v2856_v17 = vmul.f32 1.442695, %v2855_v16  ;;  %v5287_v16 = vld [vmem:[#allocation7 + $0x1e8] sm:$0xff] }
 0x861   : > { %5435 = vpow2.f32 %v2856_v17  ;;  %v5266_v17 = vld [vmem:[#allocation7 + $0x140] sm:$0xff] }
 0x864   : > { %v2950_v18 = vpop.xlane.xlu0 %2949 }
 0x865   : > { %v2951_v20 = vsub.f32 %v2944_v3, %v2950_v18  ;;  %v5259_v3 = vld [vmem:[#allocation7 + $0x108] sm:$0xff]  ;;  %v5286_v18 = vld [vmem:[#allocation7 + $0x1e0] sm:$0xff] }
 0x866   : > { %3303 = vmatpush.bf16.msra.mxu0 %v5259_v3 }
 0x867   : > { %v5436_v1 = vpop.eup %5435  ;;  %v2952_v21 = vmul.f32 1.442695, %v2951_v20  ;;  %v5285_v20 = vld [vmem:[#allocation7 + $0x1d8] sm:$0xff] }
 0x868   : > { %v2858_v22 = vsel %vm1342_vm1, %v5436_v1, 0.0 }
 0x869   : > { %5437 = vpow2.f32 %v2952_v21  ;;  %2859 = vadd.xlane.f32.xlu1 %v2858_v22  ;;  %v5283_v21 = vld [vmem:[#allocation7 + $0x1c8] sm:$0xff] }
 0x86a   : > { %3304 = vmatpush.bf16.msra.mxu0 %v5258_v8  ;;  %v5301_v8 = vld [vmem:[#allocation8 + $0x58] sm:$0xff] }
 0x86c   : > { %v2906_v23 = vpop.xlane.xlu1 %2905 }
 0x86d   : > { %v2907_v24 = vsub.f32 %v2900_v9, %v2906_v23  ;;  %v5270_v9 = vld [vmem:[#allocation7 + $0x160] sm:$0xff] }
 0x86e   : > { %3313 = vmatpush.bf16.msrb.mxu1 %v5270_v9  ;;  %v5282_v23 = vld [vmem:[#allocation7 + $0x1c0] sm:$0xff] }
 0x86f   : > { %v5438_v25 = vpop.eup %5437  ;;  %v2908_v26 = vmul.f32 1.442695, %v2907_v24 }
 0x870   : > { %v2954_v27 = vsel %vm1342_vm1, %v5438_v25, 0.0 }
 0x871   : > { %5439 = vpow2.f32 %v2908_v26  ;;  %2955 = vadd.xlane.f32.xlu1 %v2954_v27 }
 0x872   : > { %3314 = vmatpush.bf16.msrb.mxu1 %v5269_v11  ;;  %v5300_v11 = vld [vmem:[#allocation8 + $0x50] sm:$0xff] }
 0x876   : > { %3315 = vmatpush.bf16.msrb.mxu1 %v5268_v13 }
 0x877   : > { %v5440_v28 = vpop.eup %5439 }
 0x878   : > { %v2910_v30 = vsel %vm1342_vm1, %v5440_v28, 0.0 }
 0x879   : > { %2911 = vadd.xlane.f32.xlu2 %v2910_v30 }
 0x87a   : > { %3316 = vmatpush.bf16.msrb.mxu1 %v5267_v15 }
 0x87c   : > { %v3002_v31 = vpop.xlane.xlu2 %3001 }
 0x87d   : > { %v3003_v32 = vsub.f32 %v2996_v12, %v3002_v31  ;;  %v5289_v12 = vld [vmem:[#allocation7 + $0x1f8] sm:$0xff] }
 0x87e   : > { %3317 = vmatpush.bf16.msrb.mxu1 %v5266_v17  ;;  %v5409_v17 = vld [vmem:[%s6095_s6 + $0x1] ss:$0 sm:$0xff] }
 0x87f   : > { %v3004_v33 = vmul.f32 1.442695, %v3003_v32 }
 0x881   : > { %5441 = vpow2.f32 %v3004_v33 }
 0x887   : > { %v5442_v35 = vpop.eup %5441 }
 0x888   : > { %v3006_v36 = vsel %vm1342_vm1, %v5442_v35, 0.0 }
 0x889   : > { %3007 = vadd.xlane.f32.xlu0 %v3006_v36 }
 0x8dc   : > { %v2860_v37 = vpop.xlane.xlu1 %2859 }
 0x8dd   : > { %5443 = vrcp.f32 %v2860_v37 }
 0x8e3   : > { %v5444_v38 = vpop.eup %5443 }
 0x8e4   : > { %v2862_v40 = vmul.f32 %v5444_v38, %v5436_v1  ;;  %v2956_v41 = vpop.xlane.xlu1 %2955  ;;  %v5284_v1 = vld [vmem:[#allocation7 + $0x1d0] sm:$0xff] }
 0x8e5   : > { %5445 = vrcp.f32 %v2956_v41 }
 0x8e6   : > { %v2863_v29 = vpack.c.bf16 %v2862_v40, %v2862_v40 }
 0x8e8   : > { %4763 = vmatmul.msk.bf16.vlgmr.msra.gmra.mxu3 %vm1342_vm1, %v2863_v29 }
 0x8e9   : > { %3025 = vmatpush.bf16.msra.mxu3 %v3016_v42  ;;  %v5407_v42 = vld [vmem:[%s6093_s4 + $0x1] ss:$0 sm:$0xff] }
 0x8eb   : > { %v5446_v47 = vpop.eup %5445 }
 0x8ec   : > { %v2958_v49 = vmul.f32 %v5446_v47, %v5438_v25  ;;  %v2912_v52 = vpop.xlane.xlu2 %2911 }
 0x8ed   : > { %5447 = vrcp.f32 %v2912_v52  ;;  %v5297_v52 = vld [vmem:[%s6096_s7 + $0x78] sm:$0xff] }
 0x8ee   : > { %v2959_v53 = vpack.c.bf16 %v2958_v49, %v2958_v49  ;;  %3454 = vmatpush.bf16.msrb.mxu0 %v5297_v52 }
 0x8f0   : > { %4765 = vmatmul.msk.bf16.vlgmr.msra.gmra.mxu1 %vm1342_vm1, %v2959_v53 }
 0x8f1   : > { %3539 = vmatpush.bf16.msra.mxu1 %v5305_v62  ;;  %v5414_v62 = vld [vmem:[%s6136_s15] ss:$0 sm:$0xff] }
 0x8f2   : > { %3455 = vmatpush.bf16.msrb.mxu0 %v5296_v57  ;;  %v5412_v57 = vld [vmem:[%s6100_s11 + $0x1] ss:$0 sm:$0xff] }
 0x8f3   : > { %v5448_v58 = vpop.eup %5447 }
 0x8f4   : > { %v2914_v59 = vmul.f32 %v5448_v58, %v5440_v28  ;;  %v5293_v58 = vld [vmem:[%s6096_s7 + $0x58] sm:$0xff] }
 0x8f6   : > { %v2915_v60 = vpack.c.bf16 %v2914_v59, %v2914_v59  ;;  %v5292_v59 = vld [vmem:[%s6096_s7 + $0x50] sm:$0xff] }
 0x8f8   : > { %4764 = vmatmul.msk.bf16.vlgmr.msrb.gmra.mxu3 %vm1342_vm1, %v2915_v60  ;;  %v5291_v60 = vld [vmem:[%s6096_s7 + $0x48] sm:$0xff] }
 0x8f9   : > { %3336 = vmatpush.bf16.msrb.mxu3 %v5289_v12 }
 0x8fc   : > { %v3008_v2 = vpop.xlane.xlu0 %3007 }
 0x8fd   : > { %5449 = vrcp.f32 %v3008_v2  ;;  %3337 = vmatpush.bf16.msrb.mxu3 %v5288_v14  ;;  %v5304_v2 = vld [vmem:[#allocation8 + $0x70] sm:$0xff]  ;;  %v5408_v14 = vld [vmem:[%s6094_s5 + $0x1] ss:$0 sm:$0xff] }
 0x8fe   : > { %3540 = vmatpush.bf16.msra.mxu1 %v5304_v2 }
 0x901   : > { %3338 = vmatpush.bf16.msrb.mxu3 %v5287_v16 }
 0x902   : > { %3541 = vmatpush.bf16.msra.mxu1 %v5303_v4 }
 0x903   : > { %v5450_v5 = vpop.eup %5449 }
 0x904   : > { %v3010_v6 = vmul.f32 %v5450_v5, %v5442_v35  ;;  %v5302_v5 = vld [vmem:[#allocation8 + $0x60] sm:$0xff] }
 0x905   : > { %3339 = vmatpush.bf16.msrb.mxu3 %v5286_v18 }
 0x906   : > { %v3011_v7 = vpack.c.bf16 %v3010_v6, %v3010_v6  ;;  %3542 = vmatpush.bf16.msra.mxu1 %v5302_v5 }
 0x908   : > { %4766 = vmatmul.msk.bf16.vlgmr.msra.gmra.mxu3 %vm1342_vm1, %v3011_v7 }
 0x909   : > { %3340 = vmatpush.bf16.msrb.mxu3 %v5285_v20 }
 0x90a   : > { %3543 = vmatpush.bf16.msra.mxu1 %v5301_v8 }
 0x90d   : > { %3341 = vmatpush.bf16.msrb.mxu3 %v5284_v1 }
 0x90e   : > { %3544 = vmatpush.bf16.msra.mxu1 %v5300_v11 }
 0x911   : > { %3342 = vmatpush.bf16.msrb.mxu3 %v5283_v21  ;;  %v5299_v21 = vld [vmem:[#allocation8 + $0x48] sm:$0xff] }
 0x912   : > { %3545 = vmatpush.bf16.msra.mxu1 %v5299_v21 }
 0x915   : > { %3343 = vmatpush.bf16.msrb.mxu3 %v5282_v23  ;;  %v5410_v23 = vld [vmem:[%s6097_s8 + $0x1] ss:$0 sm:$0xff] }
 0x96b   : > { %v2879_v22 = vpop.f32.mrf.mxu3 }
 0x96c   : > { %v3031_v24 = vpack.c.bf16 %v2879_v22, %v2879_v22  ;;  %v5298_v22 = vld [vmem:[#allocation8 + $0x40] sm:$0xff] }
 0x96d   : > { %v2975_v25 = vpop.f32.mrf.mxu1  ;;  %3546 = vmatpush.bf16.msra.mxu1 %v5298_v22 }
 0x96e   : > { %v3033_v26 = vpack.c.bf16 %v2975_v25, %v2975_v25  ;;  %3305 = vmatmul.bf16.vlgmr.msra.gmra.mxu0 %v3031_v24 }
 0x970   : > { %3331 = vmatmul.bf16.vlgmr.msra.gmra.mxu2 %v3033_v26 }
 0x973   : > { %v2881_v27 = vpop.f32.mrf.mxu3 }
 0x975   : > { %v2977_v28 = vpop.f32.mrf.mxu1 }
 0x97b   : > { %v2931_v30 = vpop.f32.mrf.mxu3 }
 0x97c   : > { %v3032_v31 = vpack.c.bf16 %v2931_v30, %v2931_v30  ;;  %v5411_v30 = vld [vmem:[%s6099_s10 + $0x1] ss:$0 sm:$0xff] }
 0x97e   : > { %3318 = vmatmul.bf16.vlgmr.msrb.gmra.mxu1 %v3032_v31 }
 0x983   : > { %v2933_v32 = vpop.f32.mrf.mxu3 }
 0x98b   : > { %v3027_v33 = vpop.f32.mrf.mxu3 }
 0x98c   : > { %v3034_v35 = vpack.c.bf16 %v3027_v33, %v3027_v33 }
 0x98e   : > { %3344 = vmatmul.bf16.vlgmr.msrb.gmra.mxu3 %v3034_v35 }
 0x993   : > { %v3029_v36 = vpop.f32.mrf.mxu3 }
 0x994   : > { %v5313_v36 = vld [vmem:[%s6102_s13 + $0x38] sm:$0xff] }
 0x995   : > { %3655 = vmatpush.bf16.msrb.mxu2 %v5313_v36 }
 0x9eb   : > { %v3306_v37 = vpop.f32.mrf.mxu0 }
 0x9ec   : > { %v3307_v43 = vadd.f32 %v5407_v42, %v3306_v37  ;;  %v5311_v42 = vld [vmem:[%s6102_s13 + $0x28] sm:$0xff] }
 0x9f3   : > { %v3308_v38 = vpop.f32.mrf.mxu0  ;;  %v3332_v39 = vpop.f32.mrf.mxu2 }
 0x9fb   : > { %v3319_v40 = vpop.f32.mrf.mxu1  ;;  %v3334_v41 = vpop.f32.mrf.mxu2 }
 0x9fc   : > { %v3320_v44 = vadd.f32 %v3319_v40, %v3307_v43  ;;  %v5310_v43 = vld [vmem:[%s6102_s13 + $0x20] sm:$0xff] }
 0x9fe   : > { %v3333_v45 = vadd.f32 %v3332_v39, %v3320_v44  ;;  %v5308_v44 = vld [vmem:[%s6102_s13 + $0x10] sm:$0xff] }
 0xa03   : > { %v3321_v29 = vpop.f32.mrf.mxu1 }
 0xa04   : > { %v5312_v29 = vld [vmem:[%s6102_s13 + $0x30] sm:$0xff] }
 0xa05   : > { %3656 = vmatpush.bf16.msrb.mxu2 %v5312_v29 }
 0xa09   : > { %3657 = vmatpush.bf16.msrb.mxu2 %v5311_v42 }
 0xa0d   : > { %3658 = vmatpush.bf16.msrb.mxu2 %v5310_v43 }
 0xa11   : > { %v3345_v46 = vpop.f32.mrf.mxu3  ;;  %3659 = vmatpush.bf16.msrb.mxu2 %v5309_v19 }
 0xa12   : > { %v3346_v47 = vadd.f32 %v3345_v46, %v3333_v45  ;;  %v5307_v45 = vld [vmem:[%s6102_s13 + $0x8] sm:$0xff]  ;;  %v5306_v46 = vld [vmem:[%s6102_s13] sm:$0xff] }
 0xa14   : > { %v3349_v48 = vadd.f32 %v3346_v47, %v5942_v34  ;;  %v5295_v34 = vld [vmem:[%s6096_s7 + $0x68] sm:$0xff] }
 0xa15   : > { %3456 = vmatpush.bf16.msrb.mxu0 %v5295_v34  ;;  %3660 = vmatpush.bf16.msrb.mxu2 %v5308_v44 }
 0xa16   : > { %3354 = vadd.xlane.f32.xlu2 %v3349_v48 }
 0xa19   : > { %v3347_v49 = vpop.f32.mrf.mxu3  ;;  %3457 = vmatpush.bf16.msrb.mxu0 %v5294_v51  ;;  %3661 = vmatpush.bf16.msrb.mxu2 %v5307_v45 }
 0xa1d   : > { %3458 = vmatpush.bf16.msrb.mxu0 %v5293_v58  ;;  %3662 = vmatpush.bf16.msrb.mxu2 %v5306_v46  ;;  %v5413_v58 = vld [vmem:[%s6101_s12 + $0x1] ss:$0 sm:$0xff] }
 0xa21   : > { %3459 = vmatpush.bf16.msrb.mxu0 %v5292_v59 }
 0xa25   : > { %3460 = vmatpush.bf16.msrb.mxu0 %v5291_v60 }
 0xa29   : > { %3461 = vmatpush.bf16.msrb.mxu0 %v5290_v61 }
 0xa89   : > { %v3355_v50 = vpop.xlane.xlu2 %3354 }
 0xa8a   : > { %v3356_v53 = vmul.f32 0.03125, %v3355_v50 }
 0xa8c   : > { %v3357_v54 = vsub.f32 %v3349_v48, %v3356_v53 }
 0xa8e   : > { %v3358_v55 = vsel %vm560_vm2, %v3357_v54, 0.0 }
 0xa8f   : > { %v3359_v56 = vmul.f32 %v3358_v55, %v3358_v55 }
 0xa91   : > { %3360 = vadd.xlane.f32.xlu0 %v3359_v56 }
 0xb04   : > { %v3361_v63 = vpop.xlane.xlu0 %3360 }
 0xb05   : > { %v3362_v0 = vmul.f32 0.03125, %v3361_v63 }
 0xb07   : > { %v3363_v3 = vadd.f32 1e-05, %v3362_v0 }
 0xb09   : > { %5451 = vrsqrt.f32 %v3363_v3  ;;  %vm3370_vm10 = vweird.f32 %v3363_v3 }
 0xb0f   : > { %v5452_v6 = vpop.eup %5451 }
 0xb10   : > { %v3365_v7 = vmul.f32 %v5452_v6, %v3363_v3  ;;  %vm3371_vm9 = vweird.f32 %v5452_v6 }
 0xb11   : > { %vm3372_vm11 = vmor %vm3370_vm10, %vm3371_vm9 }
 0xb12   : > { %v3366_v9 = vmul.f32 %v5452_v6, %v3365_v7 }
 0xb14   : > { %v3367_v10 = vmul.f32 0.5, %v3366_v9 }
 0xb16   : > { %v3368_v12 = vsub.f32 1.5, %v3367_v10 }
 0xb18   : > { %v3369_v13 = vmul.f32 %v5452_v6, %v3368_v12 }
 0xb1a   : > { %v3373_v15 = vsel %vm3372_vm11, %v5452_v6, %v3369_v13 }
 0xb1b   : > { %v3374_v16 = vmul.f32 %v3373_v15, %v3358_v55 }
 0xb1d   : > { %v3378_v18 = vmul.f32 %v5408_v14, %v3374_v16 }
 0xb1f   : > { %v3382_v20 = vadd.f32 %v5409_v17, %v3378_v18 }
 0xb21   : > { %v3383_v1 = vpack.c.bf16 %v3382_v20, %v3382_v20 }
 0xb23   : > { %3462 = vmatmul.bf16.vlgmr.msrb.gmra.mxu0 %v3383_v1 }
 0xba0   : > { %v3463_v24 = vpop.f32.mrf.mxu0 }
 0xba1   : > { %v3464_v25 = vadd.f32 %v5410_v23, %v3463_v24 }
 0xba3   : > { %v3467_v26 = vmax.f32 %v3464_v25, 0.0 }
 0xba5   : > { %v3468_v27 = vpack.c.bf16 %v3467_v26, %v3467_v26 }
 0xba7   : > { %3547 = vmatmul.bf16.vlgmr.msra.gmra.mxu1 %v3468_v27 }
 0xba8   : > { %v3465_v28 = vpop.f32.mrf.mxu0 }
 0xc24   : > { %v3548_v31 = vpop.f32.mrf.mxu1 }
 0xc25   : > { %v3549_v32 = vadd.f32 %v5411_v30, %v3548_v31 }
 0xc27   : > { %v3552_v33 = vadd.f32 %v3549_v32, %v3382_v20 }
 0xc29   : > { %3557 = vadd.xlane.f32.xlu1 %v3552_v33 }
 0xc2c   : > { %v3550_v35 = vpop.f32.mrf.mxu1 }
 0xc9c   : > { %v3558_v37 = vpop.xlane.xlu1 %3557 }
 0xc9d   : > { %v3559_v38 = vmul.f32 0.03125, %v3558_v37 }
 0xc9f   : > { %v3560_v39 = vsub.f32 %v3552_v33, %v3559_v38 }
 0xca1   : > { %v3561_v40 = vsel %vm560_vm2, %v3560_v39, 0.0 }
 0xca2   : > { %v3562_v41 = vmul.f32 %v3561_v40, %v3561_v40 }
 0xca4   : > { %3563 = vadd.xlane.f32.xlu2 %v3562_v41 }
 0xd17   : > { %v3564_v47 = vpop.xlane.xlu2 %3563 }
 0xd18   : > { %v3565_v48 = vmul.f32 0.03125, %v3564_v47 }
 0xd1a   : > { %v3566_v49 = vadd.f32 1e-05, %v3565_v48 }
 0xd1c   : > { %5453 = vrsqrt.f32 %v3566_v49  ;;  %vm3573_vm13 = vweird.f32 %v3566_v49 }
 0xd22   : > { %v5454_v52 = vpop.eup %5453 }
 0xd23   : > { %v3568_v50 = vmul.f32 %v5454_v52, %v3566_v49  ;;  %vm3574_vm12 = vweird.f32 %v5454_v52 }
 0xd24   : > { %vm3575_vm14 = vmor %vm3573_vm13, %vm3574_vm12 }
 0xd25   : > { %v3569_v53 = vmul.f32 %v5454_v52, %v3568_v50 }
 0xd27   : > { %v3570_v54 = vmul.f32 0.5, %v3569_v53 }
 0xd29   : > { %v3571_v55 = vsub.f32 1.5, %v3570_v54 }
 0xd2b   : > { %v3572_v56 = vmul.f32 %v5454_v52, %v3571_v55 }
 0xd2d   : > { %v3576_v34 = vsel %vm3575_vm14, %v5454_v52, %v3572_v56 }
 0xd2e   : > { %v3577_v51 = vmul.f32 %v3576_v34, %v3561_v40 }
 0xd30   : > { %v3581_v59 = vmul.f32 %v5412_v57, %v3577_v51 }
 0xd32   : > { %v3585_v60 = vadd.f32 %v5413_v58, %v3581_v59 }
 0xd34   : > { %v3586_v61 = vpack.c.bf16 %v3585_v60, %v3585_v60 }
 0xd36   : > { %3663 = vmatmul.bf16.vlgmr.msrb.gmra.mxu2 %v3586_v61 }
 0xdb9   : > { %v3664_v63 = vpop.f32.mrf.mxu2 }
 0xdba   : > { %v3665_v0 = vadd.f32 %v5414_v62, %v3664_v63 }
 0xdbc   : > { %3668 = vst [vmem:[%s552_s18] sm:$0xff] %v3665_v0 }
 0xdbd   : > { %5603 = shalt.err (!%p5600_p8)
}
 0xdbe   : > { %5330 = dma.vmem_to_hbm [thread:$0]  (%p5780_p5), %s3683_s19, 128, %s3685_s27, %s3670_s21  }
 0xdc1   : > { %v3666_v2 = vpop.f32.mrf.mxu2 }
 0xdc2 PF: > { %s6137_s25 = sld [smem:[#allocation18_spill]] }
 0xdc3   : > { %s6138_s26 = sld [smem:[#allocation15_spill]] }
 0xdc8   : > { %p5357_p9 = scmp.ge.s32.totalorder %s6137_s25, 2 }
 0xdc9   : > { %s3696_s1 = sand.u32 1, %s6138_s26  }
 0xdca   : > { %p5346_p10 = pnand %p5357_p9, %p5784_p6  ;;  %s3697_s14 = scalar_lea.sflag [#allocation4], %s3696_s1 }
 0xdcc   : > { %p5347_p11 = pneg %p5346_p10 }
 0xdce   : > { %5633 = dma.done.wait (%p5347_p11), %s3697_s14, 128  }
 0xdcf   : > { %5635 = vsyncadd (%p5347_p11), %s3697_s14, 4294967168  ;;  %s6140_s21 = sld [smem:[#allocation19_spill]] }
 0xdd0   : > { %s6141_s18 = sld [smem:[#allocation16_spill]] }
 0xdd1   : > { %s6142_s19 = sld [smem:[#allocation17_spill]] }
 0xdd2   : > { %s6143_s20 = sld [smem:[#allocation20_spill]] }
 0xdd5   : > { %p28_p12 = scmp.ge.s32.totalorder %s6140_s21, 4  }
 0xdd7   :  { %30 = sbr.rel (!%p28_p12) target bundleno = 11 (0xb), region = 144 }
 0xddc   :  { %3703 = vsyncpa [#allocation3], 1 }
 0xddd   :  { %3705 = vsyncpa [#allocation3 + $0x1], 1 }
 0xdde   :  { %3706 = vsyncpa [#allocation6], 1 }
 0xddf   :  { %3707 = vsyncpa [#allocation9], 1 }
 0xde0   :  { %3708 = vsyncpa [#allocation4], 1 }
 0xde1   :  { %3710 = vsyncpa [#allocation4 + $0x1], 1 }

</bundles_post_ra>
